<compile_context>
chip_gen: v5e
topology: v5e:2x2
jax: 0.10.0
libtpu: 0.0.40
codegen_flags: <defaults>
</compile_context>

<pallas_src>
import jax
import jax.numpy as jnp
from jax import lax
from jax.experimental import pallas as pl
from jax.experimental.pallas import tpu as pltpu


def _lstm_decoder_kernel(x_ref, w_ih_ref, b_ref, w_hh_ref, h0_ref, c0_ref,
                         w_out_ref, b_out_ref,
                         y_ref, hn_ref, cn_ref,
                         gx_ref):
    """Fused input projection + serial LSTM recurrence + Linear(H,1)+Sigmoid head.

    x_ref:     (S*BP, EP)   inputs, batch- and embedding-padded, flattened over (S,B)
    w_ih_ref:  (EP, 4*HP)   input weight, gate order [i,f,o,g], transposed & padded
    b_ref:     (1, 4*HP)    b_ih + b_hh, gate order [i,f,o,g], padded
    w_hh_ref:  (HP, 4*HP)   recurrent weight, gate order [i,f,o,g], transposed & padded
    h0/c0:     (BP, HP)     initial state, zero-padded beyond (B, H)
    w_out_ref: (HP, 128)    head weight; real logit lives in column 0
    b_out_ref: (1, 128)
    y_ref:     (BP, 128)    lane-dense sigmoid output slab (col 0 is real)
    hn/cn:     (BP, HP)
    gx_ref:    (S*BP, 4*HP) VMEM scratch for the precomputed input projection
    """
    BP, HP = h0_ref.shape
    S = x_ref.shape[0] // BP

    # ---- Prologue (no serial dependency): input projection for all timesteps ----
    # One big (S*BP, EP) @ (EP, 4*HP) matmul; stays entirely in VMEM.
    gx_ref[...] = (jnp.dot(x_ref[...], w_ih_ref[...],
                           preferred_element_type=jnp.float32) + b_ref[...])

    def step(t, carry):
        h, c = carry
        row = pl.multiple_of(t * BP, BP)            # 8-sublane-aligned slice start
        # Only the recurrent matmul sits on the serial dependency chain.
        gates = gx_ref[pl.ds(row, BP), :] + jnp.dot(
            h, w_hh_ref[...], preferred_element_type=jnp.float32)
        # Gate order [i, f, o, g]: one contiguous sigmoid slab + one tanh slab.
        sg = jax.nn.sigmoid(gates[:, :3 * HP])
        g_g = jnp.tanh(gates[:, 3 * HP:])
        i_g = sg[:, 0 * HP:1 * HP]
        f_g = sg[:, 1 * HP:2 * HP]
        o_g = sg[:, 2 * HP:3 * HP]
        c_new = f_g * c + i_g * g_g
        h_new = o_g * jnp.tanh(c_new)
        return (h_new, c_new)

    # Fully unrolled short fixed-length recurrence; h/c live in vregs.
    h, c = lax.fori_loop(0, S, step, (h0_ref[...], c0_ref[...]), unroll=True)

    hn_ref[...] = h
    cn_ref[...] = c

    # Linear(H, 1) + Sigmoid on lstm_out[-1], emitted as a lane-dense slab.
    logit = jnp.dot(h, w_out_ref[...],
                    preferred_element_type=jnp.float32) + b_out_ref[...]
    y_ref[...] = jax.nn.sigmoid(logit)


def decoder_lstm_forward(inputs, hidden, params):
    """inputs: (S, B, E) float32; hidden: (h0, c0) each (1, B, H)."""
    S, B, E = inputs.shape
    h0, c0 = hidden
    H = h0.shape[-1]

    HP = ((H + 127) // 128) * 128       # lane-aligned padded hidden size
    EP = ((E + 127) // 128) * 128       # lane-aligned padded embedding size
    BP = ((B + 7) // 8) * 8             # sublane-aligned padded batch
    OUTP = 128                          # lane-dense output slab width
    G = 4 * HP
    GATE_PERM = jnp.array([0, 1, 3, 2])  # PyTorch [i,f,g,o] -> kernel [i,f,o,g]

    def prep_gate_weight(w, k_pad):
        # w: (4H, K), PyTorch row order [W_i; W_f; W_g; W_o]  ->  (k_pad, 4*HP)
        k = w.shape[1]
        w4 = w.reshape(4, H, k)[GATE_PERM]                       # [i, f, o, g]
        w4 = jnp.pad(w4, ((0, 0), (0, HP - H), (0, k_pad - k)))  # (4, HP, k_pad)
        return jnp.transpose(w4, (2, 0, 1)).reshape(k_pad, G)

    def prep_gate_bias(b):
        b4 = b.reshape(4, H)[GATE_PERM]
        b4 = jnp.pad(b4, ((0, 0), (0, HP - H)))
        return b4.reshape(1, G)

    # Parameter / input prep (pure layout plumbing) in plain JAX.
    w_ih_t = prep_gate_weight(params["w_ih"], EP)                  # (EP, 4*HP)
    w_hh_t = prep_gate_weight(params["w_hh"], HP)                  # (HP, 4*HP)
    b = prep_gate_bias(params["b_ih"] + params["b_hh"])            # (1, 4*HP)
    w_out_t = jnp.pad(params["w_out"].T,
                      ((0, HP - H), (0, OUTP - 1)))                # (HP, OUTP)
    b_out = jnp.pad(params["b_out"].reshape(1, 1),
                    ((0, 0), (0, OUTP - 1)))                       # (1, OUTP)
    h0p = jnp.pad(h0.reshape(B, H), ((0, BP - B), (0, HP - H)))    # (BP, HP)
    c0p = jnp.pad(c0.reshape(B, H), ((0, BP - B), (0, HP - H)))    # (BP, HP)
    x2d = jnp.pad(inputs, ((0, 0), (0, BP - B), (0, EP - E))
                  ).reshape(S * BP, EP)                            # (S*BP, EP)

    # Scoped-VMEM budget: actual footprint (inputs double-buffered is irrelevant here
    # since there is no grid, but leave 2x headroom), clamped to a sane range.
    footprint = 4 * (x2d.size + w_ih_t.size + w_hh_t.size + b.size
                     + h0p.size + c0p.size + w_out_t.size + b_out.size
                     + BP * OUTP + 2 * BP * HP + S * BP * G)
    vmem_limit = int(min(max(2 * footprint, 4 * 1024 * 1024), 64 * 1024 * 1024))

    # Single kernel invocation: whole arrays resident in VMEM, no grid.
    y_slab, h_n, c_n = pl.pallas_call(
        _lstm_decoder_kernel,
        out_shape=(
            jax.ShapeDtypeStruct((BP, OUTP), jnp.float32),
            jax.ShapeDtypeStruct((BP, HP), jnp.float32),
            jax.ShapeDtypeStruct((BP, HP), jnp.float32),
        ),
        scratch_shapes=[pltpu.VMEM((S * BP, G), jnp.float32)],
        compiler_params=pltpu.CompilerParams(vmem_limit_bytes=vmem_limit),
    )(x2d, w_ih_t, b, w_hh_t, h0p, c0p, w_out_t, b_out)

    y = y_slab[:B, :1]                                             # (B, 1)
    return y, (h_n[:B, :H].reshape(1, B, H), c_n[:B, :H].reshape(1, B, H))


def decoder_lstm_reference(inputs, hidden, params):
    """Pure-JAX reference replicating PyTorch nn.LSTM semantics."""
    h = hidden[0][0]
    c = hidden[1][0]
    H = h.shape[-1]

    def step(carry, x_t):
        h, c = carry
        gates = (x_t @ params["w_ih"].T + params["b_ih"]
                 + h @ params["w_hh"].T + params["b_hh"])
        i = jax.nn.sigmoid(gates[:, 0 * H:1 * H])
        f = jax.nn.sigmoid(gates[:, 1 * H:2 * H])
        g = jnp.tanh(gates[:, 2 * H:3 * H])
        o = jax.nn.sigmoid(gates[:, 3 * H:4 * H])
        c = f * c + i * g
        h = o * jnp.tanh(c)
        return (h, c), h

    (h, c), hs = lax.scan(step, (h, c), inputs)
    x = hs[-1] @ params["w_out"].T + params["b_out"]
    return jax.nn.sigmoid(x), (h[None], c[None])


def init_params(key, embedding_dim, hidden_dim):
    """Deterministic init mimicking PyTorch's uniform(-1/sqrt(H), 1/sqrt(H))."""
    ks = jax.random.split(key, 6)
    bound = 1.0 / jnp.sqrt(jnp.float32(hidden_dim))
    u = lambda k, s: jax.random.uniform(k, s, jnp.float32, -bound, bound)
    return {
        "w_ih": u(ks[0], (4 * hidden_dim, embedding_dim)),
        "w_hh": u(ks[1], (4 * hidden_dim, hidden_dim)),
        "b_ih": u(ks[2], (4 * hidden_dim,)),
        "b_hh": u(ks[3], (4 * hidden_dim,)),
        "w_out": u(ks[4], (1, hidden_dim)),
        "b_out": u(ks[5], (1,)),
    }


if __name__ == "__main__":
    SEQ, BATCH, EMB, HID = 8, 4, 16, 32

    key = jax.random.PRNGKey(0)
    k_in, k_h, k_c, k_p = jax.random.split(key, 4)

    inputs = jax.random.normal(k_in, (SEQ, BATCH, EMB), jnp.float32)
    h0 = jax.random.normal(k_h, (1, BATCH, HID), jnp.float32)
    c0 = jax.random.normal(k_c, (1, BATCH, HID), jnp.float32)
    params = init_params(k_p, EMB, HID)

    y, (h_n, c_n) = decoder_lstm_forward(inputs, (h0, c0), params)
    jax.block_until_ready((y, h_n, c_n))

    y_ref, (h_ref, c_ref) = decoder_lstm_reference(inputs, (h0, c0), params)
    assert jnp.allclose(y, y_ref, atol=1e-5, rtol=1e-5)
    assert jnp.allclose(h_n, h_ref, atol=1e-5, rtol=1e-5)
    assert jnp.allclose(c_n, c_ref, atol=1e-5, rtol=1e-5)

    print("KERNEL_OK")
</pallas_src>

<mosaic_0001>
module attributes {stable_mosaic.version = 11 : i64} {
  func.func @_lstm_decoder_kernel(%arg0: memref<64x128xf32, #tpu.memory_space<vmem>>, %arg1: memref<128x512xf32, #tpu.memory_space<vmem>>, %arg2: memref<1x512xf32, #tpu.memory_space<vmem>>, %arg3: memref<128x512xf32, #tpu.memory_space<vmem>>, %arg4: memref<8x128xf32, #tpu.memory_space<vmem>>, %arg5: memref<8x128xf32, #tpu.memory_space<vmem>>, %arg6: memref<128x128xf32, #tpu.memory_space<vmem>>, %arg7: memref<1x128xf32, #tpu.memory_space<vmem>>, %arg8: memref<8x128xf32, #tpu.memory_space<vmem>>, %arg9: memref<8x128xf32, #tpu.memory_space<vmem>>, %arg10: memref<8x128xf32, #tpu.memory_space<vmem>>, %arg11: memref<64x512xf32, #tpu.memory_space<vmem>>) attributes {dimension_semantics = [], scalar_prefetch = 0 : i64, scratch_operands = 1 : i64, tpu.core_type = #tpu.core_type<tc>} {
    %c0 = arith.constant 0 : index
    %c0_0 = arith.constant 0 : index
    %0 = vector.load %arg0[%c0, %c0_0] : memref<64x128xf32, #tpu.memory_space<vmem>>, vector<64x128xf32>
    %c0_1 = arith.constant 0 : index
    %c0_2 = arith.constant 0 : index
    %1 = vector.load %arg1[%c0_1, %c0_2] : memref<128x512xf32, #tpu.memory_space<vmem>>, vector<128x512xf32>
    %cst = arith.constant dense<0.000000e+00> : vector<64x512xf32>
    %2 = tpu.matmul %0, %1, %cst {dimension_numbers = #tpu.dot_dimension_numbers<[1], [0], [0], [1], [0, 0, 1, 1], [], []>} : vector<64x128xf32>, vector<128x512xf32>, vector<64x512xf32> -> vector<64x512xf32>
    %c0_3 = arith.constant 0 : index
    %c0_4 = arith.constant 0 : index
    %3 = vector.load %arg2[%c0_3, %c0_4] : memref<1x512xf32, #tpu.memory_space<vmem>>, vector<1x512xf32>
    %4 = vector.broadcast %3 : vector<1x512xf32> to vector<64x512xf32>
    %5 = arith.addf %2, %4 : vector<64x512xf32>
    %c0_5 = arith.constant 0 : index
    %c0_6 = arith.constant 0 : index
    %6 = vector.load %arg11[%c0_5, %c0_6] : memref<64x512xf32, #tpu.memory_space<vmem>>, vector<64x512xf32>
    tpu.vector_store %arg11[%c0_5, %c0_6], %5 {strides = array<i32>} : memref<64x512xf32, #tpu.memory_space<vmem>>, vector<64x512xf32>,
    %c0_7 = arith.constant 0 : index
    %c0_8 = arith.constant 0 : index
    %7 = vector.load %arg4[%c0_7, %c0_8] : memref<8x128xf32, #tpu.memory_space<vmem>>, vector<8x128xf32>
    %c0_9 = arith.constant 0 : index
    %c0_10 = arith.constant 0 : index
    %8 = vector.load %arg5[%c0_9, %c0_10] : memref<8x128xf32, #tpu.memory_space<vmem>>, vector<8x128xf32>
    %c0_i32 = arith.constant 0 : i32
    %c8_i32 = arith.constant 8 : i32
    %9 = arith.muli %c0_i32, %c8_i32 : i32
    %10 = tpu.assume_multiple %9, 8 : i32
    %11 = arith.index_cast %10 : i32 to index
    %c0_11 = arith.constant 0 : index
    %12 = vector.load %arg11[%11, %c0_11] : memref<64x512xf32, #tpu.memory_space<vmem>>, vector<8x512xf32>
    %c0_12 = arith.constant 0 : index
    %c0_13 = arith.constant 0 : index
    %13 = vector.load %arg3[%c0_12, %c0_13] : memref<128x512xf32, #tpu.memory_space<vmem>>, vector<128x512xf32>
    %cst_14 = arith.constant dense<0.000000e+00> : vector<8x512xf32>
    %14 = tpu.matmul %7, %13, %cst_14 {dimension_numbers = #tpu.dot_dimension_numbers<[1], [0], [0], [1], [0, 0, 1, 1], [], []>} : vector<8x128xf32>, vector<128x512xf32>, vector<8x512xf32> -> vector<8x512xf32>
    %15 = arith.addf %12, %14 : vector<8x512xf32>
    %16 = vector.extract_strided_slice %15 {offsets = [0, 0], sizes = [8, 384], strides = [1, 1]} : vector<8x512xf32> to vector<8x384xf32>
    %17 = arith.negf %16 : vector<8x384xf32>
    %18 = math.exp %17 : vector<8x384xf32>
    %cst_15 = arith.constant 1.000000e+00 : f32
    %19 = vector.broadcast %cst_15 : f32 to vector<8x384xf32>
    %20 = arith.addf %19, %18 : vector<8x384xf32>
    %21 = arith.divf %19, %20 : vector<8x384xf32>
    %22 = vector.extract_strided_slice %15 {offsets = [0, 384], sizes = [8, 128], strides = [1, 1]} : vector<8x512xf32> to vector<8x128xf32>
    %23 = math.tanh %22 : vector<8x128xf32>
    %24 = vector.extract_strided_slice %21 {offsets = [0, 0], sizes = [8, 128], strides = [1, 1]} : vector<8x384xf32> to vector<8x128xf32>
    %25 = vector.extract_strided_slice %21 {offsets = [0, 128], sizes = [8, 128], strides = [1, 1]} : vector<8x384xf32> to vector<8x128xf32>
    %26 = vector.extract_strided_slice %21 {offsets = [0, 256], sizes = [8, 128], strides = [1, 1]} : vector<8x384xf32> to vector<8x128xf32>
    %27 = arith.mulf %25, %8 : vector<8x128xf32>
    %28 = arith.mulf %24, %23 : vector<8x128xf32>
    %29 = arith.addf %27, %28 : vector<8x128xf32>
    %30 = math.tanh %29 : vector<8x128xf32>
    %31 = arith.mulf %26, %30 : vector<8x128xf32>
    %c1_i32 = arith.constant 1 : i32
    %c8_i32_16 = arith.constant 8 : i32
    %32 = arith.muli %c1_i32, %c8_i32_16 : i32
    %33 = tpu.assume_multiple %32, 8 : i32
    %34 = arith.index_cast %33 : i32 to index
    %c0_17 = arith.constant 0 : index
    %35 = vector.load %arg11[%34, %c0_17] : memref<64x512xf32, #tpu.memory_space<vmem>>, vector<8x512xf32>
    %c0_18 = arith.constant 0 : index
    %c0_19 = arith.constant 0 : index
    %36 = vector.load %arg3[%c0_18, %c0_19] : memref<128x512xf32, #tpu.memory_space<vmem>>, vector<128x512xf32>
    %cst_20 = arith.constant dense<0.000000e+00> : vector<8x512xf32>
    %37 = tpu.matmul %31, %36, %cst_20 {dimension_numbers = #tpu.dot_dimension_numbers<[1], [0], [0], [1], [0, 0, 1, 1], [], []>} : vector<8x128xf32>, vector<128x512xf32>, vector<8x512xf32> -> vector<8x512xf32>
    %38 = arith.addf %35, %37 : vector<8x512xf32>
    %39 = vector.extract_strided_slice %38 {offsets = [0, 0], sizes = [8, 384], strides = [1, 1]} : vector<8x512xf32> to vector<8x384xf32>
    %40 = arith.negf %39 : vector<8x384xf32>
    %41 = math.exp %40 : vector<8x384xf32>
    %cst_21 = arith.constant 1.000000e+00 : f32
    %42 = vector.broadcast %cst_21 : f32 to vector<8x384xf32>
    %43 = arith.addf %42, %41 : vector<8x384xf32>
    %44 = arith.divf %42, %43 : vector<8x384xf32>
    %45 = vector.extract_strided_slice %38 {offsets = [0, 384], sizes = [8, 128], strides = [1, 1]} : vector<8x512xf32> to vector<8x128xf32>
    %46 = math.tanh %45 : vector<8x128xf32>
    %47 = vector.extract_strided_slice %44 {offsets = [0, 0], sizes = [8, 128], strides = [1, 1]} : vector<8x384xf32> to vector<8x128xf32>
    %48 = vector.extract_strided_slice %44 {offsets = [0, 128], sizes = [8, 128], strides = [1, 1]} : vector<8x384xf32> to vector<8x128xf32>
    %49 = vector.extract_strided_slice %44 {offsets = [0, 256], sizes = [8, 128], strides = [1, 1]} : vector<8x384xf32> to vector<8x128xf32>
    %50 = arith.mulf %48, %29 : vector<8x128xf32>
    %51 = arith.mulf %47, %46 : vector<8x128xf32>
    %52 = arith.addf %50, %51 : vector<8x128xf32>
    %53 = math.tanh %52 : vector<8x128xf32>
    %54 = arith.mulf %49, %53 : vector<8x128xf32>
    %c2_i32 = arith.constant 2 : i32
    %c8_i32_22 = arith.constant 8 : i32
    %55 = arith.muli %c2_i32, %c8_i32_22 : i32
    %56 = tpu.assume_multiple %55, 8 : i32
    %57 = arith.index_cast %56 : i32 to index
    %c0_23 = arith.constant 0 : index
    %58 = vector.load %arg11[%57, %c0_23] : memref<64x512xf32, #tpu.memory_space<vmem>>, vector<8x512xf32>
    %c0_24 = arith.constant 0 : index
    %c0_25 = arith.constant 0 : index
    %59 = vector.load %arg3[%c0_24, %c0_25] : memref<128x512xf32, #tpu.memory_space<vmem>>, vector<128x512xf32>
    %cst_26 = arith.constant dense<0.000000e+00> : vector<8x512xf32>
    %60 = tpu.matmul %54, %59, %cst_26 {dimension_numbers = #tpu.dot_dimension_numbers<[1], [0], [0], [1], [0, 0, 1, 1], [], []>} : vector<8x128xf32>, vector<128x512xf32>, vector<8x512xf32> -> vector<8x512xf32>
    %61 = arith.addf %58, %60 : vector<8x512xf32>
    %62 = vector.extract_strided_slice %61 {offsets = [0, 0], sizes = [8, 384], strides = [1, 1]} : vector<8x512xf32> to vector<8x384xf32>
    %63 = arith.negf %62 : vector<8x384xf32>
    %64 = math.exp %63 : vector<8x384xf32>
    %cst_27 = arith.constant 1.000000e+00 : f32
    %65 = vector.broadcast %cst_27 : f32 to vector<8x384xf32>
    %66 = arith.addf %65, %64 : vector<8x384xf32>
    %67 = arith.divf %65, %66 : vector<8x384xf32>
    %68 = vector.extract_strided_slice %61 {offsets = [0, 384], sizes = [8, 128], strides = [1, 1]} : vector<8x512xf32> to vector<8x128xf32>
    %69 = math.tanh %68 : vector<8x128xf32>
    %70 = vector.extract_strided_slice %67 {offsets = [0, 0], sizes = [8, 128], strides = [1, 1]} : vector<8x384xf32> to vector<8x128xf32>
    %71 = vector.extract_strided_slice %67 {offsets = [0, 128], sizes = [8, 128], strides = [1, 1]} : vector<8x384xf32> to vector<8x128xf32>
    %72 = vector.extract_strided_slice %67 {offsets = [0, 256], sizes = [8, 128], strides = [1, 1]} : vector<8x384xf32> to vector<8x128xf32>
    %73 = arith.mulf %71, %52 : vector<8x128xf32>
    %74 = arith.mulf %70, %69 : vector<8x128xf32>
    %75 = arith.addf %73, %74 : vector<8x128xf32>
    %76 = math.tanh %75 : vector<8x128xf32>
    %77 = arith.mulf %72, %76 : vector<8x128xf32>
    %c3_i32 = arith.constant 3 : i32
    %c8_i32_28 = arith.constant 8 : i32
    %78 = arith.muli %c3_i32, %c8_i32_28 : i32
    %79 = tpu.assume_multiple %78, 8 : i32
    %80 = arith.index_cast %79 : i32 to index
    %c0_29 = arith.constant 0 : index
    %81 = vector.load %arg11[%80, %c0_29] : memref<64x512xf32, #tpu.memory_space<vmem>>, vector<8x512xf32>
    %c0_30 = arith.constant 0 : index
    %c0_31 = arith.constant 0 : index
    %82 = vector.load %arg3[%c0_30, %c0_31] : memref<128x512xf32, #tpu.memory_space<vmem>>, vector<128x512xf32>
    %cst_32 = arith.constant dense<0.000000e+00> : vector<8x512xf32>
    %83 = tpu.matmul %77, %82, %cst_32 {dimension_numbers = #tpu.dot_dimension_numbers<[1], [0], [0], [1], [0, 0, 1, 1], [], []>} : vector<8x128xf32>, vector<128x512xf32>, vector<8x512xf32> -> vector<8x512xf32>
    %84 = arith.addf %81, %83 : vector<8x512xf32>
    %85 = vector.extract_strided_slice %84 {offsets = [0, 0], sizes = [8, 384], strides = [1, 1]} : vector<8x512xf32> to vector<8x384xf32>
    %86 = arith.negf %85 : vector<8x384xf32>
    %87 = math.exp %86 : vector<8x384xf32>
    %cst_33 = arith.constant 1.000000e+00 : f32
    %88 = vector.broadcast %cst_33 : f32 to vector<8x384xf32>
    %89 = arith.addf %88, %87 : vector<8x384xf32>
    %90 = arith.divf %88, %89 : vector<8x384xf32>
    %91 = vector.extract_strided_slice %84 {offsets = [0, 384], sizes = [8, 128], strides = [1, 1]} : vector<8x512xf32> to vector<8x128xf32>
    %92 = math.tanh %91 : vector<8x128xf32>
    %93 = vector.extract_strided_slice %90 {offsets = [0, 0], sizes = [8, 128], strides = [1, 1]} : vector<8x384xf32> to vector<8x128xf32>
    %94 = vector.extract_strided_slice %90 {offsets = [0, 128], sizes = [8, 128], strides = [1, 1]} : vector<8x384xf32> to vector<8x128xf32>
    %95 = vector.extract_strided_slice %90 {offsets = [0, 256], sizes = [8, 128], strides = [1, 1]} : vector<8x384xf32> to vector<8x128xf32>
    %96 = arith.mulf %94, %75 : vector<8x128xf32>
    %97 = arith.mulf %93, %92 : vector<8x128xf32>
    %98 = arith.addf %96, %97 : vector<8x128xf32>
    %99 = math.tanh %98 : vector<8x128xf32>
    %100 = arith.mulf %95, %99 : vector<8x128xf32>
    %c4_i32 = arith.constant 4 : i32
    %c8_i32_34 = arith.constant 8 : i32
    %101 = arith.muli %c4_i32, %c8_i32_34 : i32
    %102 = tpu.assume_multiple %101, 8 : i32
    %103 = arith.index_cast %102 : i32 to index
    %c0_35 = arith.constant 0 : index
    %104 = vector.load %arg11[%103, %c0_35] : memref<64x512xf32, #tpu.memory_space<vmem>>, vector<8x512xf32>
    %c0_36 = arith.constant 0 : index
    %c0_37 = arith.constant 0 : index
    %105 = vector.load %arg3[%c0_36, %c0_37] : memref<128x512xf32, #tpu.memory_space<vmem>>, vector<128x512xf32>
    %cst_38 = arith.constant dense<0.000000e+00> : vector<8x512xf32>
    %106 = tpu.matmul %100, %105, %cst_38 {dimension_numbers = #tpu.dot_dimension_numbers<[1], [0], [0], [1], [0, 0, 1, 1], [], []>} : vector<8x128xf32>, vector<128x512xf32>, vector<8x512xf32> -> vector<8x512xf32>
    %107 = arith.addf %104, %106 : vector<8x512xf32>
    %108 = vector.extract_strided_slice %107 {offsets = [0, 0], sizes = [8, 384], strides = [1, 1]} : vector<8x512xf32> to vector<8x384xf32>
    %109 = arith.negf %108 : vector<8x384xf32>
    %110 = math.exp %109 : vector<8x384xf32>
    %cst_39 = arith.constant 1.000000e+00 : f32
    %111 = vector.broadcast %cst_39 : f32 to vector<8x384xf32>
    %112 = arith.addf %111, %110 : vector<8x384xf32>
    %113 = arith.divf %111, %112 : vector<8x384xf32>
    %114 = vector.extract_strided_slice %107 {offsets = [0, 384], sizes = [8, 128], strides = [1, 1]} : vector<8x512xf32> to vector<8x128xf32>
    %115 = math.tanh %114 : vector<8x128xf32>
    %116 = vector.extract_strided_slice %113 {offsets = [0, 0], sizes = [8, 128], strides = [1, 1]} : vector<8x384xf32> to vector<8x128xf32>
    %117 = vector.extract_strided_slice %113 {offsets = [0, 128], sizes = [8, 128], strides = [1, 1]} : vector<8x384xf32> to vector<8x128xf32>
    %118 = vector.extract_strided_slice %113 {offsets = [0, 256], sizes = [8, 128], strides = [1, 1]} : vector<8x384xf32> to vector<8x128xf32>
    %119 = arith.mulf %117, %98 : vector<8x128xf32>
    %120 = arith.mulf %116, %115 : vector<8x128xf32>
    %121 = arith.addf %119, %120 : vector<8x128xf32>
    %122 = math.tanh %121 : vector<8x128xf32>
    %123 = arith.mulf %118, %122 : vector<8x128xf32>
    %c5_i32 = arith.constant 5 : i32
    %c8_i32_40 = arith.constant 8 : i32
    %124 = arith.muli %c5_i32, %c8_i32_40 : i32
    %125 = tpu.assume_multiple %124, 8 : i32
    %126 = arith.index_cast %125 : i32 to index
    %c0_41 = arith.constant 0 : index
    %127 = vector.load %arg11[%126, %c0_41] : memref<64x512xf32, #tpu.memory_space<vmem>>, vector<8x512xf32>
    %c0_42 = arith.constant 0 : index
    %c0_43 = arith.constant 0 : index
    %128 = vector.load %arg3[%c0_42, %c0_43] : memref<128x512xf32, #tpu.memory_space<vmem>>, vector<128x512xf32>
    %cst_44 = arith.constant dense<0.000000e+00> : vector<8x512xf32>
    %129 = tpu.matmul %123, %128, %cst_44 {dimension_numbers = #tpu.dot_dimension_numbers<[1], [0], [0], [1], [0, 0, 1, 1], [], []>} : vector<8x128xf32>, vector<128x512xf32>, vector<8x512xf32> -> vector<8x512xf32>
    %130 = arith.addf %127, %129 : vector<8x512xf32>
    %131 = vector.extract_strided_slice %130 {offsets = [0, 0], sizes = [8, 384], strides = [1, 1]} : vector<8x512xf32> to vector<8x384xf32>
    %132 = arith.negf %131 : vector<8x384xf32>
    %133 = math.exp %132 : vector<8x384xf32>
    %cst_45 = arith.constant 1.000000e+00 : f32
    %134 = vector.broadcast %cst_45 : f32 to vector<8x384xf32>
    %135 = arith.addf %134, %133 : vector<8x384xf32>
    %136 = arith.divf %134, %135 : vector<8x384xf32>
    %137 = vector.extract_strided_slice %130 {offsets = [0, 384], sizes = [8, 128], strides = [1, 1]} : vector<8x512xf32> to vector<8x128xf32>
    %138 = math.tanh %137 : vector<8x128xf32>
    %139 = vector.extract_strided_slice %136 {offsets = [0, 0], sizes = [8, 128], strides = [1, 1]} : vector<8x384xf32> to vector<8x128xf32>
    %140 = vector.extract_strided_slice %136 {offsets = [0, 128], sizes = [8, 128], strides = [1, 1]} : vector<8x384xf32> to vector<8x128xf32>
    %141 = vector.extract_strided_slice %136 {offsets = [0, 256], sizes = [8, 128], strides = [1, 1]} : vector<8x384xf32> to vector<8x128xf32>
    %142 = arith.mulf %140, %121 : vector<8x128xf32>
    %143 = arith.mulf %139, %138 : vector<8x128xf32>
    %144 = arith.addf %142, %143 : vector<8x128xf32>
    %145 = math.tanh %144 : vector<8x128xf32>
    %146 = arith.mulf %141, %145 : vector<8x128xf32>
    %c6_i32 = arith.constant 6 : i32
    %c8_i32_46 = arith.constant 8 : i32
    %147 = arith.muli %c6_i32, %c8_i32_46 : i32
    %148 = tpu.assume_multiple %147, 8 : i32
    %149 = arith.index_cast %148 : i32 to index
    %c0_47 = arith.constant 0 : index
    %150 = vector.load %arg11[%149, %c0_47] : memref<64x512xf32, #tpu.memory_space<vmem>>, vector<8x512xf32>
    %c0_48 = arith.constant 0 : index
    %c0_49 = arith.constant 0 : index
    %151 = vector.load %arg3[%c0_48, %c0_49] : memref<128x512xf32, #tpu.memory_space<vmem>>, vector<128x512xf32>
    %cst_50 = arith.constant dense<0.000000e+00> : vector<8x512xf32>
    %152 = tpu.matmul %146, %151, %cst_50 {dimension_numbers = #tpu.dot_dimension_numbers<[1], [0], [0], [1], [0, 0, 1, 1], [], []>} : vector<8x128xf32>, vector<128x512xf32>, vector<8x512xf32> -> vector<8x512xf32>
    %153 = arith.addf %150, %152 : vector<8x512xf32>
    %154 = vector.extract_strided_slice %153 {offsets = [0, 0], sizes = [8, 384], strides = [1, 1]} : vector<8x512xf32> to vector<8x384xf32>
    %155 = arith.negf %154 : vector<8x384xf32>
    %156 = math.exp %155 : vector<8x384xf32>
    %cst_51 = arith.constant 1.000000e+00 : f32
    %157 = vector.broadcast %cst_51 : f32 to vector<8x384xf32>
    %158 = arith.addf %157, %156 : vector<8x384xf32>
    %159 = arith.divf %157, %158 : vector<8x384xf32>
    %160 = vector.extract_strided_slice %153 {offsets = [0, 384], sizes = [8, 128], strides = [1, 1]} : vector<8x512xf32> to vector<8x128xf32>
    %161 = math.tanh %160 : vector<8x128xf32>
    %162 = vector.extract_strided_slice %159 {offsets = [0, 0], sizes = [8, 128], strides = [1, 1]} : vector<8x384xf32> to vector<8x128xf32>
    %163 = vector.extract_strided_slice %159 {offsets = [0, 128], sizes = [8, 128], strides = [1, 1]} : vector<8x384xf32> to vector<8x128xf32>
    %164 = vector.extract_strided_slice %159 {offsets = [0, 256], sizes = [8, 128], strides = [1, 1]} : vector<8x384xf32> to vector<8x128xf32>
    %165 = arith.mulf %163, %144 : vector<8x128xf32>
    %166 = arith.mulf %162, %161 : vector<8x128xf32>
    %167 = arith.addf %165, %166 : vector<8x128xf32>
    %168 = math.tanh %167 : vector<8x128xf32>
    %169 = arith.mulf %164, %168 : vector<8x128xf32>
    %c7_i32 = arith.constant 7 : i32
    %c8_i32_52 = arith.constant 8 : i32
    %170 = arith.muli %c7_i32, %c8_i32_52 : i32
    %171 = tpu.assume_multiple %170, 8 : i32
    %172 = arith.index_cast %171 : i32 to index
    %c0_53 = arith.constant 0 : index
    %173 = vector.load %arg11[%172, %c0_53] : memref<64x512xf32, #tpu.memory_space<vmem>>, vector<8x512xf32>
    %c0_54 = arith.constant 0 : index
    %c0_55 = arith.constant 0 : index
    %174 = vector.load %arg3[%c0_54, %c0_55] : memref<128x512xf32, #tpu.memory_space<vmem>>, vector<128x512xf32>
    %cst_56 = arith.constant dense<0.000000e+00> : vector<8x512xf32>
    %175 = tpu.matmul %169, %174, %cst_56 {dimension_numbers = #tpu.dot_dimension_numbers<[1], [0], [0], [1], [0, 0, 1, 1], [], []>} : vector<8x128xf32>, vector<128x512xf32>, vector<8x512xf32> -> vector<8x512xf32>
    %176 = arith.addf %173, %175 : vector<8x512xf32>
    %177 = vector.extract_strided_slice %176 {offsets = [0, 0], sizes = [8, 384], strides = [1, 1]} : vector<8x512xf32> to vector<8x384xf32>
    %178 = arith.negf %177 : vector<8x384xf32>
    %179 = math.exp %178 : vector<8x384xf32>
    %cst_57 = arith.constant 1.000000e+00 : f32
    %180 = vector.broadcast %cst_57 : f32 to vector<8x384xf32>
    %181 = arith.addf %180, %179 : vector<8x384xf32>
    %182 = arith.divf %180, %181 : vector<8x384xf32>
    %183 = vector.extract_strided_slice %176 {offsets = [0, 384], sizes = [8, 128], strides = [1, 1]} : vector<8x512xf32> to vector<8x128xf32>
    %184 = math.tanh %183 : vector<8x128xf32>
    %185 = vector.extract_strided_slice %182 {offsets = [0, 0], sizes = [8, 128], strides = [1, 1]} : vector<8x384xf32> to vector<8x128xf32>
    %186 = vector.extract_strided_slice %182 {offsets = [0, 128], sizes = [8, 128], strides = [1, 1]} : vector<8x384xf32> to vector<8x128xf32>
    %187 = vector.extract_strided_slice %182 {offsets = [0, 256], sizes = [8, 128], strides = [1, 1]} : vector<8x384xf32> to vector<8x128xf32>
    %188 = arith.mulf %186, %167 : vector<8x128xf32>
    %189 = arith.mulf %185, %184 : vector<8x128xf32>
    %190 = arith.addf %188, %189 : vector<8x128xf32>
    %191 = math.tanh %190 : vector<8x128xf32>
    %192 = arith.mulf %187, %191 : vector<8x128xf32>
    %c8_i32_58 = arith.constant 8 : i32
    %c0_59 = arith.constant 0 : index
    %c0_60 = arith.constant 0 : index
    %193 = vector.load %arg9[%c0_59, %c0_60] : memref<8x128xf32, #tpu.memory_space<vmem>>, vector<8x128xf32>
    tpu.vector_store %arg9[%c0_59, %c0_60], %192 {strides = array<i32>} : memref<8x128xf32, #tpu.memory_space<vmem>>, vector<8x128xf32>,
    %c0_61 = arith.constant 0 : index
    %c0_62 = arith.constant 0 : index
    %194 = vector.load %arg10[%c0_61, %c0_62] : memref<8x128xf32, #tpu.memory_space<vmem>>, vector<8x128xf32>
    tpu.vector_store %arg10[%c0_61, %c0_62], %190 {strides = array<i32>} : memref<8x128xf32, #tpu.memory_space<vmem>>, vector<8x128xf32>,
    %c0_63 = arith.constant 0 : index
    %c0_64 = arith.constant 0 : index
    %195 = vector.load %arg6[%c0_63, %c0_64] : memref<128x128xf32, #tpu.memory_space<vmem>>, vector<128x128xf32>
    %cst_65 = arith.constant dense<0.000000e+00> : vector<8x128xf32>
    %196 = tpu.matmul %192, %195, %cst_65 {dimension_numbers = #tpu.dot_dimension_numbers<[1], [0], [0], [1], [0, 0, 1, 1], [], []>} : vector<8x128xf32>, vector<128x128xf32>, vector<8x128xf32> -> vector<8x128xf32>
    %c0_66 = arith.constant 0 : index
    %c0_67 = arith.constant 0 : index
    %197 = vector.load %arg7[%c0_66, %c0_67] : memref<1x128xf32, #tpu.memory_space<vmem>>, vector<1x128xf32>
    %198 = vector.broadcast %197 : vector<1x128xf32> to vector<8x128xf32>
    %199 = arith.addf %196, %198 : vector<8x128xf32>
    %200 = arith.negf %199 : vector<8x128xf32>
    %201 = math.exp %200 : vector<8x128xf32>
    %cst_68 = arith.constant 1.000000e+00 : f32
    %202 = vector.broadcast %cst_68 : f32 to vector<8x128xf32>
    %203 = arith.addf %202, %201 : vector<8x128xf32>
    %204 = arith.divf %202, %203 : vector<8x128xf32>
    %c0_69 = arith.constant 0 : index
    %c0_70 = arith.constant 0 : index
    %205 = vector.load %arg8[%c0_69, %c0_70] : memref<8x128xf32, #tpu.memory_space<vmem>>, vector<8x128xf32>
    tpu.vector_store %arg8[%c0_69, %c0_70], %204 {strides = array<i32>} : memref<8x128xf32, #tpu.memory_space<vmem>>, vector<8x128xf32>,
    return
  }
}

</mosaic_0001>

<bundles_post_ra>
// kernel: tpu_custom_call.1
= control target key start
LH: loop header
LB: loop body
LE: loop exit
PB: predicated region body
PF: predicated region fallthrough
CT: control target
= control target key end

     0   :  { %16 = vsyncpa [#allocation4], 0  ;;  %s3329_s0 = inlined_call_operand.hbm [shape: f32[64,128], index: 0, kind: input, shape index: {}]   ;;  %s3330_s1 = inlined_call_operand.hbm [shape: f32[128,512], index: 1, kind: input, shape index: {}]   ;;  %s3331_s2 = inlined_call_operand.hbm [shape: f32[1,512], index: 2, kind: input, shape index: {}]   ;;  %s3332_s3 = inlined_call_operand.hbm [shape: f32[128,512], index: 3, kind: input, shape index: {}]   ;;  %s3333_s4 = inlined_call_operand.hbm [shape: f32[8,128], index: 4, kind: input, shape index: {}]   ;;  %s3334_s5 = inlined_call_operand.hbm [shape: f32[8,128], index: 5, kind: input, shape index: {}]   ;;  %s3335_s6 = inlined_call_operand.hbm [shape: f32[128,128], index: 6, kind: input, shape index: {}]   ;;  %s3336_s7 = inlined_call_operand.vmem [shape: f32[1,128], index: 7, kind: input, shape index: {}]   ;;  %s3337_s8 = inlined_call_operand.hbm [shape: f32[8,128], index: 8, kind: output, shape index: {0}]   ;;  %s3338_s9 = inlined_call_operand.hbm [shape: f32[8,128], index: 9, kind: output, shape index: {1}]   ;;  %s3339_s10 = inlined_call_operand.hbm [shape: f32[8,128], index: 10, kind: output, shape index: {2}]  }
   0x1   :  { %17 = vsyncpa [#allocation7], 0 }
   0x2   :  { %18 = vsyncpa [#allocation10], 0 }
   0x3   :  { %19 = vsyncpa [#allocation13], 0 }
   0x4   :  { %20 = vsyncpa [#allocation5], 0  ;;  %s39_s15 = sshll.u32 %s3330_s1, 4  ;;  %s40_s15 = int_to_ptr.hbm [resolvable:$true] %s39_s15 }
   0x5   :  { %21 = vsyncpa [#allocation17], 0  ;;  %s2321_s16 = smov [#allocation6]   ;;  %s63_s20 = sshll.u32 %s3332_s3, 4  ;;  %s64_s20 = int_to_ptr.hbm [resolvable:$true] %s63_s20 }
   0x6   :  { %s41_s17 = sshll.u32 %s2321_s16, 4  ;;  %s2322_s21 = smov 512   ;;  %s42_s17 = int_to_ptr.vmem [resolvable:$true] %s41_s17 }
   0x7   :  { %s2323_s22 = smov 32   ;;  %s2324_s23 = smov [#allocation9]  }
   0x8   :  { %47 = dma.hbm_to_vmem [thread:$0]  %s40_s15, 8192, %s42_s17, [#allocation7], %s2322_s21, %s2322_s21, %s2323_s22  }
   0x9   :  { %s65_s24 = sshll.u32 %s2324_s23, 4  ;;  %s88_s27 = sshll.u32 %s3334_s5, 4  ;;  %s66_s24 = int_to_ptr.vmem [resolvable:$true] %s65_s24  ;;  %s89_s27 = int_to_ptr.hbm [resolvable:$true] %s88_s27 }
   0xa   :  { %71 = dma.hbm_to_vmem [thread:$0]  %s64_s20, 8192, %s66_s24, [#allocation10], %s2322_s21, %s2322_s21, %s2323_s22  }
   0xb   :  { %s26_s29 = sshll.u32 %s3329_s0, 4  ;;  %s2325_s30 = smov [#allocation12]   ;;  %s27_s29 = int_to_ptr.hbm [resolvable:$true] %s26_s29 }
   0xc   :  { %s90_s11 = sshll.u32 %s2325_s30, 4  ;;  %s2326_s3 = smov [#allocation3]   ;;  %s91_s11 = int_to_ptr.vmem [resolvable:$true] %s90_s11 }
   0xd   :  { %93 = dma.hbm_to_vmem [thread:$0]  %s89_s27, 128, %s91_s11, [#allocation13]  }
   0xe   :  { %s28_s12 = sshll.u32 %s2326_s3, 4  ;;  %s2327_s13 = smov 128   ;;  %s29_s12 = int_to_ptr.vmem [resolvable:$true] %s28_s12 }
   0xf   :  { %s2328_s14 = smov 8   ;;  %s53_s16 = sshll.u32 %s3331_s2, 4  ;;  %s54_s16 = int_to_ptr.hbm [resolvable:$true] %s53_s16 }
  0x10   :  { %34 = dma.hbm_to_vmem [thread:$0]  %s27_s29, 1024, %s29_s12, [#allocation4], %s2327_s13, %s2327_s13, %s2328_s14  }
  0x11   :  { %s2329_s17 = smov [#allocation8]   ;;  %s77_s20 = sshll.u32 %s3333_s4, 4  ;;  %s78_s20 = int_to_ptr.hbm [resolvable:$true] %s77_s20 }
  0x12   :  { %s55_s18 = sshll.u32 %s2329_s17, 4  ;;  %s2330_s21 = smov [#allocation11]   ;;  %s56_s18 = int_to_ptr.vmem [resolvable:$true] %s55_s18 }
  0x13   :  { %58 = dma.hbm_to_vmem [thread:$0]  %s54_s16, 64, %s56_s18, [#allocation7]  }
  0x14   :  { %s79_s22 = sshll.u32 %s2330_s21, 4  ;;  %s98_s25 = sshll.u32 %s3335_s6, 4  ;;  %s80_s22 = int_to_ptr.vmem [resolvable:$true] %s79_s22  ;;  %s99_s25 = int_to_ptr.hbm [resolvable:$true] %s98_s25 }
  0x15   :  { %82 = dma.hbm_to_vmem [thread:$0]  %s78_s20, 128, %s80_s22, [#allocation10]  }
  0x16   :  { %s2331_s2 = smov [#allocation14]  }
  0x17   :  { %s100_s26 = sshll.u32 %s2331_s2, 4  ;;  %s101_s26 = int_to_ptr.vmem [resolvable:$true] %s100_s26 }
  0x18   :  { %106 = dma.hbm_to_vmem [thread:$0]  %s99_s25, 2048, %s101_s26, [#allocation13], %s2327_s13, %s2327_s13, %s2328_s14  }
  0x19   :  { %2309 = dma.done.wait [#allocation4], 1024  }
  0x1a   :  { %2310 = vsyncadd [#allocation4], 4294966272 }
  0x1b   :  { %2311 = dma.done.wait [#allocation7], 8256  }
  0x1c   :  { %2312 = vsyncadd [#allocation7], 4294959040 }
  0x1d   :  { %2313 = dma.done.wait [#allocation10], 8320  }
  0x1e   :  { %2314 = vsyncadd [#allocation10], 4294958976 }
  0x1f   :  { %2315 = dma.done.wait [#allocation13], 2176  }
  0x20   :  { %2316 = vsyncadd [#allocation13], 4294965120  ;;  %v205_v0 = vld [vmem:[#allocation6 + $0x1e0] sm:$0xff]  ;;  %v206_v1 = vld [vmem:[#allocation6 + $0x1e8] sm:$0xff]  ;;  %s1793_s27 = sshll.u32 %s3338_s9, 4  ;;  %s2332_s1 = smov [#allocation16]   ;;  %s1794_s27 = int_to_ptr.hbm [resolvable:$true] %s1793_s27 }
  0x21   :  { %v207_v2 = vld [vmem:[#allocation6 + $0x1f0] sm:$0xff]  ;;  %219 = vmatpush.msra.mxu0 %v205_v0  ;;  %260 = vmatpush.msra.mxu1 %v206_v1  ;;  %v208_v3 = vld [vmem:[#allocation6 + $0x1f8] sm:$0xff]  ;;  %v201_v4 = vld [vmem:[#allocation6 + $0x1c0] sm:$0xff]  ;;  %s1791_s28 = sshll.u32 %s2332_s1, 4  ;;  %s2333_s29 = smov [#allocation18]   ;;  %s1792_s28 = int_to_ptr.vmem [resolvable:$true] %s1791_s28 }
  0x22   :  { %v202_v5 = vld [vmem:[#allocation6 + $0x1c8] sm:$0xff]  ;;  %301 = vmatpush.msra.mxu2 %v207_v2  ;;  %342 = vmatpush.msra.mxu3 %v208_v3  ;;  %v203_v6 = vld [vmem:[#allocation6 + $0x1d0] sm:$0xff]  ;;  %v204_v7 = vld [vmem:[#allocation6 + $0x1d8] sm:$0xff]  ;;  %s1802_s30 = sshll.u32 %s2333_s29, 4  ;;  %s1804_s12 = sshll.u32 %s3339_s10, 4  ;;  %s1803_s30 = int_to_ptr.vmem [resolvable:$true] %s1802_s30  ;;  %s1805_s12 = int_to_ptr.hbm [resolvable:$true] %s1804_s12 }
  0x23   :  { %v197_v8 = vld [vmem:[#allocation6 + $0x1a0] sm:$0xff]  ;;  %220 = vmatpush.msra.mxu0 %v201_v4  ;;  %261 = vmatpush.msra.mxu1 %v202_v5  ;;  %v198_v9 = vld [vmem:[#allocation6 + $0x1a8] sm:$0xff]  ;;  %v199_v10 = vld [vmem:[#allocation6 + $0x1b0] sm:$0xff]  ;;  %s2334_s9 = smov [#allocation15]  }
  0x24   :  { %v200_v11 = vld [vmem:[#allocation6 + $0x1b8] sm:$0xff]  ;;  %302 = vmatpush.msra.mxu2 %v203_v6  ;;  %343 = vmatpush.msra.mxu3 %v204_v7  ;;  %v193_v12 = vld [vmem:[#allocation6 + $0x180] sm:$0xff]  ;;  %v194_v13 = vld [vmem:[#allocation6 + $0x188] sm:$0xff]  ;;  %s1780_s10 = sshll.u32 %s2334_s9, 4  ;;  %s1781_s10 = int_to_ptr.vmem [resolvable:$true] %s1780_s10 }
  0x25   :  { %221 = vmatpush.msra.mxu0 %v197_v8  ;;  %262 = vmatpush.msra.mxu1 %v198_v9  ;;  %v195_v14 = vld [vmem:[#allocation6 + $0x190] sm:$0xff]  ;;  %v196_v15 = vld [vmem:[#allocation6 + $0x198] sm:$0xff]  ;;  %v189_v16 = vld [vmem:[#allocation6 + $0x160] sm:$0xff] }
  0x26   :  { %303 = vmatpush.msra.mxu2 %v199_v10  ;;  %344 = vmatpush.msra.mxu3 %v200_v11  ;;  %v190_v17 = vld [vmem:[#allocation6 + $0x168] sm:$0xff]  ;;  %v191_v18 = vld [vmem:[#allocation6 + $0x170] sm:$0xff]  ;;  %v192_v19 = vld [vmem:[#allocation6 + $0x178] sm:$0xff] }
  0x27   :  { %222 = vmatpush.msra.mxu0 %v193_v12  ;;  %263 = vmatpush.msra.mxu1 %v194_v13  ;;  %v185_v20 = vld [vmem:[#allocation6 + $0x140] sm:$0xff]  ;;  %v186_v21 = vld [vmem:[#allocation6 + $0x148] sm:$0xff]  ;;  %v187_v22 = vld [vmem:[#allocation6 + $0x150] sm:$0xff] }
  0x28   :  { %304 = vmatpush.msra.mxu2 %v195_v14  ;;  %345 = vmatpush.msra.mxu3 %v196_v15  ;;  %v188_v23 = vld [vmem:[#allocation6 + $0x158] sm:$0xff]  ;;  %v181_v24 = vld [vmem:[#allocation6 + $0x120] sm:$0xff]  ;;  %v182_v25 = vld [vmem:[#allocation6 + $0x128] sm:$0xff] }
  0x29   :  { %223 = vmatpush.msra.mxu0 %v189_v16  ;;  %264 = vmatpush.msra.mxu1 %v190_v17  ;;  %v183_v26 = vld [vmem:[#allocation6 + $0x130] sm:$0xff]  ;;  %v184_v27 = vld [vmem:[#allocation6 + $0x138] sm:$0xff]  ;;  %v177_v28 = vld [vmem:[#allocation6 + $0x100] sm:$0xff] }
  0x2a   :  { %305 = vmatpush.msra.mxu2 %v191_v18  ;;  %346 = vmatpush.msra.mxu3 %v192_v19  ;;  %v178_v29 = vld [vmem:[#allocation6 + $0x108] sm:$0xff]  ;;  %v179_v30 = vld [vmem:[#allocation6 + $0x110] sm:$0xff]  ;;  %v180_v31 = vld [vmem:[#allocation6 + $0x118] sm:$0xff] }
  0x2b   :  { %224 = vmatpush.msra.mxu0 %v185_v20  ;;  %265 = vmatpush.msra.mxu1 %v186_v21  ;;  %v173_v32 = vld [vmem:[#allocation6 + $0xe0] sm:$0xff]  ;;  %v174_v33 = vld [vmem:[#allocation6 + $0xe8] sm:$0xff]  ;;  %v175_v34 = vld [vmem:[#allocation6 + $0xf0] sm:$0xff] }
  0x2c   :  { %306 = vmatpush.msra.mxu2 %v187_v22  ;;  %347 = vmatpush.msra.mxu3 %v188_v23  ;;  %v176_v35 = vld [vmem:[#allocation6 + $0xf8] sm:$0xff]  ;;  %v169_v36 = vld [vmem:[#allocation6 + $0xc0] sm:$0xff]  ;;  %v170_v37 = vld [vmem:[#allocation6 + $0xc8] sm:$0xff] }
  0x2d   :  { %225 = vmatpush.msra.mxu0 %v181_v24  ;;  %266 = vmatpush.msra.mxu1 %v182_v25  ;;  %v171_v38 = vld [vmem:[#allocation6 + $0xd0] sm:$0xff]  ;;  %v172_v39 = vld [vmem:[#allocation6 + $0xd8] sm:$0xff]  ;;  %v165_v40 = vld [vmem:[#allocation6 + $0xa0] sm:$0xff] }
  0x2e   :  { %307 = vmatpush.msra.mxu2 %v183_v26  ;;  %348 = vmatpush.msra.mxu3 %v184_v27  ;;  %v166_v41 = vld [vmem:[#allocation6 + $0xa8] sm:$0xff]  ;;  %v167_v42 = vld [vmem:[#allocation6 + $0xb0] sm:$0xff]  ;;  %v168_v43 = vld [vmem:[#allocation6 + $0xb8] sm:$0xff] }
  0x2f   :  { %226 = vmatpush.msra.mxu0 %v177_v28  ;;  %267 = vmatpush.msra.mxu1 %v178_v29  ;;  %v161_v44 = vld [vmem:[#allocation6 + $0x80] sm:$0xff]  ;;  %v162_v45 = vld [vmem:[#allocation6 + $0x88] sm:$0xff]  ;;  %v163_v46 = vld [vmem:[#allocation6 + $0x90] sm:$0xff] }
  0x30   :  { %308 = vmatpush.msra.mxu2 %v179_v30  ;;  %349 = vmatpush.msra.mxu3 %v180_v31  ;;  %v164_v47 = vld [vmem:[#allocation6 + $0x98] sm:$0xff]  ;;  %v157_v48 = vld [vmem:[#allocation6 + $0x60] sm:$0xff]  ;;  %v158_v49 = vld [vmem:[#allocation6 + $0x68] sm:$0xff] }
  0x31   :  { %227 = vmatpush.msra.mxu0 %v173_v32  ;;  %268 = vmatpush.msra.mxu1 %v174_v33  ;;  %v159_v50 = vld [vmem:[#allocation6 + $0x70] sm:$0xff]  ;;  %v160_v51 = vld [vmem:[#allocation6 + $0x78] sm:$0xff]  ;;  %v153_v52 = vld [vmem:[#allocation6 + $0x40] sm:$0xff] }
  0x32   :  { %309 = vmatpush.msra.mxu2 %v175_v34  ;;  %350 = vmatpush.msra.mxu3 %v176_v35  ;;  %v154_v53 = vld [vmem:[#allocation6 + $0x48] sm:$0xff]  ;;  %v155_v54 = vld [vmem:[#allocation6 + $0x50] sm:$0xff]  ;;  %v156_v55 = vld [vmem:[#allocation6 + $0x58] sm:$0xff] }
  0x33   :  { %228 = vmatpush.msra.mxu0 %v169_v36  ;;  %269 = vmatpush.msra.mxu1 %v170_v37  ;;  %v149_v56 = vld [vmem:[#allocation6 + $0x20] sm:$0xff]  ;;  %v150_v57 = vld [vmem:[#allocation6 + $0x28] sm:$0xff]  ;;  %v151_v58 = vld [vmem:[#allocation6 + $0x30] sm:$0xff] }
  0x34   :  { %310 = vmatpush.msra.mxu2 %v171_v38  ;;  %351 = vmatpush.msra.mxu3 %v172_v39  ;;  %v152_v59 = vld [vmem:[#allocation6 + $0x38] sm:$0xff]  ;;  %v145_v60 = vld [vmem:[#allocation6] sm:$0xff]  ;;  %v146_v61 = vld [vmem:[#allocation6 + $0x8] sm:$0xff] }
  0x35   :  { %229 = vmatpush.msra.mxu0 %v165_v40  ;;  %270 = vmatpush.msra.mxu1 %v166_v41  ;;  %v147_v62 = vld [vmem:[#allocation6 + $0x10] sm:$0xff]  ;;  %v148_v63 = vld [vmem:[#allocation6 + $0x18] sm:$0xff]  ;;  %v137_v0 = vld [vmem:[#allocation3] sm:$0xff] }
  0x36   :  { %311 = vmatpush.msra.mxu2 %v167_v42  ;;  %352 = vmatpush.msra.mxu3 %v168_v43  ;;  %v2411_v1 = vld [vmem:[#allocation9 + $0x1e0] sm:$0xff]  ;;  %v2413_v2 = vld [vmem:[#allocation9 + $0x1e8] sm:$0xff]  ;;  %v2415_v3 = vld [vmem:[#allocation9 + $0x1f0] sm:$0xff] }
  0x37   :  { %230 = vmatpush.msra.mxu0 %v161_v44  ;;  %271 = vmatpush.msra.mxu1 %v162_v45  ;;  %v2417_v4 = vld [vmem:[#allocation9 + $0x1f8] sm:$0xff]  ;;  %v2419_v5 = vld [vmem:[#allocation9 + $0x1c0] sm:$0xff]  ;;  %v2421_v6 = vld [vmem:[#allocation9 + $0x1c8] sm:$0xff] }
  0x38   :  { %312 = vmatpush.msra.mxu2 %v163_v46  ;;  %353 = vmatpush.msra.mxu3 %v164_v47  ;;  %v2425_v7 = vld [vmem:[#allocation9 + $0x1d0] sm:$0xff]  ;;  %v2427_v8 = vld [vmem:[#allocation9 + $0x1d8] sm:$0xff]  ;;  %v2430_v9 = vld [vmem:[#allocation9 + $0x1a0] sm:$0xff] }
  0x39   :  { %231 = vmatpush.msra.mxu0 %v157_v48  ;;  %272 = vmatpush.msra.mxu1 %v158_v49  ;;  %v2432_v10 = vld [vmem:[#allocation9 + $0x1a8] sm:$0xff]  ;;  %v2437_v11 = vld [vmem:[#allocation9 + $0x1b0] sm:$0xff]  ;;  %v2439_v12 = vld [vmem:[#allocation9 + $0x1b8] sm:$0xff] }
  0x3a   :  { %313 = vmatpush.msra.mxu2 %v159_v50  ;;  %354 = vmatpush.msra.mxu3 %v160_v51  ;;  %v138_v13 = vld [vmem:[#allocation3 + $0x8] sm:$0xff]  ;;  %v2451_v16 = vld [vmem:[#allocation9 + $0x190] sm:$0xff]  ;;  %v2453_v17 = vld [vmem:[#allocation9 + $0x198] sm:$0xff] }
  0x3b   :  { %232 = vmatpush.msra.mxu0 %v153_v52  ;;  %273 = vmatpush.msra.mxu1 %v154_v53  ;;  %v2445_v14 = vld [vmem:[#allocation9 + $0x180] sm:$0xff]  ;;  %v2447_v15 = vld [vmem:[#allocation9 + $0x188] sm:$0xff]  ;;  %v2461_v20 = vld [vmem:[#allocation9 + $0x170] sm:$0xff] }
  0x3c   :  { %314 = vmatpush.msra.mxu2 %v155_v54  ;;  %355 = vmatpush.msra.mxu3 %v156_v55  ;;  %v2455_v18 = vld [vmem:[#allocation9 + $0x160] sm:$0xff]  ;;  %v2457_v19 = vld [vmem:[#allocation9 + $0x168] sm:$0xff]  ;;  %v2463_v21 = vld [vmem:[#allocation9 + $0x178] sm:$0xff] }
  0x3d   :  { %233 = vmatpush.msra.mxu0 %v149_v56  ;;  %274 = vmatpush.msra.mxu1 %v150_v57  ;;  %v2466_v22 = vld [vmem:[#allocation9 + $0x140] sm:$0xff]  ;;  %v2468_v23 = vld [vmem:[#allocation9 + $0x148] sm:$0xff]  ;;  %v2473_v24 = vld [vmem:[#allocation9 + $0x150] sm:$0xff] }
  0x3e   :  { %315 = vmatpush.msra.mxu2 %v151_v58  ;;  %356 = vmatpush.msra.mxu3 %v152_v59  ;;  %v2475_v25 = vld [vmem:[#allocation9 + $0x158] sm:$0xff]  ;;  %v139_v26 = vld [vmem:[#allocation3 + $0x10] sm:$0xff]  ;;  %v2481_v27 = vld [vmem:[#allocation9 + $0x120] sm:$0xff] }
  0x3f   :  { %234 = vmatpush.msra.mxu0 %v145_v60  ;;  %275 = vmatpush.msra.mxu1 %v146_v61  ;;  %v2483_v28 = vld [vmem:[#allocation9 + $0x128] sm:$0xff]  ;;  %v2487_v29 = vld [vmem:[#allocation9 + $0x130] sm:$0xff]  ;;  %v2489_v30 = vld [vmem:[#allocation9 + $0x138] sm:$0xff] }
  0x40   :  { %316 = vmatpush.msra.mxu2 %v147_v62  ;;  %357 = vmatpush.msra.mxu3 %v148_v63  ;;  %v2491_v31 = vld [vmem:[#allocation9 + $0x100] sm:$0xff]  ;;  %v2493_v32 = vld [vmem:[#allocation9 + $0x108] sm:$0xff]  ;;  %v2497_v33 = vld [vmem:[#allocation9 + $0x110] sm:$0xff] }
  0x41   :  { %235 = vmatmul.f32.vlgmr.msra.gmra.mxu0 %v137_v0  ;;  %276 = vmatmul.f32.vlgmr.msra.gmra.mxu1 %v137_v0  ;;  %v2499_v34 = vld [vmem:[#allocation9 + $0x118] sm:$0xff]  ;;  %v2502_v35 = vld [vmem:[#allocation9 + $0xe0] sm:$0xff]  ;;  %v2504_v36 = vld [vmem:[#allocation9 + $0xe8] sm:$0xff] }
  0x42   :  { %317 = vmatmul.f32.vlgmr.msra.gmra.mxu2 %v137_v0  ;;  %358 = vmatmul.f32.vlgmr.msra.gmra.mxu3 %v137_v0  ;;  %v2509_v37 = vld [vmem:[#allocation9 + $0xf0] sm:$0xff]  ;;  %v2511_v38 = vld [vmem:[#allocation9 + $0xf8] sm:$0xff]  ;;  %v2517_v40 = vld [vmem:[#allocation9 + $0xc0] sm:$0xff] }
  0x43   :  { %488 = vmatpush.msrb.mxu0 %v2411_v1  ;;  %508 = vmatpush.msrb.mxu1 %v2413_v2  ;;  %v140_v39 = vld [vmem:[#allocation3 + $0x18] sm:$0xff]  ;;  %v2519_v41 = vld [vmem:[#allocation9 + $0xc8] sm:$0xff]  ;;  %v2527_v44 = vld [vmem:[#allocation9 + $0xa0] sm:$0xff] }
  0x44   :  { %528 = vmatpush.msrb.mxu2 %v2415_v3  ;;  %548 = vmatpush.msrb.mxu3 %v2417_v4  ;;  %v2523_v42 = vld [vmem:[#allocation9 + $0xd0] sm:$0xff]  ;;  %v2525_v43 = vld [vmem:[#allocation9 + $0xd8] sm:$0xff]  ;;  %3429 = vst [vmem:[#allocation27_spill] sm:$0xff] %v2527_v44  ;;  %v2529_v45 = vld [vmem:[#allocation9 + $0xa8] sm:$0xff] }
  0x45   :  { %489 = vmatpush.msrb.mxu0 %v2419_v5  ;;  %509 = vmatpush.msrb.mxu1 %v2421_v6  ;;  %3427 = vst [vmem:[#allocation25_spill] sm:$0xff] %v2523_v42  ;;  %v2533_v46 = vld [vmem:[#allocation9 + $0xb0] sm:$0xff]  ;;  %v2535_v47 = vld [vmem:[#allocation9 + $0xb8] sm:$0xff]  ;;  %v2538_v48 = vld [vmem:[#allocation9 + $0x80] sm:$0xff] }
  0x46   :  { %529 = vmatpush.msrb.mxu2 %v2425_v7  ;;  %549 = vmatpush.msrb.mxu3 %v2427_v8  ;;  %3428 = vst [vmem:[#allocation26_spill] sm:$0xff] %v2525_v43  ;;  %v2540_v49 = vld [vmem:[#allocation9 + $0x88] sm:$0xff]  ;;  %v2545_v50 = vld [vmem:[#allocation9 + $0x90] sm:$0xff]  ;;  %v2547_v51 = vld [vmem:[#allocation9 + $0x98] sm:$0xff] }
  0x47   :  { %490 = vmatpush.msrb.mxu0 %v2430_v9  ;;  %510 = vmatpush.msrb.mxu1 %v2432_v10  ;;  %3430 = vst [vmem:[#allocation28_spill] sm:$0xff] %v2529_v45  ;;  %v141_v52 = vld [vmem:[#allocation3 + $0x20] sm:$0xff]  ;;  %v2555_v54 = vld [vmem:[#allocation9 + $0x68] sm:$0xff]  ;;  %v2559_v55 = vld [vmem:[#allocation9 + $0x70] sm:$0xff] }
  0x48   :  { %530 = vmatpush.msrb.mxu2 %v2437_v11  ;;  %550 = vmatpush.msrb.mxu3 %v2439_v12  ;;  %3431 = vst [vmem:[#allocation29_spill] sm:$0xff] %v2533_v46  ;;  %v2553_v53 = vld [vmem:[#allocation9 + $0x60] sm:$0xff]  ;;  %v2561_v56 = vld [vmem:[#allocation9 + $0x78] sm:$0xff]  ;;  %v2565_v58 = vld [vmem:[#allocation9 + $0x48] sm:$0xff] }
  0x49   :  { %238 = vmatmul.f32.gmra.mxu0 %v138_v13  ;;  %279 = vmatmul.f32.gmra.mxu1 %v138_v13  ;;  %3432 = vst [vmem:[#allocation30_spill] sm:$0xff] %v2535_v47  ;;  %v2563_v57 = vld [vmem:[#allocation9 + $0x40] sm:$0xff]  ;;  %v2569_v59 = vld [vmem:[#allocation9 + $0x50] sm:$0xff]  ;;  %v2571_v60 = vld [vmem:[#allocation9 + $0x58] sm:$0xff] }
  0x4a   :  { %320 = vmatmul.f32.gmra.mxu2 %v138_v13  ;;  %361 = vmatmul.f32.gmra.mxu3 %v138_v13  ;;  %3433 = vst [vmem:[#allocation31_spill] sm:$0xff] %v2538_v48  ;;  %v2574_v61 = vld [vmem:[#allocation9 + $0x20] sm:$0xff]  ;;  %v2576_v62 = vld [vmem:[#allocation9 + $0x28] sm:$0xff]  ;;  %v2581_v63 = vld [vmem:[#allocation9 + $0x30] sm:$0xff] }
  0x4b   :  { %491 = vmatpush.msrb.mxu0 %v2445_v14  ;;  %511 = vmatpush.msrb.mxu1 %v2447_v15  ;;  %3434 = vst [vmem:[#allocation32_spill] sm:$0xff] %v2540_v49  ;;  %v2583_v0 = vld [vmem:[#allocation9 + $0x38] sm:$0xff]  ;;  %v142_v13 = vld [vmem:[#allocation3 + $0x28] sm:$0xff] }
  0x4c   :  { %531 = vmatpush.msrb.mxu2 %v2451_v16  ;;  %551 = vmatpush.msrb.mxu3 %v2453_v17  ;;  %3435 = vst [vmem:[#allocation33_spill] sm:$0xff] %v2545_v50 }
  0x4d   :  { %492 = vmatpush.msrb.mxu0 %v2455_v18  ;;  %512 = vmatpush.msrb.mxu1 %v2457_v19  ;;  %3436 = vst [vmem:[#allocation34_spill] sm:$0xff] %v2547_v51 }
  0x4e   :  { %532 = vmatpush.msrb.mxu2 %v2461_v20  ;;  %552 = vmatpush.msrb.mxu3 %v2463_v21  ;;  %3437 = vst [vmem:[#allocation35_spill] sm:$0xff] %v2553_v53 }
  0x4f   :  { %493 = vmatpush.msrb.mxu0 %v2466_v22  ;;  %513 = vmatpush.msrb.mxu1 %v2468_v23  ;;  %3438 = vst [vmem:[#allocation36_spill] sm:$0xff] %v2555_v54 }
  0x50   :  { %533 = vmatpush.msrb.mxu2 %v2473_v24  ;;  %553 = vmatpush.msrb.mxu3 %v2475_v25  ;;  %3439 = vst [vmem:[#allocation37_spill] sm:$0xff] %v2559_v55 }
  0x51   :  { %241 = vmatmul.f32.gmra.mxu0 %v139_v26  ;;  %282 = vmatmul.f32.gmra.mxu1 %v139_v26  ;;  %3440 = vst [vmem:[#allocation38_spill] sm:$0xff] %v2561_v56 }
  0x52   :  { %323 = vmatmul.f32.gmra.mxu2 %v139_v26  ;;  %364 = vmatmul.f32.gmra.mxu3 %v139_v26  ;;  %3441 = vst [vmem:[#allocation39_spill] sm:$0xff] %v2563_v57  ;;  %v2589_v26 = vld [vmem:[#allocation9] sm:$0xff] }
  0x53   :  { %494 = vmatpush.msrb.mxu0 %v2481_v27  ;;  %514 = vmatpush.msrb.mxu1 %v2483_v28  ;;  %3442 = vst [vmem:[#allocation40_spill] sm:$0xff] %v2565_v58 }
  0x54   :  { %534 = vmatpush.msrb.mxu2 %v2487_v29  ;;  %554 = vmatpush.msrb.mxu3 %v2489_v30  ;;  %3443 = vst [vmem:[#allocation41_spill] sm:$0xff] %v2569_v59 }
  0x55   :  { %495 = vmatpush.msrb.mxu0 %v2491_v31  ;;  %515 = vmatpush.msrb.mxu1 %v2493_v32  ;;  %3444 = vst [vmem:[#allocation42_spill] sm:$0xff] %v2571_v60 }
  0x56   :  { %535 = vmatpush.msrb.mxu2 %v2497_v33  ;;  %555 = vmatpush.msrb.mxu3 %v2499_v34  ;;  %3445 = vst [vmem:[#allocation43_spill] sm:$0xff] %v2574_v61 }
  0x57   :  { %496 = vmatpush.msrb.mxu0 %v2502_v35  ;;  %516 = vmatpush.msrb.mxu1 %v2504_v36  ;;  %3446 = vst [vmem:[#allocation44_spill] sm:$0xff] %v2576_v62 }
  0x58   :  { %536 = vmatpush.msrb.mxu2 %v2509_v37  ;;  %556 = vmatpush.msrb.mxu3 %v2511_v38  ;;  %3447 = vst [vmem:[#allocation45_spill] sm:$0xff] %v2581_v63 }
  0x59   :  { %244 = vmatmul.f32.gmra.mxu0 %v140_v39  ;;  %285 = vmatmul.f32.gmra.mxu1 %v140_v39  ;;  %3448 = vst [vmem:[#allocation46_spill] sm:$0xff] %v2583_v0 }
  0x5a   :  { %326 = vmatmul.f32.gmra.mxu2 %v140_v39  ;;  %367 = vmatmul.f32.gmra.mxu3 %v140_v39  ;;  %3449 = vst [vmem:[#allocation47_spill] sm:$0xff] %v2589_v26  ;;  %v2591_v39 = vld [vmem:[#allocation9 + $0x8] sm:$0xff] }
  0x5b   :  { %497 = vmatpush.msrb.mxu0 %v2517_v40  ;;  %517 = vmatpush.msrb.mxu1 %v2519_v41  ;;  %3450 = vst [vmem:[#allocation48_spill] sm:$0xff] %v2591_v39 }
  0x5c   :  { %537 = vmatpush.msrb.mxu2 %v2523_v42  ;;  %557 = vmatpush.msrb.mxu3 %v2525_v43 }
  0x5d   :  { %498 = vmatpush.msrb.mxu0 %v2527_v44  ;;  %518 = vmatpush.msrb.mxu1 %v2529_v45 }
  0x5e   :  { %538 = vmatpush.msrb.mxu2 %v2533_v46  ;;  %558 = vmatpush.msrb.mxu3 %v2535_v47 }
  0x5f   :  { %499 = vmatpush.msrb.mxu0 %v2538_v48  ;;  %519 = vmatpush.msrb.mxu1 %v2540_v49 }
  0x60   :  { %539 = vmatpush.msrb.mxu2 %v2545_v50  ;;  %559 = vmatpush.msrb.mxu3 %v2547_v51 }
  0x61   :  { %247 = vmatmul.f32.gmra.mxu0 %v141_v52  ;;  %288 = vmatmul.f32.gmra.mxu1 %v141_v52 }
  0x62   :  { %329 = vmatmul.f32.gmra.mxu2 %v141_v52  ;;  %370 = vmatmul.f32.gmra.mxu3 %v141_v52  ;;  %v2595_v52 = vld [vmem:[#allocation9 + $0x10] sm:$0xff] }
  0x63   :  { %500 = vmatpush.msrb.mxu0 %v2553_v53  ;;  %520 = vmatpush.msrb.mxu1 %v2555_v54  ;;  %3451 = vst [vmem:[#allocation49_spill] sm:$0xff] %v2595_v52 }
  0x64   :  { %540 = vmatpush.msrb.mxu2 %v2559_v55  ;;  %560 = vmatpush.msrb.mxu3 %v2561_v56 }
  0x65   :  { %501 = vmatpush.msrb.mxu0 %v2563_v57  ;;  %521 = vmatpush.msrb.mxu1 %v2565_v58  ;;  %v2597_v58 = vld [vmem:[#allocation9 + $0x18] sm:$0xff] }
  0x66   :  { %541 = vmatpush.msrb.mxu2 %v2569_v59  ;;  %561 = vmatpush.msrb.mxu3 %v2571_v60  ;;  %3452 = vst [vmem:[#allocation50_spill] sm:$0xff] %v2597_v58 }
  0x67   :  { %502 = vmatpush.msrb.mxu0 %v2574_v61  ;;  %522 = vmatpush.msrb.mxu1 %v2576_v62 }
  0x68   :  { %542 = vmatpush.msrb.mxu2 %v2581_v63  ;;  %562 = vmatpush.msrb.mxu3 %v2583_v0  ;;  %v143_v0 = vld [vmem:[#allocation3 + $0x30] sm:$0xff] }
  0x69   :  { %250 = vmatmul.f32.gmra.mxu0 %v142_v13  ;;  %291 = vmatmul.f32.gmra.mxu1 %v142_v13 }
  0x6a   :  { %332 = vmatmul.f32.gmra.mxu2 %v142_v13  ;;  %373 = vmatmul.f32.gmra.mxu3 %v142_v13  ;;  %v144_v13 = vld [vmem:[#allocation3 + $0x38] sm:$0xff] }
  0x6b   :  { %503 = vmatpush.msrb.mxu0 %v2589_v26  ;;  %523 = vmatpush.msrb.mxu1 %v2591_v39 }
  0x6c   :  { %543 = vmatpush.msrb.mxu2 %v2595_v52  ;;  %563 = vmatpush.msrb.mxu3 %v2597_v58 }
  0x6d   :  { %642 = vmatpush.msra.mxu0 %v2411_v1  ;;  %662 = vmatpush.msra.mxu1 %v2413_v2 }
  0x6e   :  { %682 = vmatpush.msra.mxu2 %v2415_v3  ;;  %702 = vmatpush.msra.mxu3 %v2417_v4 }
  0x6f   :  { %643 = vmatpush.msra.mxu0 %v2419_v5  ;;  %663 = vmatpush.msra.mxu1 %v2421_v6 }
  0x70   :  { %683 = vmatpush.msra.mxu2 %v2425_v7  ;;  %703 = vmatpush.msra.mxu3 %v2427_v8 }
  0x71   :  { %253 = vmatmul.f32.gmra.mxu0 %v143_v0  ;;  %294 = vmatmul.f32.gmra.mxu1 %v143_v0 }
  0x72   :  { %335 = vmatmul.f32.gmra.mxu2 %v143_v0  ;;  %376 = vmatmul.f32.gmra.mxu3 %v143_v0  ;;  %v415_v0 = vld [vmem:[#allocation11] sm:$0xff] }
  0x73   :  { %644 = vmatpush.msra.mxu0 %v2430_v9  ;;  %664 = vmatpush.msra.mxu1 %v2432_v10 }
  0x74   :  { %684 = vmatpush.msra.mxu2 %v2437_v11  ;;  %704 = vmatpush.msra.mxu3 %v2439_v12 }
  0x75   :  { %645 = vmatpush.msra.mxu0 %v2445_v14  ;;  %665 = vmatpush.msra.mxu1 %v2447_v15 }
  0x76   :  { %685 = vmatpush.msra.mxu2 %v2451_v16  ;;  %705 = vmatpush.msra.mxu3 %v2453_v17 }
  0x77   :  { %646 = vmatpush.msra.mxu0 %v2455_v18  ;;  %666 = vmatpush.msra.mxu1 %v2457_v19 }
  0x78   :  { %686 = vmatpush.msra.mxu2 %v2461_v20  ;;  %706 = vmatpush.msra.mxu3 %v2463_v21 }
  0x79   :  { %256 = vmatmul.f32.gmra.mxu0 %v144_v13  ;;  %297 = vmatmul.f32.gmra.mxu1 %v144_v13 }
  0x7a   :  { %338 = vmatmul.f32.gmra.mxu2 %v144_v13  ;;  %379 = vmatmul.f32.gmra.mxu3 %v144_v13  ;;  %v3453_v13 = vld [vmem:[#allocation40_spill] sm:$0xff] }
  0x7b   :  { %647 = vmatpush.msra.mxu0 %v2466_v22  ;;  %667 = vmatpush.msra.mxu1 %v2468_v23 }
  0x7c   :  { %687 = vmatpush.msra.mxu2 %v2473_v24  ;;  %707 = vmatpush.msra.mxu3 %v2475_v25 }
  0x7d   :  { %648 = vmatpush.msra.mxu0 %v2481_v27  ;;  %668 = vmatpush.msra.mxu1 %v2483_v28 }
  0x7e   :  { %688 = vmatpush.msra.mxu2 %v2487_v29  ;;  %708 = vmatpush.msra.mxu3 %v2489_v30 }
  0x7f   :  { %649 = vmatpush.msra.mxu0 %v2491_v31  ;;  %669 = vmatpush.msra.mxu1 %v2493_v32 }
  0x80   :  { %689 = vmatpush.msra.mxu2 %v2497_v33  ;;  %709 = vmatpush.msra.mxu3 %v2499_v34 }
  0x81   :  { %504 = vmatmul.f32.vlgmr.msrb.gmra.mxu0 %v415_v0  ;;  %524 = vmatmul.f32.vlgmr.msrb.gmra.mxu1 %v415_v0 }
  0x82   :  { %544 = vmatmul.f32.vlgmr.msrb.gmra.mxu2 %v415_v0  ;;  %564 = vmatmul.f32.vlgmr.msrb.gmra.mxu3 %v415_v0  ;;  %v3454_v0 = vld [vmem:[#allocation46_spill] sm:$0xff] }
  0x83   :  { %650 = vmatpush.msra.mxu0 %v2502_v35  ;;  %670 = vmatpush.msra.mxu1 %v2504_v36 }
  0x84   :  { %690 = vmatpush.msra.mxu2 %v2509_v37  ;;  %710 = vmatpush.msra.mxu3 %v2511_v38 }
  0x85   :  { %651 = vmatpush.msra.mxu0 %v2517_v40  ;;  %671 = vmatpush.msra.mxu1 %v2519_v41 }
  0x86   :  { %691 = vmatpush.msra.mxu2 %v2523_v42  ;;  %711 = vmatpush.msra.mxu3 %v2525_v43 }
  0x87   :  { %652 = vmatpush.msra.mxu0 %v2527_v44  ;;  %672 = vmatpush.msra.mxu1 %v2529_v45 }
  0x88   :  { %692 = vmatpush.msra.mxu2 %v2533_v46  ;;  %712 = vmatpush.msra.mxu3 %v2535_v47 }
  0x89   :  { %653 = vmatpush.msra.mxu0 %v2538_v48  ;;  %673 = vmatpush.msra.mxu1 %v2540_v49 }
  0x8a   :  { %693 = vmatpush.msra.mxu2 %v2545_v50  ;;  %713 = vmatpush.msra.mxu3 %v2547_v51 }
  0x8b   :  { %654 = vmatpush.msra.mxu0 %v2553_v53  ;;  %674 = vmatpush.msra.mxu1 %v2555_v54 }
  0x8c   :  { %694 = vmatpush.msra.mxu2 %v2559_v55  ;;  %714 = vmatpush.msra.mxu3 %v2561_v56 }
  0x8d   :  { %655 = vmatpush.msra.mxu0 %v2563_v57  ;;  %675 = vmatpush.msra.mxu1 %v3453_v13 }
  0x8e   :  { %695 = vmatpush.msra.mxu2 %v2569_v59  ;;  %715 = vmatpush.msra.mxu3 %v2571_v60 }
  0x8f   :  { %656 = vmatpush.msra.mxu0 %v2574_v61  ;;  %676 = vmatpush.msra.mxu1 %v2576_v62 }
  0x90   :  { %696 = vmatpush.msra.mxu2 %v2581_v63  ;;  %716 = vmatpush.msra.mxu3 %v3454_v0 }
  0x91   :  { %657 = vmatpush.msra.mxu0 %v2589_v26  ;;  %677 = vmatpush.msra.mxu1 %v2591_v39 }
  0x92   :  { %697 = vmatpush.msra.mxu2 %v2595_v52  ;;  %717 = vmatpush.msra.mxu3 %v2597_v58 }
  0x93   :  { %796 = vmatpush.msrb.mxu0 %v2411_v1  ;;  %816 = vmatpush.msrb.mxu1 %v2413_v2 }
  0x94   :  { %836 = vmatpush.msrb.mxu2 %v2415_v3  ;;  %856 = vmatpush.msrb.mxu3 %v2417_v4 }
  0x95   :  { %797 = vmatpush.msrb.mxu0 %v2419_v5  ;;  %817 = vmatpush.msrb.mxu1 %v2421_v6 }
  0x96   :  { %837 = vmatpush.msrb.mxu2 %v2425_v7  ;;  %857 = vmatpush.msrb.mxu3 %v2427_v8 }
  0x97   :  { %798 = vmatpush.msrb.mxu0 %v2430_v9  ;;  %818 = vmatpush.msrb.mxu1 %v2432_v10 }
  0x98   :  { %838 = vmatpush.msrb.mxu2 %v2437_v11  ;;  %858 = vmatpush.msrb.mxu3 %v2439_v12 }
  0x99   :  { %799 = vmatpush.msrb.mxu0 %v2445_v14  ;;  %819 = vmatpush.msrb.mxu1 %v2447_v15 }
  0x9a   :  { %839 = vmatpush.msrb.mxu2 %v2451_v16  ;;  %859 = vmatpush.msrb.mxu3 %v2453_v17 }
  0x9b   :  { %800 = vmatpush.msrb.mxu0 %v2455_v18  ;;  %820 = vmatpush.msrb.mxu1 %v2457_v19 }
  0x9c   :  { %840 = vmatpush.msrb.mxu2 %v2461_v20  ;;  %860 = vmatpush.msrb.mxu3 %v2463_v21 }
  0x9d   :  { %801 = vmatpush.msrb.mxu0 %v2466_v22  ;;  %821 = vmatpush.msrb.mxu1 %v2468_v23 }
  0x9e   :  { %841 = vmatpush.msrb.mxu2 %v2473_v24  ;;  %861 = vmatpush.msrb.mxu3 %v2475_v25 }
  0x9f   :  { %802 = vmatpush.msrb.mxu0 %v2481_v27  ;;  %822 = vmatpush.msrb.mxu1 %v2483_v28 }
  0xa0   :  { %842 = vmatpush.msrb.mxu2 %v2487_v29  ;;  %862 = vmatpush.msrb.mxu3 %v2489_v30 }
  0xa1   :  { %803 = vmatpush.msrb.mxu0 %v2491_v31  ;;  %823 = vmatpush.msrb.mxu1 %v2493_v32 }
  0xa2   :  { %843 = vmatpush.msrb.mxu2 %v2497_v33  ;;  %863 = vmatpush.msrb.mxu3 %v2499_v34 }
  0xa3   :  { %804 = vmatpush.msrb.mxu0 %v2502_v35  ;;  %824 = vmatpush.msrb.mxu1 %v2504_v36 }
  0xa4   :  { %844 = vmatpush.msrb.mxu2 %v2509_v37  ;;  %864 = vmatpush.msrb.mxu3 %v2511_v38 }
  0xa5   :  { %805 = vmatpush.msrb.mxu0 %v2517_v40  ;;  %825 = vmatpush.msrb.mxu1 %v2519_v41 }
  0xa6   :  { %845 = vmatpush.msrb.mxu2 %v2523_v42  ;;  %865 = vmatpush.msrb.mxu3 %v2525_v43 }
  0xa7   :  { %806 = vmatpush.msrb.mxu0 %v2527_v44  ;;  %826 = vmatpush.msrb.mxu1 %v2529_v45 }
  0xa8   :  { %846 = vmatpush.msrb.mxu2 %v2533_v46  ;;  %866 = vmatpush.msrb.mxu3 %v2535_v47 }
  0xa9   :  { %807 = vmatpush.msrb.mxu0 %v2538_v48  ;;  %827 = vmatpush.msrb.mxu1 %v2540_v49 }
  0xaa   :  { %847 = vmatpush.msrb.mxu2 %v2545_v50  ;;  %867 = vmatpush.msrb.mxu3 %v2547_v51 }
  0xab   :  { %808 = vmatpush.msrb.mxu0 %v2553_v53  ;;  %828 = vmatpush.msrb.mxu1 %v2555_v54 }
  0xac   :  { %848 = vmatpush.msrb.mxu2 %v2559_v55  ;;  %868 = vmatpush.msrb.mxu3 %v2561_v56 }
  0xad   :  { %809 = vmatpush.msrb.mxu0 %v2563_v57  ;;  %829 = vmatpush.msrb.mxu1 %v3453_v13  ;;  %v209_v57 = vld [vmem:[#allocation8] sm:$0xf] }
  0xae   :  { %849 = vmatpush.msrb.mxu2 %v2569_v59  ;;  %869 = vmatpush.msrb.mxu3 %v2571_v60  ;;  %v211_v60 = vperm.slane %v209_v57, 0  ;;  %v212_v56 = vperm.slane %v209_v57, 1 }
  0xaf   :  { %810 = vmatpush.msrb.mxu0 %v2574_v61  ;;  %830 = vmatpush.msrb.mxu1 %v2576_v62 }
  0xb0   :  { %850 = vmatpush.msrb.mxu2 %v2581_v63  ;;  %870 = vmatpush.msrb.mxu3 %v3454_v0 }
  0xb1   :  { %811 = vmatpush.msrb.mxu0 %v2589_v26  ;;  %831 = vmatpush.msrb.mxu1 %v2591_v39  ;;  %v2739_v39 = vperm.slane %v209_v57, 2 }
  0xb2   :  { %851 = vmatpush.msrb.mxu2 %v2595_v52  ;;  %871 = vmatpush.msrb.mxu3 %v2597_v58  ;;  %v2741_v52 = vperm.slane %v209_v57, 3 }
  0xbe   :  { %v236_v13 = vpop.f32.mrf.mxu0  ;;  %v277_v59 = vpop.f32.mrf.mxu1 }
  0xc5   :  { %v2731_v61 = vpop.f32.mrf.mxu2  ;;  %v2733_v62 = vpop.f32.mrf.mxu3 }
  0xc6   :  { %v239_v63 = vpop.f32.mrf.mxu0  ;;  %v280_v55 = vpop.f32.mrf.mxu1 }
  0xc7   :  { %v2735_v0 = vadd.f32 %v239_v63, %v211_v60  ;;  %v2737_v26 = vadd.f32 %v280_v55, %v212_v56 }
  0xc9   :  { %3455 = vst [vmem:[#allocation51_spill] sm:$0xff] %v2735_v0 }
  0xca   :  { %3456 = vst [vmem:[#allocation52_spill] sm:$0xff] %v2737_v26 }
  0xcd   :  { %v321_v58 = vpop.f32.mrf.mxu2  ;;  %v362_v54 = vpop.f32.mrf.mxu3 }
  0xce   :  { %v2744_v53 = vadd.f32 %v321_v58, %v2739_v39  ;;  %v2747_v51 = vadd.f32 %v362_v54, %v2741_v52  ;;  %v242_v50 = vpop.f32.mrf.mxu0  ;;  %v283_v49 = vpop.f32.mrf.mxu1 }
  0xcf   :  { %v2749_v48 = vadd.f32 %v242_v50, %v211_v60  ;;  %v2751_v63 = vadd.f32 %v283_v49, %v212_v56 }
  0xd0   :  { %3457 = vst [vmem:[#allocation53_spill] sm:$0xff] %v2744_v53 }
  0xd1   :  { %3458 = vst [vmem:[#allocation54_spill] sm:$0xff] %v2747_v51 }
  0xd2   :  { %3459 = vst [vmem:[#allocation55_spill] sm:$0xff] %v2749_v48 }
  0xd3   :  { %3460 = vst [vmem:[#allocation56_spill] sm:$0xff] %v2751_v63 }
  0xd5   :  { %v324_v55 = vpop.f32.mrf.mxu2  ;;  %v365_v26 = vpop.f32.mrf.mxu3 }
  0xd6   :  { %v2754_v0 = vadd.f32 %v324_v55, %v2739_v39  ;;  %v2757_v57 = vadd.f32 %v365_v26, %v2741_v52  ;;  %v245_v47 = vpop.f32.mrf.mxu0  ;;  %v286_v58 = vpop.f32.mrf.mxu1 }
  0xd7   :  { %v2759_v53 = vadd.f32 %v245_v47, %v211_v60  ;;  %v2761_v54 = vadd.f32 %v286_v58, %v212_v56 }
  0xd8   :  { %3461 = vst [vmem:[#allocation57_spill] sm:$0xff] %v2754_v0 }
  0xd9   :  { %3462 = vst [vmem:[#allocation58_spill] sm:$0xff] %v2757_v57 }
  0xda   :  { %3463 = vst [vmem:[#allocation59_spill] sm:$0xff] %v2759_v53 }
  0xdb   :  { %3464 = vst [vmem:[#allocation60_spill] sm:$0xff] %v2761_v54 }
  0xdd   :  { %v327_v51 = vpop.f32.mrf.mxu2  ;;  %v368_v46 = vpop.f32.mrf.mxu3 }
  0xde   :  { %v2764_v50 = vadd.f32 %v327_v51, %v2739_v39  ;;  %v2767_v49 = vadd.f32 %v368_v46, %v2741_v52  ;;  %v248_v63 = vpop.f32.mrf.mxu0  ;;  %v289_v55 = vpop.f32.mrf.mxu1 }
  0xdf   :  { %v2769_v0 = vadd.f32 %v248_v63, %v211_v60  ;;  %v2771_v26 = vadd.f32 %v289_v55, %v212_v56 }
  0xe0   :  { %3465 = vst [vmem:[#allocation61_spill] sm:$0xff] %v2764_v50 }
  0xe1   :  { %3466 = vst [vmem:[#allocation62_spill] sm:$0xff] %v2767_v49 }
  0xe2   :  { %3467 = vst [vmem:[#allocation63_spill] sm:$0xff] %v2769_v0 }
  0xe3   :  { %3468 = vst [vmem:[#allocation64_spill] sm:$0xff] %v2771_v26 }
  0xe5   :  { %v330_v57 = vpop.f32.mrf.mxu2  ;;  %v371_v48 = vpop.f32.mrf.mxu3 }
  0xe6   :  { %v2774_v47 = vadd.f32 %v330_v57, %v2739_v39  ;;  %v2777_v58 = vadd.f32 %v371_v48, %v2741_v52  ;;  %v251_v54 = vpop.f32.mrf.mxu0  ;;  %v292_v51 = vpop.f32.mrf.mxu1 }
  0xe7   :  { %v2779_v50 = vadd.f32 %v251_v54, %v211_v60  ;;  %v2781_v46 = vadd.f32 %v292_v51, %v212_v56 }
  0xe8   :  { %3469 = vst [vmem:[#allocation65_spill] sm:$0xff] %v2774_v47 }
  0xe9   :  { %3470 = vst [vmem:[#allocation66_spill] sm:$0xff] %v2777_v58 }
  0xea   :  { %3471 = vst [vmem:[#allocation67_spill] sm:$0xff] %v2779_v50  ;;  %v278_v50 = vadd.f32 %v277_v59, %v212_v56 }
  0xeb   :  { %3472 = vst [vmem:[#allocation68_spill] sm:$0xff] %v2781_v46 }
  0xed   :  { %v333_v49 = vpop.f32.mrf.mxu2  ;;  %v374_v53 = vpop.f32.mrf.mxu3 }
  0xee   :  { %v2784_v63 = vadd.f32 %v333_v49, %v2739_v39  ;;  %v2787_v55 = vadd.f32 %v374_v53, %v2741_v52  ;;  %v254_v26 = vpop.f32.mrf.mxu0  ;;  %v295_v57 = vpop.f32.mrf.mxu1 }
  0xef   :  { %v2789_v47 = vadd.f32 %v254_v26, %v211_v60  ;;  %v2791_v48 = vadd.f32 %v295_v57, %v212_v56 }
  0xf0   :  { %3473 = vst [vmem:[#allocation69_spill] sm:$0xff] %v2784_v63 }
  0xf1   :  { %3474 = vst [vmem:[#allocation70_spill] sm:$0xff] %v2787_v55  ;;  %v237_v55 = vadd.f32 %v236_v13, %v211_v60 }
  0xf2   :  { %3475 = vst [vmem:[#allocation71_spill] sm:$0xff] %v2789_v47 }
  0xf3   :  { %3476 = vst [vmem:[#allocation72_spill] sm:$0xff] %v2791_v48 }
  0xf5   :  { %v336_v58 = vpop.f32.mrf.mxu2  ;;  %v377_v0 = vpop.f32.mrf.mxu3 }
  0xf6   :  { %v2794_v54 = vadd.f32 %v336_v58, %v2739_v39  ;;  %v2797_v51 = vadd.f32 %v377_v0, %v2741_v52  ;;  %v257_v46 = vpop.f32.mrf.mxu0  ;;  %v298_v49 = vpop.f32.mrf.mxu1 }
  0xf7   :  { %v2799_v63 = vadd.f32 %v257_v46, %v211_v60  ;;  %v2801_v53 = vadd.f32 %v298_v49, %v212_v56  ;;  %v319_v46 = vadd.f32 %v2731_v61, %v2739_v39 }
  0xf8   :  { %3477 = vst [vmem:[#allocation73_spill] sm:$0xff] %v2794_v54 }
  0xf9   :  { %3478 = vst [vmem:[#allocation74_spill] sm:$0xff] %v2797_v51 }
  0xfa   :  { %3479 = vst [vmem:[#allocation75_spill] sm:$0xff] %v2799_v63 }
  0xfb   :  { %3480 = vst [vmem:[#allocation76_spill] sm:$0xff] %v2801_v53 }
  0xfd   :  { %v339_v26 = vpop.f32.mrf.mxu2  ;;  %v380_v47 = vpop.f32.mrf.mxu3 }
  0xfe   :  { %v2804_v57 = vadd.f32 %v339_v26, %v2739_v39  ;;  %v2807_v48 = vadd.f32 %v380_v47, %v2741_v52  ;;  %v505_v58 = vpop.f32.mrf.mxu0  ;;  %v525_v54 = vpop.f32.mrf.mxu1 }
  0xff   :  { %v568_v0 = vadd.f32 %v505_v58, %v237_v55  ;;  %v569_v51 = vadd.f32 %v525_v54, %v278_v50  ;;  %v360_v50 = vadd.f32 %v2733_v62, %v2741_v52 }
 0x100   :  { %3481 = vst [vmem:[#allocation77_spill] sm:$0xff] %v2804_v57 }
 0x101   :  { %3482 = vst [vmem:[#allocation78_spill] sm:$0xff] %v2807_v48  ;;  %v1833_v45 = vmul.f32 -1.442695, %v568_v0  ;;  %v1834_v44 = vmul.f32 -1.442695, %v569_v51 }
 0x103   :  { %1873 = vpow2.f32 %v1833_v45 }
 0x104   :  { %1875 = vpow2.f32 %v1834_v44 }
 0x105   :  { %v545_v56 = vpop.f32.mrf.mxu2  ;;  %v565_v48 = vpop.f32.mrf.mxu3 }
 0x106   :  { %v570_v59 = vadd.f32 %v545_v56, %v319_v46  ;;  %v571_v51 = vadd.f32 %v565_v48, %v360_v50 }
 0x108   :  { %v1835_v60 = vmul.f32 -1.442695, %v570_v59 }
 0x109   :  { %v1874_v13 = vpop.eup %1873 }
 0x10a   :  { %v1876_v49 = vpop.eup %1875  ;;  %v581_v26 = vadd.f32 1.0, %v1874_v13  ;;  %1877 = vpow2.f32 %v1835_v60 }
 0x10b   :  { %v582_v47 = vadd.f32 1.0, %v1876_v49 }
 0x10c   :  { %1879 = vrcp.f32 %v581_v26  ;;  %v595_v46 = vand.u32 2147483648, %v581_v26  ;;  %v593_v60 = vand.u32 2147483647, %v581_v26  ;;  %vm589_vm2 = vweird.f32 %v581_v26 }
 0x10d   :  { %1881 = vrcp.f32 %v582_v47  ;;  %v610_v56 = vand.u32 2147483648, %v582_v47  ;;  %v608_v49 = vand.u32 2147483647, %v582_v47  ;;  %vm604_vm3 = vweird.f32 %v582_v47 }
 0x10e   :  { %v596_v48 = vor.u32 1.1754944e-38, %v595_v46  ;;  %vm594_vm6 = vcmp.eq.f32.partialorder %v593_v60, 8.507059e+37 }
 0x10f   :  { %v611_v50 = vor.u32 1.1754944e-38, %v610_v56  ;;  %vm609_vm7 = vcmp.eq.f32.partialorder %v608_v49, 8.507059e+37 }
 0x110   :  { %v1878_v55 = vpop.eup %1877 }
 0x111   :  { %v583_v45 = vadd.f32 1.0, %v1878_v55 }
 0x112   :  { %v1880_v54 = vpop.eup %1879 }
 0x113   :  { %v1882_v61 = vpop.eup %1881  ;;  %v585_v44 = vmul.f32 %v1880_v54, %v581_v26  ;;  %1883 = vrcp.f32 %v583_v45  ;;  %vm590_vm0 = vweird.f32 %v1880_v54  ;;  %v625_v46 = vand.u32 2147483648, %v583_v45 }
 0x114   :  { %v600_v39 = vmul.f32 %v1882_v61, %v582_v47  ;;  %1885 = vtanh.f32 %v571_v51  ;;  %vm605_vm1 = vweird.f32 %v1882_v61  ;;  %vm591_vm4 = vmor %vm589_vm2, %vm590_vm0  ;;  %vm619_vm9 = vweird.f32 %v583_v45 }
 0x115   :  { %v586_v58 = vsub.f32 1.0, %v585_v44  ;;  %vm606_vm5 = vmor %vm604_vm3, %vm605_vm1  ;;  %v416_v44 = vld [vmem:[#allocation12] sm:$0xff]  ;;  %v623_v56 = vand.u32 2147483647, %v583_v45  ;;  %v626_v60 = vor.u32 1.1754944e-38, %v625_v46 }
 0x116   :  { %v601_v0 = vsub.f32 1.0, %v600_v39 }
 0x117   :  { %v587_v59 = vmul.f32 %v1880_v54, %v586_v58  ;;  %vm624_vm11 = vcmp.eq.f32.partialorder %v623_v56, 8.507059e+37 }
 0x118   :  { %v602_v13 = vmul.f32 %v1882_v61, %v601_v0 }
 0x119   :  { %v1884_v57 = vpop.eup %1883  ;;  %v588_v62 = vadd.f32 %v1880_v54, %v587_v59 }
 0x11a   :  { %v615_v52 = vmul.f32 %v1884_v57, %v583_v45  ;;  %v603_v55 = vadd.f32 %v1882_v61, %v602_v13  ;;  %v1886_v51 = vpop.eup %1885  ;;  %vm620_vm8 = vweird.f32 %v1884_v57 }
 0x11b   :  { %v592_v39 = vsel %vm591_vm4, %v1880_v54, %v588_v62  ;;  %vm621_vm10 = vmor %vm619_vm9, %vm620_vm8 }
 0x11c   :  { %v616_v58 = vsub.f32 1.0, %v615_v52  ;;  %v597_v53 = vsel %vm594_vm6, %v596_v48, %v592_v39  ;;  %v607_v63 = vsel %vm606_vm5, %v1882_v61, %v603_v55  ;;  %v3512_v48 = vld [vmem:[#allocation54_spill] sm:$0xff] }
 0x11d   :  { %v612_v0 = vsel %vm609_vm7, %v611_v50, %v607_v63  ;;  %v631_v43 = vmul.f32 %v1886_v51, %v597_v53 }
 0x11e   :  { %v630_v42 = vmul.f32 %v612_v0, %v416_v44  ;;  %v617_v59 = vmul.f32 %v1884_v57, %v616_v58 }
 0x120   :  { %v2813_v26 = vadd.f32 %v631_v43, %v630_v42  ;;  %v618_v47 = vadd.f32 %v1884_v57, %v617_v59 }
 0x122   :  { %1887 = vtanh.f32 %v2813_v26  ;;  %v622_v54 = vsel %vm621_vm10, %v1884_v57, %v618_v47 }
 0x123   :  { %v627_v61 = vsel %vm624_vm11, %v626_v60, %v622_v54 }
 0x128   :  { %v1888_v13 = vpop.eup %1887 }
 0x129   :  { %v634_v49 = vmul.f32 %v1888_v13, %v627_v61 }
 0x12b   :  { %658 = vmatmul.f32.vlgmr.msra.gmra.mxu0 %v634_v49  ;;  %678 = vmatmul.f32.vlgmr.msra.gmra.mxu1 %v634_v49 }
 0x12c   :  { %698 = vmatmul.f32.vlgmr.msra.gmra.mxu2 %v634_v49  ;;  %718 = vmatmul.f32.vlgmr.msra.gmra.mxu3 %v634_v49 }
 0x12d   :  { %950 = vmatpush.msra.mxu0 %v2411_v1  ;;  %970 = vmatpush.msra.mxu1 %v2413_v2  ;;  %v3483_v1 = vld [vmem:[#allocation25_spill] sm:$0xff]  ;;  %v3484_v2 = vld [vmem:[#allocation26_spill] sm:$0xff] }
 0x12e   :  { %990 = vmatpush.msra.mxu2 %v2415_v3  ;;  %1010 = vmatpush.msra.mxu3 %v2417_v4  ;;  %v3485_v3 = vld [vmem:[#allocation27_spill] sm:$0xff]  ;;  %v3486_v4 = vld [vmem:[#allocation28_spill] sm:$0xff] }
 0x12f   :  { %951 = vmatpush.msra.mxu0 %v2419_v5  ;;  %971 = vmatpush.msra.mxu1 %v2421_v6  ;;  %v3487_v5 = vld [vmem:[#allocation29_spill] sm:$0xff]  ;;  %v3488_v6 = vld [vmem:[#allocation30_spill] sm:$0xff] }
 0x130   :  { %991 = vmatpush.msra.mxu2 %v2425_v7  ;;  %1011 = vmatpush.msra.mxu3 %v2427_v8  ;;  %v3489_v7 = vld [vmem:[#allocation31_spill] sm:$0xff]  ;;  %v3490_v8 = vld [vmem:[#allocation32_spill] sm:$0xff] }
 0x131   :  { %952 = vmatpush.msra.mxu0 %v2430_v9  ;;  %972 = vmatpush.msra.mxu1 %v2432_v10  ;;  %v3491_v9 = vld [vmem:[#allocation33_spill] sm:$0xff]  ;;  %v3492_v10 = vld [vmem:[#allocation34_spill] sm:$0xff] }
 0x132   :  { %992 = vmatpush.msra.mxu2 %v2437_v11  ;;  %1012 = vmatpush.msra.mxu3 %v2439_v12  ;;  %v3493_v11 = vld [vmem:[#allocation35_spill] sm:$0xff]  ;;  %v3494_v12 = vld [vmem:[#allocation36_spill] sm:$0xff] }
 0x133   :  { %953 = vmatpush.msra.mxu0 %v2445_v14  ;;  %973 = vmatpush.msra.mxu1 %v2447_v15  ;;  %v3495_v14 = vld [vmem:[#allocation37_spill] sm:$0xff]  ;;  %v3496_v15 = vld [vmem:[#allocation38_spill] sm:$0xff] }
 0x134   :  { %993 = vmatpush.msra.mxu2 %v2451_v16  ;;  %1013 = vmatpush.msra.mxu3 %v2453_v17  ;;  %v3497_v16 = vld [vmem:[#allocation39_spill] sm:$0xff]  ;;  %v3498_v17 = vld [vmem:[#allocation40_spill] sm:$0xff] }
 0x135   :  { %954 = vmatpush.msra.mxu0 %v2455_v18  ;;  %974 = vmatpush.msra.mxu1 %v2457_v19  ;;  %v3499_v18 = vld [vmem:[#allocation41_spill] sm:$0xff]  ;;  %v3500_v19 = vld [vmem:[#allocation42_spill] sm:$0xff] }
 0x136   :  { %994 = vmatpush.msra.mxu2 %v2461_v20  ;;  %1014 = vmatpush.msra.mxu3 %v2463_v21  ;;  %v3501_v20 = vld [vmem:[#allocation43_spill] sm:$0xff]  ;;  %v3502_v21 = vld [vmem:[#allocation44_spill] sm:$0xff] }
 0x137   :  { %955 = vmatpush.msra.mxu0 %v2466_v22  ;;  %975 = vmatpush.msra.mxu1 %v2468_v23  ;;  %v3503_v22 = vld [vmem:[#allocation45_spill] sm:$0xff]  ;;  %v3504_v23 = vld [vmem:[#allocation46_spill] sm:$0xff] }
 0x138   :  { %995 = vmatpush.msra.mxu2 %v2473_v24  ;;  %1015 = vmatpush.msra.mxu3 %v2475_v25  ;;  %v3505_v24 = vld [vmem:[#allocation47_spill] sm:$0xff]  ;;  %v3506_v25 = vld [vmem:[#allocation48_spill] sm:$0xff] }
 0x139   :  { %956 = vmatpush.msra.mxu0 %v2481_v27  ;;  %976 = vmatpush.msra.mxu1 %v2483_v28  ;;  %v3507_v27 = vld [vmem:[#allocation49_spill] sm:$0xff]  ;;  %v3508_v28 = vld [vmem:[#allocation50_spill] sm:$0xff] }
 0x13a   :  { %996 = vmatpush.msra.mxu2 %v2487_v29  ;;  %1016 = vmatpush.msra.mxu3 %v2489_v30 }
 0x13b   :  { %957 = vmatpush.msra.mxu0 %v2491_v31  ;;  %977 = vmatpush.msra.mxu1 %v2493_v32  ;;  %v3509_v31 = vld [vmem:[#allocation51_spill] sm:$0xff] }
 0x13c   :  { %997 = vmatpush.msra.mxu2 %v2497_v33  ;;  %1017 = vmatpush.msra.mxu3 %v2499_v34  ;;  %v3510_v33 = vld [vmem:[#allocation52_spill] sm:$0xff] }
 0x13d   :  { %958 = vmatpush.msra.mxu0 %v2502_v35  ;;  %978 = vmatpush.msra.mxu1 %v2504_v36 }
 0x13e   :  { %998 = vmatpush.msra.mxu2 %v2509_v37  ;;  %1018 = vmatpush.msra.mxu3 %v2511_v38  ;;  %v3511_v38 = vld [vmem:[#allocation53_spill] sm:$0xff] }
 0x13f   :  { %959 = vmatpush.msra.mxu0 %v2517_v40  ;;  %979 = vmatpush.msra.mxu1 %v2519_v41 }
 0x140   :  { %999 = vmatpush.msra.mxu2 %v3483_v1  ;;  %1019 = vmatpush.msra.mxu3 %v3484_v2 }
 0x141   :  { %960 = vmatpush.msra.mxu0 %v3485_v3  ;;  %980 = vmatpush.msra.mxu1 %v3486_v4 }
 0x142   :  { %1000 = vmatpush.msra.mxu2 %v3487_v5  ;;  %1020 = vmatpush.msra.mxu3 %v3488_v6 }
 0x143   :  { %961 = vmatpush.msra.mxu0 %v3489_v7  ;;  %981 = vmatpush.msra.mxu1 %v3490_v8 }
 0x144   :  { %1001 = vmatpush.msra.mxu2 %v3491_v9  ;;  %1021 = vmatpush.msra.mxu3 %v3492_v10 }
 0x145   :  { %962 = vmatpush.msra.mxu0 %v3493_v11  ;;  %982 = vmatpush.msra.mxu1 %v3494_v12 }
 0x146   :  { %1002 = vmatpush.msra.mxu2 %v3495_v14  ;;  %1022 = vmatpush.msra.mxu3 %v3496_v15 }
 0x147   :  { %963 = vmatpush.msra.mxu0 %v3497_v16  ;;  %983 = vmatpush.msra.mxu1 %v3498_v17 }
 0x148   :  { %1003 = vmatpush.msra.mxu2 %v3499_v18  ;;  %1023 = vmatpush.msra.mxu3 %v3500_v19 }
 0x149   :  { %964 = vmatpush.msra.mxu0 %v3501_v20  ;;  %984 = vmatpush.msra.mxu1 %v3502_v21 }
 0x14a   :  { %1004 = vmatpush.msra.mxu2 %v3503_v22  ;;  %1024 = vmatpush.msra.mxu3 %v3504_v23 }
 0x14b   :  { %965 = vmatpush.msra.mxu0 %v3505_v24  ;;  %985 = vmatpush.msra.mxu1 %v3506_v25 }
 0x14c   :  { %1005 = vmatpush.msra.mxu2 %v3507_v27  ;;  %1025 = vmatpush.msra.mxu3 %v3508_v28 }
 0x1a8   :  { %v659_v29 = vpop.f32.mrf.mxu0  ;;  %v679_v30 = vpop.f32.mrf.mxu1 }
 0x1a9   :  { %v722_v32 = vadd.f32 %v659_v29, %v3509_v31  ;;  %v723_v34 = vadd.f32 %v679_v30, %v3510_v33  ;;  %v2891_v29 = vld [vmem:[#allocation9 + $0x1e8] sm:$0xff]  ;;  %v2894_v30 = vld [vmem:[#allocation9 + $0x1f0] sm:$0xff]  ;;  %v2897_v31 = vld [vmem:[#allocation9 + $0x1f8] sm:$0xff] }
 0x1aa   :  { %v2903_v33 = vld [vmem:[#allocation9 + $0x1c8] sm:$0xff] }
 0x1ab   :  { %v1836_v35 = vmul.f32 -1.442695, %v722_v32  ;;  %v1837_v36 = vmul.f32 -1.442695, %v723_v34  ;;  %v2900_v32 = vld [vmem:[#allocation9 + $0x1c0] sm:$0xff]  ;;  %v2906_v34 = vld [vmem:[#allocation9 + $0x1d0] sm:$0xff] }
 0x1ad   :  { %1889 = vpow2.f32 %v1836_v35  ;;  %v2909_v35 = vld [vmem:[#allocation9 + $0x1d8] sm:$0xff] }
 0x1ae   :  { %1891 = vpow2.f32 %v1837_v36  ;;  %v2912_v36 = vld [vmem:[#allocation9 + $0x1a0] sm:$0xff] }
 0x1af   :  { %v699_v37 = vpop.f32.mrf.mxu2  ;;  %v719_v57 = vpop.f32.mrf.mxu3 }
 0x1b0   :  { %v724_v40 = vadd.f32 %v699_v37, %v3511_v38  ;;  %v725_v55 = vadd.f32 %v719_v57, %v3512_v48  ;;  %v2915_v37 = vld [vmem:[#allocation9 + $0x1a8] sm:$0xff]  ;;  %v2918_v38 = vld [vmem:[#allocation9 + $0x1b0] sm:$0xff] }
 0x1b1   :  { %v2939_v57 = vld [vmem:[#allocation9 + $0x168] sm:$0xff] }
 0x1b2   :  { %v1838_v41 = vmul.f32 -1.442695, %v724_v40  ;;  %v2921_v40 = vld [vmem:[#allocation9 + $0x1b8] sm:$0xff]  ;;  %v2951_v48 = vld [vmem:[#allocation9 + $0x148] sm:$0xff] }
 0x1b3   :  { %v1890_v42 = vpop.eup %1889 }
 0x1b4   :  { %v1892_v43 = vpop.eup %1891  ;;  %v735_v63 = vadd.f32 1.0, %v1890_v42  ;;  %1893 = vpow2.f32 %v1838_v41  ;;  %v2924_v41 = vld [vmem:[#allocation9 + $0x180] sm:$0xff]  ;;  %v2927_v42 = vld [vmem:[#allocation9 + $0x188] sm:$0xff] }
 0x1b5   :  { %v736_v53 = vadd.f32 1.0, %v1892_v43  ;;  %v2930_v43 = vld [vmem:[#allocation9 + $0x190] sm:$0xff] }
 0x1b6   :  { %1895 = vrcp.f32 %v735_v63  ;;  %v749_v0 = vand.u32 2147483648, %v735_v63  ;;  %v747_v46 = vand.u32 2147483647, %v735_v63  ;;  %vm743_vm14 = vweird.f32 %v735_v63 }
 0x1b7   :  { %1897 = vrcp.f32 %v736_v53  ;;  %v764_v59 = vand.u32 2147483648, %v736_v53  ;;  %v762_v54 = vand.u32 2147483647, %v736_v53  ;;  %vm758_vm15 = vweird.f32 %v736_v53 }
 0x1b8   :  { %v750_v49 = vor.u32 1.1754944e-38, %v749_v0  ;;  %vm748_vm2 = vcmp.eq.f32.partialorder %v747_v46, 8.507059e+37  ;;  %v2972_v0 = vld [vmem:[#allocation9 + $0x100] sm:$0xff]  ;;  %v2981_v46 = vld [vmem:[#allocation9 + $0x118] sm:$0xff] }
 0x1b9   :  { %v765_v2 = vor.u32 1.1754944e-38, %v764_v59  ;;  %vm763_vm3 = vcmp.eq.f32.partialorder %v762_v54, 8.507059e+37  ;;  %v2975_v59 = vld [vmem:[#allocation9 + $0x108] sm:$0xff] }
 0x1ba   :  { %v1894_v45 = vpop.eup %1893  ;;  %v2987_v54 = vld [vmem:[#allocation9 + $0xe8] sm:$0xff] }
 0x1bb   :  { %v737_v62 = vadd.f32 1.0, %v1894_v45  ;;  %v2942_v45 = vld [vmem:[#allocation9 + $0x170] sm:$0xff] }
 0x1bc   :  { %v1896_v52 = vpop.eup %1895 }
 0x1bd   :  { %v1898_v50 = vpop.eup %1897  ;;  %v739_v44 = vmul.f32 %v1896_v52, %v735_v63  ;;  %1899 = vrcp.f32 %v737_v62  ;;  %vm744_vm12 = vweird.f32 %v1896_v52  ;;  %v779_v15 = vand.u32 2147483648, %v737_v62  ;;  %v2933_v63 = vld [vmem:[#allocation9 + $0x198] sm:$0xff] }
 0x1be   :  { %v754_v39 = vmul.f32 %v1898_v50, %v736_v53  ;;  %1901 = vtanh.f32 %v725_v55  ;;  %vm759_vm13 = vweird.f32 %v1898_v50  ;;  %vm745_vm0 = vmor %vm743_vm14, %vm744_vm12  ;;  %vm773_vm5 = vweird.f32 %v737_v62  ;;  %v2936_v53 = vld [vmem:[#allocation9 + $0x160] sm:$0xff]  ;;  %v2954_v55 = vld [vmem:[#allocation9 + $0x150] sm:$0xff] }
 0x1bf   :  { %v740_v51 = vsub.f32 1.0, %v739_v44  ;;  %vm760_vm1 = vmor %vm758_vm15, %vm759_vm13  ;;  %v777_v16 = vand.u32 2147483647, %v737_v62  ;;  %v780_v18 = vor.u32 1.1754944e-38, %v779_v15  ;;  %v2960_v44 = vld [vmem:[#allocation9 + $0x120] sm:$0xff]  ;;  %v3038_v15 = vld [vmem:[#allocation9 + $0x70] sm:$0xff] }
 0x1c0   :  { %v755_v58 = vsub.f32 1.0, %v754_v39  ;;  %v2963_v39 = vld [vmem:[#allocation9 + $0x128] sm:$0xff]  ;;  %3525 = vst [vmem:[#allocation37_spill] sm:$0xff] %v3038_v15 }
 0x1c1   :  { %v741_v47 = vmul.f32 %v1896_v52, %v740_v51  ;;  %vm778_vm7 = vcmp.eq.f32.partialorder %v777_v16, 8.507059e+37  ;;  %v2966_v51 = vld [vmem:[#allocation9 + $0x130] sm:$0xff]  ;;  %v3041_v16 = vld [vmem:[#allocation9 + $0x78] sm:$0xff] }
 0x1c2   :  { %v756_v56 = vmul.f32 %v1898_v50, %v755_v58  ;;  %v2969_v58 = vld [vmem:[#allocation9 + $0x138] sm:$0xff]  ;;  %3526 = vst [vmem:[#allocation38_spill] sm:$0xff] %v3041_v16 }
 0x1c3   :  { %v1900_v60 = vpop.eup %1899  ;;  %v742_v13 = vadd.f32 %v1896_v52, %v741_v47  ;;  %v2978_v47 = vld [vmem:[#allocation9 + $0x110] sm:$0xff] }
 0x1c4   :  { %v769_v61 = vmul.f32 %v1900_v60, %v737_v62  ;;  %v757_v1 = vadd.f32 %v1898_v50, %v756_v56  ;;  %v1902_v4 = vpop.eup %1901  ;;  %vm774_vm4 = vweird.f32 %v1900_v60  ;;  %v2945_v62 = vld [vmem:[#allocation9 + $0x178] sm:$0xff]  ;;  %v2984_v56 = vld [vmem:[#allocation9 + $0xe0] sm:$0xff] }
 0x1c5   :  { %v746_v3 = vsel %vm745_vm0, %v1896_v52, %v742_v13  ;;  %vm775_vm6 = vmor %vm773_vm5, %vm774_vm4  ;;  %v2948_v52 = vld [vmem:[#allocation9 + $0x140] sm:$0xff]  ;;  %v2993_v13 = vld [vmem:[#allocation9 + $0xf8] sm:$0xff] }
 0x1c6   :  { %v770_v5 = vsub.f32 1.0, %v769_v61  ;;  %v751_v6 = vsel %vm748_vm2, %v750_v49, %v746_v3  ;;  %v761_v7 = vsel %vm760_vm1, %v1898_v50, %v757_v1  ;;  %v2957_v50 = vld [vmem:[#allocation9 + $0x158] sm:$0xff]  ;;  %v2996_v61 = vld [vmem:[#allocation9 + $0xc0] sm:$0xff]  ;;  %v2999_v49 = vld [vmem:[#allocation9 + $0xc8] sm:$0xff] }
 0x1c7   :  { %v766_v8 = vsel %vm763_vm3, %v765_v2, %v761_v7  ;;  %v785_v9 = vmul.f32 %v1902_v4, %v751_v6  ;;  %v3002_v1 = vld [vmem:[#allocation9 + $0xd0] sm:$0xff]  ;;  %v3005_v2 = vld [vmem:[#allocation9 + $0xd8] sm:$0xff]  ;;  %v3008_v3 = vld [vmem:[#allocation9 + $0xa0] sm:$0xff] }
 0x1c8   :  { %v784_v10 = vmul.f32 %v766_v8, %v2813_v26  ;;  %v771_v11 = vmul.f32 %v1900_v60, %v770_v5  ;;  %v2888_v26 = vld [vmem:[#allocation9 + $0x1e0] sm:$0xff]  ;;  %3513 = vst [vmem:[#allocation25_spill] sm:$0xff] %v3002_v1  ;;  %v3011_v4 = vld [vmem:[#allocation9 + $0xa8] sm:$0xff]  ;;  %v3014_v5 = vld [vmem:[#allocation9 + $0xb0] sm:$0xff] }
 0x1c9   :  { %3514 = vst [vmem:[#allocation26_spill] sm:$0xff] %v3005_v2  ;;  %v3017_v6 = vld [vmem:[#allocation9 + $0xb8] sm:$0xff]  ;;  %v3020_v7 = vld [vmem:[#allocation9 + $0x80] sm:$0xff]  ;;  %v3023_v8 = vld [vmem:[#allocation9 + $0x88] sm:$0xff] }
 0x1ca   :  { %v2885_v12 = vadd.f32 %v785_v9, %v784_v10  ;;  %v772_v14 = vadd.f32 %v1900_v60, %v771_v11  ;;  %3515 = vst [vmem:[#allocation27_spill] sm:$0xff] %v3008_v3  ;;  %v3026_v9 = vld [vmem:[#allocation9 + $0x90] sm:$0xff]  ;;  %v3029_v10 = vld [vmem:[#allocation9 + $0x98] sm:$0xff]  ;;  %v3032_v11 = vld [vmem:[#allocation9 + $0x60] sm:$0xff] }
 0x1cb   :  { %3516 = vst [vmem:[#allocation28_spill] sm:$0xff] %v3011_v4 }
 0x1cc   :  { %1903 = vtanh.f32 %v2885_v12  ;;  %v776_v17 = vsel %vm775_vm6, %v1900_v60, %v772_v14  ;;  %v2990_v60 = vld [vmem:[#allocation9 + $0xf0] sm:$0xff]  ;;  %3517 = vst [vmem:[#allocation29_spill] sm:$0xff] %v3014_v5  ;;  %v3035_v14 = vld [vmem:[#allocation9 + $0x68] sm:$0xff] }
 0x1cd   :  { %v781_v20 = vsel %vm778_vm7, %v780_v18, %v776_v17  ;;  %3518 = vst [vmem:[#allocation30_spill] sm:$0xff] %v3017_v6  ;;  %v3044_v17 = vld [vmem:[#allocation9 + $0x40] sm:$0xff]  ;;  %v3047_v18 = vld [vmem:[#allocation9 + $0x48] sm:$0xff] }
 0x1ce   :  { %3519 = vst [vmem:[#allocation31_spill] sm:$0xff] %v3020_v7 }
 0x1cf   :  { %3520 = vst [vmem:[#allocation32_spill] sm:$0xff] %v3023_v8 }
 0x1d0   :  { %3521 = vst [vmem:[#allocation33_spill] sm:$0xff] %v3026_v9 }
 0x1d1   :  { %3522 = vst [vmem:[#allocation34_spill] sm:$0xff] %v3029_v10 }
 0x1d2   :  { %v1904_v19 = vpop.eup %1903  ;;  %3523 = vst [vmem:[#allocation35_spill] sm:$0xff] %v3032_v11 }
 0x1d3   :  { %v788_v21 = vmul.f32 %v1904_v19, %v781_v20  ;;  %3524 = vst [vmem:[#allocation36_spill] sm:$0xff] %v3035_v14  ;;  %v3050_v19 = vld [vmem:[#allocation9 + $0x50] sm:$0xff]  ;;  %v3053_v20 = vld [vmem:[#allocation9 + $0x58] sm:$0xff] }
 0x1d4   :  { %3527 = vst [vmem:[#allocation39_spill] sm:$0xff] %v3044_v17 }
 0x1d5   :  { %812 = vmatmul.f32.vlgmr.msrb.gmra.mxu0 %v788_v21  ;;  %832 = vmatmul.f32.vlgmr.msrb.gmra.mxu1 %v788_v21  ;;  %3528 = vst [vmem:[#allocation40_spill] sm:$0xff] %v3047_v18 }
 0x1d6   :  { %852 = vmatmul.f32.vlgmr.msrb.gmra.mxu2 %v788_v21  ;;  %872 = vmatmul.f32.vlgmr.msrb.gmra.mxu3 %v788_v21  ;;  %3529 = vst [vmem:[#allocation41_spill] sm:$0xff] %v3050_v19  ;;  %v3056_v21 = vld [vmem:[#allocation9 + $0x20] sm:$0xff] }
 0x1d7   :  { %1104 = vmatpush.msrb.mxu0 %v2888_v26  ;;  %1124 = vmatpush.msrb.mxu1 %v2891_v29  ;;  %3530 = vst [vmem:[#allocation42_spill] sm:$0xff] %v3053_v20 }
 0x1d8   :  { %1144 = vmatpush.msrb.mxu2 %v2894_v30  ;;  %1164 = vmatpush.msrb.mxu3 %v2897_v31  ;;  %3531 = vst [vmem:[#allocation43_spill] sm:$0xff] %v3056_v21 }
 0x1d9   :  { %1105 = vmatpush.msrb.mxu0 %v2900_v32  ;;  %1125 = vmatpush.msrb.mxu1 %v2903_v33 }
 0x1da   :  { %1145 = vmatpush.msrb.mxu2 %v2906_v34  ;;  %1165 = vmatpush.msrb.mxu3 %v2909_v35 }
 0x1db   :  { %1106 = vmatpush.msrb.mxu0 %v2912_v36  ;;  %1126 = vmatpush.msrb.mxu1 %v2915_v37 }
 0x1dc   :  { %1146 = vmatpush.msrb.mxu2 %v2918_v38  ;;  %1166 = vmatpush.msrb.mxu3 %v2921_v40 }
 0x1dd   :  { %1107 = vmatpush.msrb.mxu0 %v2924_v41  ;;  %1127 = vmatpush.msrb.mxu1 %v2927_v42 }
 0x1de   :  { %1147 = vmatpush.msrb.mxu2 %v2930_v43  ;;  %1167 = vmatpush.msrb.mxu3 %v2933_v63 }
 0x1df   :  { %1108 = vmatpush.msrb.mxu0 %v2936_v53  ;;  %1128 = vmatpush.msrb.mxu1 %v2939_v57 }
 0x1e0   :  { %1148 = vmatpush.msrb.mxu2 %v2942_v45  ;;  %1168 = vmatpush.msrb.mxu3 %v2945_v62 }
 0x1e1   :  { %1109 = vmatpush.msrb.mxu0 %v2948_v52  ;;  %1129 = vmatpush.msrb.mxu1 %v2951_v48 }
 0x1e2   :  { %1149 = vmatpush.msrb.mxu2 %v2954_v55  ;;  %1169 = vmatpush.msrb.mxu3 %v2957_v50 }
 0x1e3   :  { %1110 = vmatpush.msrb.mxu0 %v2960_v44  ;;  %1130 = vmatpush.msrb.mxu1 %v2963_v39 }
 0x1e4   :  { %1150 = vmatpush.msrb.mxu2 %v2966_v51  ;;  %1170 = vmatpush.msrb.mxu3 %v2969_v58 }
 0x1e5   :  { %1111 = vmatpush.msrb.mxu0 %v2972_v0  ;;  %1131 = vmatpush.msrb.mxu1 %v2975_v59 }
 0x1e6   :  { %1151 = vmatpush.msrb.mxu2 %v2978_v47  ;;  %1171 = vmatpush.msrb.mxu3 %v2981_v46 }
 0x1e7   :  { %1112 = vmatpush.msrb.mxu0 %v2984_v56  ;;  %1132 = vmatpush.msrb.mxu1 %v2987_v54 }
 0x1e8   :  { %1152 = vmatpush.msrb.mxu2 %v2990_v60  ;;  %1172 = vmatpush.msrb.mxu3 %v2993_v13 }
 0x1e9   :  { %1113 = vmatpush.msrb.mxu0 %v2996_v61  ;;  %1133 = vmatpush.msrb.mxu1 %v2999_v49 }
 0x1ea   :  { %1153 = vmatpush.msrb.mxu2 %v3002_v1  ;;  %1173 = vmatpush.msrb.mxu3 %v3005_v2 }
 0x1eb   :  { %1114 = vmatpush.msrb.mxu0 %v3008_v3  ;;  %1134 = vmatpush.msrb.mxu1 %v3011_v4 }
 0x1ec   :  { %1154 = vmatpush.msrb.mxu2 %v3014_v5  ;;  %1174 = vmatpush.msrb.mxu3 %v3017_v6 }
 0x1ed   :  { %1115 = vmatpush.msrb.mxu0 %v3020_v7  ;;  %1135 = vmatpush.msrb.mxu1 %v3023_v8 }
 0x1ee   :  { %1155 = vmatpush.msrb.mxu2 %v3026_v9  ;;  %1175 = vmatpush.msrb.mxu3 %v3029_v10 }
 0x1ef   :  { %1116 = vmatpush.msrb.mxu0 %v3032_v11  ;;  %1136 = vmatpush.msrb.mxu1 %v3035_v14 }
 0x1f0   :  { %1156 = vmatpush.msrb.mxu2 %v3038_v15  ;;  %1176 = vmatpush.msrb.mxu3 %v3041_v16  ;;  %v3059_v16 = vld [vmem:[#allocation9 + $0x28] sm:$0xff] }
 0x1f1   :  { %1117 = vmatpush.msrb.mxu0 %v3044_v17  ;;  %1137 = vmatpush.msrb.mxu1 %v3047_v18  ;;  %3532 = vst [vmem:[#allocation44_spill] sm:$0xff] %v3059_v16  ;;  %v3533_v18 = vld [vmem:[#allocation55_spill] sm:$0xff]  ;;  %v3534_v17 = vld [vmem:[#allocation56_spill] sm:$0xff] }
 0x1f2   :  { %1157 = vmatpush.msrb.mxu2 %v3050_v19  ;;  %1177 = vmatpush.msrb.mxu3 %v3053_v20 }
 0x1f3   :  { %1118 = vmatpush.msrb.mxu0 %v3056_v21  ;;  %1138 = vmatpush.msrb.mxu1 %v3059_v16 }
 0x1f4   :  { %1158 = vmatpush.msrb.mxu2 %v3503_v22  ;;  %1178 = vmatpush.msrb.mxu3 %v3504_v23  ;;  %v3535_v23 = vld [vmem:[#allocation57_spill] sm:$0xff] }
 0x1f5   :  { %1119 = vmatpush.msrb.mxu0 %v3505_v24  ;;  %1139 = vmatpush.msrb.mxu1 %v3506_v25 }
 0x1f6   :  { %1159 = vmatpush.msrb.mxu2 %v3507_v27  ;;  %1179 = vmatpush.msrb.mxu3 %v3508_v28 }
 0x252   :  { %v813_v20 = vpop.f32.mrf.mxu0  ;;  %v833_v19 = vpop.f32.mrf.mxu1 }
 0x253   :  { %v876_v21 = vadd.f32 %v813_v20, %v3533_v18  ;;  %v877_v15 = vadd.f32 %v833_v19, %v3534_v17  ;;  %v3536_v17 = vld [vmem:[#allocation58_spill] sm:$0xff] }
 0x255   :  { %v1839_v14 = vmul.f32 -1.442695, %v876_v21  ;;  %v1840_v16 = vmul.f32 -1.442695, %v877_v15 }
 0x257   :  { %1905 = vpow2.f32 %v1839_v14 }
 0x258   :  { %1907 = vpow2.f32 %v1840_v16 }
 0x259   :  { %v853_v22 = vpop.f32.mrf.mxu2  ;;  %v873_v28 = vpop.f32.mrf.mxu3 }
 0x25a   :  { %v878_v11 = vadd.f32 %v853_v22, %v3535_v23  ;;  %v879_v19 = vadd.f32 %v873_v28, %v3536_v17 }
 0x25c   :  { %v1841_v24 = vmul.f32 -1.442695, %v878_v11 }
 0x25d   :  { %v1906_v10 = vpop.eup %1905 }
 0x25e   :  { %v1908_v25 = vpop.eup %1907  ;;  %v889_v9 = vadd.f32 1.0, %v1906_v10  ;;  %1909 = vpow2.f32 %v1841_v24 }
 0x25f   :  { %v890_v27 = vadd.f32 1.0, %v1908_v25 }
 0x260   :  { %1911 = vrcp.f32 %v889_v9  ;;  %v903_v11 = vand.u32 2147483648, %v889_v9  ;;  %v901_v24 = vand.u32 2147483647, %v889_v9  ;;  %vm897_vm10 = vweird.f32 %v889_v9 }
 0x261   :  { %1913 = vrcp.f32 %v890_v27  ;;  %v918_v23 = vand.u32 2147483648, %v890_v27  ;;  %v916_v7 = vand.u32 2147483647, %v890_v27  ;;  %vm912_vm11 = vweird.f32 %v890_v27 }
 0x262   :  { %v904_v17 = vor.u32 1.1754944e-38, %v903_v11  ;;  %vm902_vm14 = vcmp.eq.f32.partialorder %v901_v24, 8.507059e+37 }
 0x263   :  { %vm917_vm15 = vcmp.eq.f32.partialorder %v916_v7, 8.507059e+37 }
 0x264   :  { %v1910_v8 = vpop.eup %1909 }
 0x265   :  { %v891_v18 = vadd.f32 1.0, %v1910_v8 }
 0x266   :  { %v1912_v20 = vpop.eup %1911 }
 0x267   :  { %v1914_v15 = vpop.eup %1913  ;;  %v893_v14 = vmul.f32 %v1912_v20, %v889_v9  ;;  %1915 = vrcp.f32 %v891_v18  ;;  %vm898_vm8 = vweird.f32 %v1912_v20  ;;  %v933_v11 = vand.u32 2147483648, %v891_v18 }
 0x268   :  { %v908_v16 = vmul.f32 %v1914_v15, %v890_v27  ;;  %1917 = vtanh.f32 %v879_v19  ;;  %vm913_vm9 = vweird.f32 %v1914_v15  ;;  %vm899_vm12 = vmor %vm897_vm10, %vm898_vm8  ;;  %vm927_vm1 = vweird.f32 %v891_v18 }
 0x269   :  { %v894_v21 = vsub.f32 1.0, %v893_v14  ;;  %vm914_vm13 = vmor %vm912_vm11, %vm913_vm9  ;;  %v919_v14 = vor.u32 1.1754944e-38, %v918_v23  ;;  %v934_v24 = vor.u32 1.1754944e-38, %v933_v11  ;;  %v3555_v11 = vld [vmem:[#allocation43_spill] sm:$0xff] }
 0x26a   :  { %v909_v22 = vsub.f32 1.0, %v908_v16 }
 0x26b   :  { %v895_v10 = vmul.f32 %v1912_v20, %v894_v21 }
 0x26c   :  { %v910_v25 = vmul.f32 %v1914_v15, %v909_v22 }
 0x26d   :  { %v1916_v6 = vpop.eup %1915  ;;  %v896_v8 = vadd.f32 %v1912_v20, %v895_v10 }
 0x26e   :  { %v923_v28 = vmul.f32 %v1916_v6, %v891_v18  ;;  %v911_v5 = vadd.f32 %v1914_v15, %v910_v25  ;;  %v1918_v19 = vpop.eup %1917  ;;  %vm928_vm0 = vweird.f32 %v1916_v6  ;;  %v3544_v25 = vld [vmem:[#allocation32_spill] sm:$0xff] }
 0x26f   :  { %v900_v16 = vsel %vm899_vm12, %v1912_v20, %v896_v8  ;;  %v931_v20 = vand.u32 2147483647, %v891_v18  ;;  %vm929_vm2 = vmor %vm927_vm1, %vm928_vm0  ;;  %v3542_v18 = vld [vmem:[#allocation30_spill] sm:$0xff]  ;;  %v3545_v8 = vld [vmem:[#allocation33_spill] sm:$0xff] }
 0x270   :  { %v924_v4 = vsub.f32 1.0, %v923_v28  ;;  %v905_v21 = vsel %vm902_vm14, %v904_v17, %v900_v16  ;;  %v915_v3 = vsel %vm914_vm13, %v1914_v15, %v911_v5  ;;  %v3543_v15 = vld [vmem:[#allocation31_spill] sm:$0xff]  ;;  %v3546_v28 = vld [vmem:[#allocation34_spill] sm:$0xff]  ;;  %v3549_v16 = vld [vmem:[#allocation37_spill] sm:$0xff] }
 0x271   :  { %v920_v22 = vsel %vm917_vm15, %v919_v14, %v915_v3  ;;  %v939_v2 = vmul.f32 %v1918_v19, %v905_v21  ;;  %vm932_vm3 = vcmp.eq.f32.partialorder %v931_v20, 8.507059e+37  ;;  %v3547_v17 = vld [vmem:[#allocation35_spill] sm:$0xff]  ;;  %v3548_v14 = vld [vmem:[#allocation36_spill] sm:$0xff]  ;;  %v3550_v19 = vld [vmem:[#allocation38_spill] sm:$0xff] }
 0x272   :  { %v938_v1 = vmul.f32 %v920_v22, %v2885_v12  ;;  %v925_v10 = vmul.f32 %v1916_v6, %v924_v4  ;;  %v3537_v12 = vld [vmem:[#allocation25_spill] sm:$0xff]  ;;  %v3540_v4 = vld [vmem:[#allocation28_spill] sm:$0xff]  ;;  %v3551_v21 = vld [vmem:[#allocation39_spill] sm:$0xff] }
 0x273   :  { %v3552_v22 = vld [vmem:[#allocation40_spill] sm:$0xff] }
 0x274   :  { %v3073_v9 = vadd.f32 %v939_v2, %v938_v1  ;;  %v926_v27 = vadd.f32 %v1916_v6, %v925_v10  ;;  %v3538_v1 = vld [vmem:[#allocation26_spill] sm:$0xff]  ;;  %v3539_v2 = vld [vmem:[#allocation27_spill] sm:$0xff]  ;;  %v3553_v10 = vld [vmem:[#allocation41_spill] sm:$0xff] }
 0x275   :  { %v3556_v20 = vld [vmem:[#allocation44_spill] sm:$0xff] }
 0x276   :  { %1919 = vtanh.f32 %v3073_v9  ;;  %v930_v23 = vsel %vm929_vm2, %v1916_v6, %v926_v27  ;;  %v3541_v6 = vld [vmem:[#allocation29_spill] sm:$0xff]  ;;  %v3554_v27 = vld [vmem:[#allocation42_spill] sm:$0xff] }
 0x277   :  { %v935_v7 = vsel %vm932_vm3, %v934_v24, %v930_v23  ;;  %v3134_v23 = vld [vmem:[#allocation9 + $0x30] sm:$0xff]  ;;  %v3137_v24 = vld [vmem:[#allocation9 + $0x38] sm:$0xff] }
 0x278   :  { %3557 = vst [vmem:[#allocation45_spill] sm:$0xff] %v3134_v23 }
 0x279   :  { %3558 = vst [vmem:[#allocation46_spill] sm:$0xff] %v3137_v24 }
 0x27c   :  { %v1920_v5 = vpop.eup %1919 }
 0x27d   :  { %v942_v3 = vmul.f32 %v1920_v5, %v935_v7  ;;  %v3140_v5 = vld [vmem:[#allocation9] sm:$0xff]  ;;  %v3143_v7 = vld [vmem:[#allocation9 + $0x8] sm:$0xff] }
 0x27e   :  { %3559 = vst [vmem:[#allocation47_spill] sm:$0xff] %v3140_v5 }
 0x27f   :  { %966 = vmatmul.f32.vlgmr.msra.gmra.mxu0 %v942_v3  ;;  %986 = vmatmul.f32.vlgmr.msra.gmra.mxu1 %v942_v3  ;;  %3560 = vst [vmem:[#allocation48_spill] sm:$0xff] %v3143_v7 }
 0x280   :  { %1006 = vmatmul.f32.vlgmr.msra.gmra.mxu2 %v942_v3  ;;  %1026 = vmatmul.f32.vlgmr.msra.gmra.mxu3 %v942_v3  ;;  %v3146_v3 = vld [vmem:[#allocation9 + $0x10] sm:$0xff] }
 0x281   :  { %1258 = vmatpush.msra.mxu0 %v2888_v26  ;;  %1278 = vmatpush.msra.mxu1 %v2891_v29  ;;  %3561 = vst [vmem:[#allocation49_spill] sm:$0xff] %v3146_v3 }
 0x282   :  { %1298 = vmatpush.msra.mxu2 %v2894_v30  ;;  %1318 = vmatpush.msra.mxu3 %v2897_v31 }
 0x283   :  { %1259 = vmatpush.msra.mxu0 %v2900_v32  ;;  %1279 = vmatpush.msra.mxu1 %v2903_v33 }
 0x284   :  { %1299 = vmatpush.msra.mxu2 %v2906_v34  ;;  %1319 = vmatpush.msra.mxu3 %v2909_v35 }
 0x285   :  { %1260 = vmatpush.msra.mxu0 %v2912_v36  ;;  %1280 = vmatpush.msra.mxu1 %v2915_v37 }
 0x286   :  { %1300 = vmatpush.msra.mxu2 %v2918_v38  ;;  %1320 = vmatpush.msra.mxu3 %v2921_v40 }
 0x287   :  { %1261 = vmatpush.msra.mxu0 %v2924_v41  ;;  %1281 = vmatpush.msra.mxu1 %v2927_v42 }
 0x288   :  { %1301 = vmatpush.msra.mxu2 %v2930_v43  ;;  %1321 = vmatpush.msra.mxu3 %v2933_v63 }
 0x289   :  { %1262 = vmatpush.msra.mxu0 %v2936_v53  ;;  %1282 = vmatpush.msra.mxu1 %v2939_v57 }
 0x28a   :  { %1302 = vmatpush.msra.mxu2 %v2942_v45  ;;  %1322 = vmatpush.msra.mxu3 %v2945_v62 }
 0x28b   :  { %1263 = vmatpush.msra.mxu0 %v2948_v52  ;;  %1283 = vmatpush.msra.mxu1 %v2951_v48 }
 0x28c   :  { %1303 = vmatpush.msra.mxu2 %v2954_v55  ;;  %1323 = vmatpush.msra.mxu3 %v2957_v50 }
 0x28d   :  { %1264 = vmatpush.msra.mxu0 %v2960_v44  ;;  %1284 = vmatpush.msra.mxu1 %v2963_v39 }
 0x28e   :  { %1304 = vmatpush.msra.mxu2 %v2966_v51  ;;  %1324 = vmatpush.msra.mxu3 %v2969_v58 }
 0x28f   :  { %1265 = vmatpush.msra.mxu0 %v2972_v0  ;;  %1285 = vmatpush.msra.mxu1 %v2975_v59 }
 0x290   :  { %1305 = vmatpush.msra.mxu2 %v2978_v47  ;;  %1325 = vmatpush.msra.mxu3 %v2981_v46 }
 0x291   :  { %1266 = vmatpush.msra.mxu0 %v2984_v56  ;;  %1286 = vmatpush.msra.mxu1 %v2987_v54 }
 0x292   :  { %1306 = vmatpush.msra.mxu2 %v2990_v60  ;;  %1326 = vmatpush.msra.mxu3 %v2993_v13 }
 0x293   :  { %1267 = vmatpush.msra.mxu0 %v2996_v61  ;;  %1287 = vmatpush.msra.mxu1 %v2999_v49 }
 0x294   :  { %1307 = vmatpush.msra.mxu2 %v3537_v12  ;;  %1327 = vmatpush.msra.mxu3 %v3538_v1 }
 0x295   :  { %1268 = vmatpush.msra.mxu0 %v3539_v2  ;;  %1288 = vmatpush.msra.mxu1 %v3540_v4 }
 0x296   :  { %1308 = vmatpush.msra.mxu2 %v3541_v6  ;;  %1328 = vmatpush.msra.mxu3 %v3542_v18 }
 0x297   :  { %1269 = vmatpush.msra.mxu0 %v3543_v15  ;;  %1289 = vmatpush.msra.mxu1 %v3544_v25 }
 0x298   :  { %1309 = vmatpush.msra.mxu2 %v3545_v8  ;;  %1329 = vmatpush.msra.mxu3 %v3546_v28 }
 0x299   :  { %1270 = vmatpush.msra.mxu0 %v3547_v17  ;;  %1290 = vmatpush.msra.mxu1 %v3548_v14 }
 0x29a   :  { %1310 = vmatpush.msra.mxu2 %v3549_v16  ;;  %1330 = vmatpush.msra.mxu3 %v3550_v19 }
 0x29b   :  { %1271 = vmatpush.msra.mxu0 %v3551_v21  ;;  %1291 = vmatpush.msra.mxu1 %v3552_v22 }
 0x29c   :  { %1311 = vmatpush.msra.mxu2 %v3553_v10  ;;  %1331 = vmatpush.msra.mxu3 %v3554_v27  ;;  %v3563_v27 = vld [vmem:[#allocation59_spill] sm:$0xff]  ;;  %v3564_v10 = vld [vmem:[#allocation60_spill] sm:$0xff] }
 0x29d   :  { %1272 = vmatpush.msra.mxu0 %v3555_v11  ;;  %1292 = vmatpush.msra.mxu1 %v3556_v20  ;;  %v3149_v20 = vld [vmem:[#allocation9 + $0x18] sm:$0xff] }
 0x29e   :  { %1312 = vmatpush.msra.mxu2 %v3134_v23  ;;  %1332 = vmatpush.msra.mxu3 %v3137_v24  ;;  %3562 = vst [vmem:[#allocation50_spill] sm:$0xff] %v3149_v20 }
 0x29f   :  { %1273 = vmatpush.msra.mxu0 %v3140_v5  ;;  %1293 = vmatpush.msra.mxu1 %v3143_v7  ;;  %v3565_v7 = vld [vmem:[#allocation61_spill] sm:$0xff] }
 0x2a0   :  { %1313 = vmatpush.msra.mxu2 %v3146_v3  ;;  %1333 = vmatpush.msra.mxu3 %v3149_v20 }
 0x2fc   :  { %v967_v23 = vpop.f32.mrf.mxu0  ;;  %v987_v11 = vpop.f32.mrf.mxu1 }
 0x2fd   :  { %v1030_v24 = vadd.f32 %v967_v23, %v3563_v27  ;;  %v1031_v22 = vadd.f32 %v987_v11, %v3564_v10  ;;  %v3566_v10 = vld [vmem:[#allocation62_spill] sm:$0xff] }
 0x2ff   :  { %v1842_v21 = vmul.f32 -1.442695, %v1030_v24  ;;  %v1843_v5 = vmul.f32 -1.442695, %v1031_v22 }
 0x301   :  { %1921 = vpow2.f32 %v1842_v21 }
 0x302   :  { %1923 = vpow2.f32 %v1843_v5 }
 0x303   :  { %v1007_v19 = vpop.f32.mrf.mxu2  ;;  %v1027_v20 = vpop.f32.mrf.mxu3 }
 0x304   :  { %v1032_v16 = vadd.f32 %v1007_v19, %v3565_v7  ;;  %v1033_v11 = vadd.f32 %v1027_v20, %v3566_v10 }
 0x306   :  { %v1844_v14 = vmul.f32 -1.442695, %v1032_v16 }
 0x307   :  { %v1922_v17 = vpop.eup %1921 }
 0x308   :  { %v1924_v3 = vpop.eup %1923  ;;  %v1043_v28 = vadd.f32 1.0, %v1922_v17  ;;  %1925 = vpow2.f32 %v1844_v14 }
 0x309   :  { %v1044_v8 = vadd.f32 1.0, %v1924_v3 }
 0x30a   :  { %1927 = vrcp.f32 %v1043_v28  ;;  %v1057_v16 = vand.u32 2147483648, %v1043_v28  ;;  %v1055_v14 = vand.u32 2147483647, %v1043_v28  ;;  %vm1051_vm6 = vweird.f32 %v1043_v28 }
 0x30b   :  { %1929 = vrcp.f32 %v1044_v8  ;;  %v1072_v7 = vand.u32 2147483648, %v1044_v8  ;;  %v1070_v15 = vand.u32 2147483647, %v1044_v8  ;;  %vm1066_vm7 = vweird.f32 %v1044_v8 }
 0x30c   :  { %v1058_v10 = vor.u32 1.1754944e-38, %v1057_v16  ;;  %vm1056_vm10 = vcmp.eq.f32.partialorder %v1055_v14, 8.507059e+37 }
 0x30d   :  { %vm1071_vm11 = vcmp.eq.f32.partialorder %v1070_v15, 8.507059e+37 }
 0x30e   :  { %v1926_v25 = vpop.eup %1925 }
 0x30f   :  { %v1045_v27 = vadd.f32 1.0, %v1926_v25 }
 0x310   :  { %v1928_v23 = vpop.eup %1927 }
 0x311   :  { %v1930_v22 = vpop.eup %1929  ;;  %v1047_v21 = vmul.f32 %v1928_v23, %v1043_v28  ;;  %1931 = vrcp.f32 %v1045_v27  ;;  %vm1052_vm4 = vweird.f32 %v1928_v23  ;;  %v1087_v16 = vand.u32 2147483648, %v1045_v27 }
 0x312   :  { %v1062_v24 = vmul.f32 %v1930_v22, %v1044_v8  ;;  %1933 = vtanh.f32 %v1033_v11  ;;  %vm1067_vm5 = vweird.f32 %v1930_v22  ;;  %vm1053_vm8 = vmor %vm1051_vm6, %vm1052_vm4  ;;  %vm1081_vm13 = vweird.f32 %v1045_v27 }
 0x313   :  { %v1048_v5 = vsub.f32 1.0, %v1047_v21  ;;  %vm1068_vm9 = vmor %vm1066_vm7, %vm1067_vm5  ;;  %v1073_v21 = vor.u32 1.1754944e-38, %v1072_v7  ;;  %v1088_v14 = vor.u32 1.1754944e-38, %v1087_v16  ;;  %v3585_v16 = vld [vmem:[#allocation43_spill] sm:$0xff] }
 0x314   :  { %v1063_v19 = vsub.f32 1.0, %v1062_v24 }
 0x315   :  { %v1049_v17 = vmul.f32 %v1928_v23, %v1048_v5 }
 0x316   :  { %v1064_v3 = vmul.f32 %v1930_v22, %v1063_v19 }
 0x317   :  { %v1932_v18 = vpop.eup %1931  ;;  %v1050_v25 = vadd.f32 %v1928_v23, %v1049_v17 }
 0x318   :  { %v1077_v20 = vmul.f32 %v1932_v18, %v1045_v27  ;;  %v1065_v6 = vadd.f32 %v1930_v22, %v1064_v3  ;;  %v1934_v11 = vpop.eup %1933  ;;  %vm1082_vm12 = vweird.f32 %v1932_v18  ;;  %v3574_v3 = vld [vmem:[#allocation32_spill] sm:$0xff] }
 0x319   :  { %v1054_v24 = vsel %vm1053_vm8, %v1928_v23, %v1050_v25  ;;  %v1085_v23 = vand.u32 2147483647, %v1045_v27  ;;  %vm1083_vm14 = vmor %vm1081_vm13, %vm1082_vm12  ;;  %v3572_v27 = vld [vmem:[#allocation30_spill] sm:$0xff]  ;;  %v3575_v25 = vld [vmem:[#allocation33_spill] sm:$0xff] }
 0x31a   :  { %v1078_v4 = vsub.f32 1.0, %v1077_v20  ;;  %v1059_v5 = vsel %vm1056_vm10, %v1058_v10, %v1054_v24  ;;  %v1069_v2 = vsel %vm1068_vm9, %v1930_v22, %v1065_v6  ;;  %v3573_v22 = vld [vmem:[#allocation31_spill] sm:$0xff]  ;;  %v3576_v20 = vld [vmem:[#allocation34_spill] sm:$0xff]  ;;  %v3579_v24 = vld [vmem:[#allocation37_spill] sm:$0xff] }
 0x31b   :  { %v1074_v19 = vsel %vm1071_vm11, %v1073_v21, %v1069_v2  ;;  %v1093_v1 = vmul.f32 %v1934_v11, %v1059_v5  ;;  %vm1086_vm15 = vcmp.eq.f32.partialorder %v1085_v23, 8.507059e+37  ;;  %v3577_v10 = vld [vmem:[#allocation35_spill] sm:$0xff]  ;;  %v3578_v21 = vld [vmem:[#allocation36_spill] sm:$0xff]  ;;  %v3580_v11 = vld [vmem:[#allocation38_spill] sm:$0xff] }
 0x31c   :  { %v1092_v12 = vmul.f32 %v1074_v19, %v3073_v9  ;;  %v1079_v17 = vmul.f32 %v1932_v18, %v1078_v4  ;;  %v3567_v9 = vld [vmem:[#allocation25_spill] sm:$0xff]  ;;  %v3570_v4 = vld [vmem:[#allocation28_spill] sm:$0xff]  ;;  %v3581_v5 = vld [vmem:[#allocation39_spill] sm:$0xff] }
 0x31d   :  { %v3582_v19 = vld [vmem:[#allocation40_spill] sm:$0xff] }
 0x31e   :  { %v3157_v28 = vadd.f32 %v1093_v1, %v1092_v12  ;;  %v1080_v8 = vadd.f32 %v1932_v18, %v1079_v17  ;;  %v3568_v12 = vld [vmem:[#allocation26_spill] sm:$0xff]  ;;  %v3569_v1 = vld [vmem:[#allocation27_spill] sm:$0xff]  ;;  %v3583_v17 = vld [vmem:[#allocation41_spill] sm:$0xff] }
 0x31f   :  { %v3586_v23 = vld [vmem:[#allocation44_spill] sm:$0xff] }
 0x320   :  { %1935 = vtanh.f32 %v3157_v28  ;;  %v1084_v7 = vsel %vm1083_vm14, %v1932_v18, %v1080_v8  ;;  %v3571_v18 = vld [vmem:[#allocation29_spill] sm:$0xff]  ;;  %v3584_v8 = vld [vmem:[#allocation42_spill] sm:$0xff] }
 0x321   :  { %v1089_v15 = vsel %vm1086_vm15, %v1088_v14, %v1084_v7  ;;  %v3587_v7 = vld [vmem:[#allocation45_spill] sm:$0xff]  ;;  %v3588_v14 = vld [vmem:[#allocation46_spill] sm:$0xff] }
 0x326   :  { %v1936_v6 = vpop.eup %1935 }
 0x327   :  { %v1096_v2 = vmul.f32 %v1936_v6, %v1089_v15  ;;  %v3589_v6 = vld [vmem:[#allocation47_spill] sm:$0xff]  ;;  %v3590_v15 = vld [vmem:[#allocation48_spill] sm:$0xff] }
 0x329   :  { %1120 = vmatmul.f32.vlgmr.msrb.gmra.mxu0 %v1096_v2  ;;  %1140 = vmatmul.f32.vlgmr.msrb.gmra.mxu1 %v1096_v2 }
 0x32a   :  { %1160 = vmatmul.f32.vlgmr.msrb.gmra.mxu2 %v1096_v2  ;;  %1180 = vmatmul.f32.vlgmr.msrb.gmra.mxu3 %v1096_v2  ;;  %v3591_v2 = vld [vmem:[#allocation49_spill] sm:$0xff] }
 0x32b   :  { %1412 = vmatpush.msrb.mxu0 %v2888_v26  ;;  %1432 = vmatpush.msrb.mxu1 %v2891_v29 }
 0x32c   :  { %1452 = vmatpush.msrb.mxu2 %v2894_v30  ;;  %1472 = vmatpush.msrb.mxu3 %v2897_v31 }
 0x32d   :  { %1413 = vmatpush.msrb.mxu0 %v2900_v32  ;;  %1433 = vmatpush.msrb.mxu1 %v2903_v33 }
 0x32e   :  { %1453 = vmatpush.msrb.mxu2 %v2906_v34  ;;  %1473 = vmatpush.msrb.mxu3 %v2909_v35 }
 0x32f   :  { %1414 = vmatpush.msrb.mxu0 %v2912_v36  ;;  %1434 = vmatpush.msrb.mxu1 %v2915_v37 }
 0x330   :  { %1454 = vmatpush.msrb.mxu2 %v2918_v38  ;;  %1474 = vmatpush.msrb.mxu3 %v2921_v40 }
 0x331   :  { %1415 = vmatpush.msrb.mxu0 %v2924_v41  ;;  %1435 = vmatpush.msrb.mxu1 %v2927_v42 }
 0x332   :  { %1455 = vmatpush.msrb.mxu2 %v2930_v43  ;;  %1475 = vmatpush.msrb.mxu3 %v2933_v63 }
 0x333   :  { %1416 = vmatpush.msrb.mxu0 %v2936_v53  ;;  %1436 = vmatpush.msrb.mxu1 %v2939_v57 }
 0x334   :  { %1456 = vmatpush.msrb.mxu2 %v2942_v45  ;;  %1476 = vmatpush.msrb.mxu3 %v2945_v62 }
 0x335   :  { %1417 = vmatpush.msrb.mxu0 %v2948_v52  ;;  %1437 = vmatpush.msrb.mxu1 %v2951_v48 }
 0x336   :  { %1457 = vmatpush.msrb.mxu2 %v2954_v55  ;;  %1477 = vmatpush.msrb.mxu3 %v2957_v50 }
 0x337   :  { %1418 = vmatpush.msrb.mxu0 %v2960_v44  ;;  %1438 = vmatpush.msrb.mxu1 %v2963_v39 }
 0x338   :  { %1458 = vmatpush.msrb.mxu2 %v2966_v51  ;;  %1478 = vmatpush.msrb.mxu3 %v2969_v58 }
 0x339   :  { %1419 = vmatpush.msrb.mxu0 %v2972_v0  ;;  %1439 = vmatpush.msrb.mxu1 %v2975_v59 }
 0x33a   :  { %1459 = vmatpush.msrb.mxu2 %v2978_v47  ;;  %1479 = vmatpush.msrb.mxu3 %v2981_v46 }
 0x33b   :  { %1420 = vmatpush.msrb.mxu0 %v2984_v56  ;;  %1440 = vmatpush.msrb.mxu1 %v2987_v54 }
 0x33c   :  { %1460 = vmatpush.msrb.mxu2 %v2990_v60  ;;  %1480 = vmatpush.msrb.mxu3 %v2993_v13 }
 0x33d   :  { %1421 = vmatpush.msrb.mxu0 %v2996_v61  ;;  %1441 = vmatpush.msrb.mxu1 %v2999_v49 }
 0x33e   :  { %1461 = vmatpush.msrb.mxu2 %v3567_v9  ;;  %1481 = vmatpush.msrb.mxu3 %v3568_v12 }
 0x33f   :  { %1422 = vmatpush.msrb.mxu0 %v3569_v1  ;;  %1442 = vmatpush.msrb.mxu1 %v3570_v4 }
 0x340   :  { %1462 = vmatpush.msrb.mxu2 %v3571_v18  ;;  %1482 = vmatpush.msrb.mxu3 %v3572_v27 }
 0x341   :  { %1423 = vmatpush.msrb.mxu0 %v3573_v22  ;;  %1443 = vmatpush.msrb.mxu1 %v3574_v3 }
 0x342   :  { %1463 = vmatpush.msrb.mxu2 %v3575_v25  ;;  %1483 = vmatpush.msrb.mxu3 %v3576_v20 }
 0x343   :  { %1424 = vmatpush.msrb.mxu0 %v3577_v10  ;;  %1444 = vmatpush.msrb.mxu1 %v3578_v21 }
 0x344   :  { %1464 = vmatpush.msrb.mxu2 %v3579_v24  ;;  %1484 = vmatpush.msrb.mxu3 %v3580_v11  ;;  %v3593_v11 = vld [vmem:[#allocation63_spill] sm:$0xff]  ;;  %v3594_v24 = vld [vmem:[#allocation64_spill] sm:$0xff] }
 0x345   :  { %1425 = vmatpush.msrb.mxu0 %v3581_v5  ;;  %1445 = vmatpush.msrb.mxu1 %v3582_v19  ;;  %v3592_v5 = vld [vmem:[#allocation50_spill] sm:$0xff] }
 0x346   :  { %1465 = vmatpush.msrb.mxu2 %v3583_v17  ;;  %1485 = vmatpush.msrb.mxu3 %v3584_v8 }
 0x347   :  { %1426 = vmatpush.msrb.mxu0 %v3585_v16  ;;  %1446 = vmatpush.msrb.mxu1 %v3586_v23 }
 0x348   :  { %1466 = vmatpush.msrb.mxu2 %v3587_v7  ;;  %1486 = vmatpush.msrb.mxu3 %v3588_v14  ;;  %v3595_v14 = vld [vmem:[#allocation65_spill] sm:$0xff] }
 0x349   :  { %1427 = vmatpush.msrb.mxu0 %v3589_v6  ;;  %1447 = vmatpush.msrb.mxu1 %v3590_v15 }
 0x34a   :  { %1467 = vmatpush.msrb.mxu2 %v3591_v2  ;;  %1487 = vmatpush.msrb.mxu3 %v3592_v5 }
 0x3a6   :  { %v1121_v19 = vpop.f32.mrf.mxu0  ;;  %v1141_v17 = vpop.f32.mrf.mxu1 }
 0x3a7   :  { %v1184_v8 = vadd.f32 %v1121_v19, %v3593_v11  ;;  %v1185_v16 = vadd.f32 %v1141_v17, %v3594_v24  ;;  %v3596_v24 = vld [vmem:[#allocation66_spill] sm:$0xff] }
 0x3a9   :  { %v1845_v21 = vmul.f32 -1.442695, %v1184_v8  ;;  %v1846_v23 = vmul.f32 -1.442695, %v1185_v16 }
 0x3ab   :  { %1937 = vpow2.f32 %v1845_v21 }
 0x3ac   :  { %1939 = vpow2.f32 %v1846_v23 }
 0x3ad   :  { %v1161_v7 = vpop.f32.mrf.mxu2  ;;  %v1181_v5 = vpop.f32.mrf.mxu3 }
 0x3ae   :  { %v1186_v10 = vadd.f32 %v1161_v7, %v3595_v14  ;;  %v1187_v17 = vadd.f32 %v1181_v5, %v3596_v24 }
 0x3b0   :  { %v1847_v6 = vmul.f32 -1.442695, %v1186_v10 }
 0x3b1   :  { %v1938_v20 = vpop.eup %1937 }
 0x3b2   :  { %v1940_v15 = vpop.eup %1939  ;;  %v1197_v25 = vadd.f32 1.0, %v1938_v20  ;;  %1941 = vpow2.f32 %v1847_v6 }
 0x3b3   :  { %v1198_v2 = vadd.f32 1.0, %v1940_v15 }
 0x3b4   :  { %1943 = vrcp.f32 %v1197_v25  ;;  %v1211_v10 = vand.u32 2147483648, %v1197_v25  ;;  %v1209_v6 = vand.u32 2147483647, %v1197_v25  ;;  %vm1205_vm2 = vweird.f32 %v1197_v25 }
 0x3b5   :  { %1945 = vrcp.f32 %v1198_v2  ;;  %v1226_v14 = vand.u32 2147483648, %v1198_v2  ;;  %v1224_v22 = vand.u32 2147483647, %v1198_v2  ;;  %vm1220_vm3 = vweird.f32 %v1198_v2 }
 0x3b6   :  { %v1212_v24 = vor.u32 1.1754944e-38, %v1211_v10  ;;  %vm1210_vm6 = vcmp.eq.f32.partialorder %v1209_v6, 8.507059e+37 }
 0x3b7   :  { %vm1225_vm7 = vcmp.eq.f32.partialorder %v1224_v22, 8.507059e+37 }
 0x3b8   :  { %v1942_v3 = vpop.eup %1941 }
 0x3b9   :  { %v1199_v11 = vadd.f32 1.0, %v1942_v3 }
 0x3ba   :  { %v1944_v19 = vpop.eup %1943 }
 0x3bb   :  { %v1946_v8 = vpop.eup %1945  ;;  %v1201_v21 = vmul.f32 %v1944_v19, %v1197_v25  ;;  %1947 = vrcp.f32 %v1199_v11  ;;  %vm1206_vm0 = vweird.f32 %v1944_v19  ;;  %v1241_v10 = vand.u32 2147483648, %v1199_v11 }
 0x3bc   :  { %v1216_v16 = vmul.f32 %v1946_v8, %v1198_v2  ;;  %1949 = vtanh.f32 %v1187_v17  ;;  %vm1221_vm1 = vweird.f32 %v1946_v8  ;;  %vm1207_vm4 = vmor %vm1205_vm2, %vm1206_vm0  ;;  %vm1235_vm9 = vweird.f32 %v1199_v11 }
 0x3bd   :  { %v1202_v23 = vsub.f32 1.0, %v1201_v21  ;;  %vm1222_vm5 = vmor %vm1220_vm3, %vm1221_vm1  ;;  %v1227_v21 = vor.u32 1.1754944e-38, %v1226_v14  ;;  %v1242_v6 = vor.u32 1.1754944e-38, %v1241_v10 }
 0x3be   :  { %v1217_v7 = vsub.f32 1.0, %v1216_v16 }
 0x3bf   :  { %v1203_v20 = vmul.f32 %v1944_v19, %v1202_v23 }
 0x3c0   :  { %v1218_v15 = vmul.f32 %v1946_v8, %v1217_v7 }
 0x3c1   :  { %v1948_v27 = vpop.eup %1947  ;;  %v1204_v3 = vadd.f32 %v1944_v19, %v1203_v20 }
 0x3c2   :  { %v1231_v5 = vmul.f32 %v1948_v27, %v1199_v11  ;;  %v1219_v18 = vadd.f32 %v1946_v8, %v1218_v15  ;;  %v1950_v17 = vpop.eup %1949  ;;  %vm1236_vm8 = vweird.f32 %v1948_v27 }
 0x3c3   :  { %v1208_v16 = vsel %vm1207_vm4, %v1944_v19, %v1204_v3  ;;  %v1239_v19 = vand.u32 2147483647, %v1199_v11  ;;  %vm1237_vm10 = vmor %vm1235_vm9, %vm1236_vm8  ;;  %v3626_v3 = vld [vmem:[#allocation70_spill] sm:$0xff] }
 0x3c4   :  { %v1232_v4 = vsub.f32 1.0, %v1231_v5  ;;  %v1213_v23 = vsel %vm1210_vm6, %v1212_v24, %v1208_v16  ;;  %v1223_v1 = vsel %vm1222_vm5, %v1946_v8, %v1219_v18 }
 0x3c5   :  { %v1228_v7 = vsel %vm1225_vm7, %v1227_v21, %v1223_v1  ;;  %v1247_v12 = vmul.f32 %v1950_v17, %v1213_v23  ;;  %vm1240_vm11 = vcmp.eq.f32.partialorder %v1239_v19, 8.507059e+37 }
 0x3c6   :  { %v1246_v9 = vmul.f32 %v1228_v7, %v3157_v28  ;;  %v1233_v20 = vmul.f32 %v1948_v27, %v1232_v4 }
 0x3c8   :  { %v3229_v25 = vadd.f32 %v1247_v12, %v1246_v9  ;;  %v1234_v2 = vadd.f32 %v1948_v27, %v1233_v20 }
 0x3ca   :  { %1951 = vtanh.f32 %v3229_v25  ;;  %v1238_v14 = vsel %vm1237_vm10, %v1948_v27, %v1234_v2 }
 0x3cb   :  { %v1243_v22 = vsel %vm1240_vm11, %v1242_v6, %v1238_v14 }
 0x3d0   :  { %v1952_v18 = vpop.eup %1951 }
 0x3d1   :  { %v1250_v1 = vmul.f32 %v1952_v18, %v1243_v22 }
 0x3d3   :  { %1274 = vmatmul.f32.vlgmr.msra.gmra.mxu0 %v1250_v1  ;;  %1294 = vmatmul.f32.vlgmr.msra.gmra.mxu1 %v1250_v1 }
 0x3d4   :  { %1314 = vmatmul.f32.vlgmr.msra.gmra.mxu2 %v1250_v1  ;;  %1334 = vmatmul.f32.vlgmr.msra.gmra.mxu3 %v1250_v1 }
 0x3d5   :  { %1566 = vmatpush.msra.mxu0 %v2888_v26  ;;  %1586 = vmatpush.msra.mxu1 %v2891_v29  ;;  %v3597_v26 = vld [vmem:[#allocation25_spill] sm:$0xff]  ;;  %v3598_v29 = vld [vmem:[#allocation26_spill] sm:$0xff] }
 0x3d6   :  { %1606 = vmatpush.msra.mxu2 %v2894_v30  ;;  %1626 = vmatpush.msra.mxu3 %v2897_v31  ;;  %v3599_v30 = vld [vmem:[#allocation27_spill] sm:$0xff]  ;;  %v3600_v31 = vld [vmem:[#allocation28_spill] sm:$0xff] }
 0x3d7   :  { %1567 = vmatpush.msra.mxu0 %v2900_v32  ;;  %1587 = vmatpush.msra.mxu1 %v2903_v33  ;;  %v3601_v32 = vld [vmem:[#allocation29_spill] sm:$0xff]  ;;  %v3602_v33 = vld [vmem:[#allocation30_spill] sm:$0xff] }
 0x3d8   :  { %1607 = vmatpush.msra.mxu2 %v2906_v34  ;;  %1627 = vmatpush.msra.mxu3 %v2909_v35  ;;  %v3603_v34 = vld [vmem:[#allocation31_spill] sm:$0xff]  ;;  %v3604_v35 = vld [vmem:[#allocation32_spill] sm:$0xff] }
 0x3d9   :  { %1568 = vmatpush.msra.mxu0 %v2912_v36  ;;  %1588 = vmatpush.msra.mxu1 %v2915_v37  ;;  %v3605_v36 = vld [vmem:[#allocation33_spill] sm:$0xff]  ;;  %v3606_v37 = vld [vmem:[#allocation34_spill] sm:$0xff] }
 0x3da   :  { %1608 = vmatpush.msra.mxu2 %v2918_v38  ;;  %1628 = vmatpush.msra.mxu3 %v2921_v40  ;;  %v3607_v38 = vld [vmem:[#allocation35_spill] sm:$0xff]  ;;  %v3608_v40 = vld [vmem:[#allocation36_spill] sm:$0xff] }
 0x3db   :  { %1569 = vmatpush.msra.mxu0 %v2924_v41  ;;  %1589 = vmatpush.msra.mxu1 %v2927_v42  ;;  %v3609_v41 = vld [vmem:[#allocation37_spill] sm:$0xff]  ;;  %v3610_v42 = vld [vmem:[#allocation38_spill] sm:$0xff] }
 0x3dc   :  { %1609 = vmatpush.msra.mxu2 %v2930_v43  ;;  %1629 = vmatpush.msra.mxu3 %v2933_v63  ;;  %v3611_v43 = vld [vmem:[#allocation39_spill] sm:$0xff]  ;;  %v3612_v63 = vld [vmem:[#allocation40_spill] sm:$0xff] }
 0x3dd   :  { %1570 = vmatpush.msra.mxu0 %v2936_v53  ;;  %1590 = vmatpush.msra.mxu1 %v2939_v57  ;;  %v3613_v53 = vld [vmem:[#allocation41_spill] sm:$0xff]  ;;  %v3614_v57 = vld [vmem:[#allocation42_spill] sm:$0xff] }
 0x3de   :  { %1610 = vmatpush.msra.mxu2 %v2942_v45  ;;  %1630 = vmatpush.msra.mxu3 %v2945_v62  ;;  %v3615_v45 = vld [vmem:[#allocation43_spill] sm:$0xff]  ;;  %v3616_v62 = vld [vmem:[#allocation44_spill] sm:$0xff] }
 0x3df   :  { %1571 = vmatpush.msra.mxu0 %v2948_v52  ;;  %1591 = vmatpush.msra.mxu1 %v2951_v48  ;;  %v3617_v52 = vld [vmem:[#allocation45_spill] sm:$0xff]  ;;  %v3618_v48 = vld [vmem:[#allocation46_spill] sm:$0xff] }
 0x3e0   :  { %1611 = vmatpush.msra.mxu2 %v2954_v55  ;;  %1631 = vmatpush.msra.mxu3 %v2957_v50  ;;  %v3619_v55 = vld [vmem:[#allocation47_spill] sm:$0xff]  ;;  %v3620_v50 = vld [vmem:[#allocation48_spill] sm:$0xff] }
 0x3e1   :  { %1572 = vmatpush.msra.mxu0 %v2960_v44  ;;  %1592 = vmatpush.msra.mxu1 %v2963_v39  ;;  %v3621_v44 = vld [vmem:[#allocation49_spill] sm:$0xff]  ;;  %v3622_v39 = vld [vmem:[#allocation50_spill] sm:$0xff] }
 0x3e2   :  { %1612 = vmatpush.msra.mxu2 %v2966_v51  ;;  %1632 = vmatpush.msra.mxu3 %v2969_v58 }
 0x3e3   :  { %1573 = vmatpush.msra.mxu0 %v2972_v0  ;;  %1593 = vmatpush.msra.mxu1 %v2975_v59  ;;  %v3623_v0 = vld [vmem:[#allocation67_spill] sm:$0xff] }
 0x3e4   :  { %1613 = vmatpush.msra.mxu2 %v2978_v47  ;;  %1633 = vmatpush.msra.mxu3 %v2981_v46  ;;  %v3624_v47 = vld [vmem:[#allocation68_spill] sm:$0xff] }
 0x3e5   :  { %1574 = vmatpush.msra.mxu0 %v2984_v56  ;;  %1594 = vmatpush.msra.mxu1 %v2987_v54 }
 0x3e6   :  { %1614 = vmatpush.msra.mxu2 %v2990_v60  ;;  %1634 = vmatpush.msra.mxu3 %v2993_v13  ;;  %v3625_v13 = vld [vmem:[#allocation69_spill] sm:$0xff] }
 0x3e7   :  { %1575 = vmatpush.msra.mxu0 %v2996_v61  ;;  %1595 = vmatpush.msra.mxu1 %v2999_v49 }
 0x3e8   :  { %1615 = vmatpush.msra.mxu2 %v3597_v26  ;;  %1635 = vmatpush.msra.mxu3 %v3598_v29 }
 0x3e9   :  { %1576 = vmatpush.msra.mxu0 %v3599_v30  ;;  %1596 = vmatpush.msra.mxu1 %v3600_v31 }
 0x3ea   :  { %1616 = vmatpush.msra.mxu2 %v3601_v32  ;;  %1636 = vmatpush.msra.mxu3 %v3602_v33 }
 0x3eb   :  { %1577 = vmatpush.msra.mxu0 %v3603_v34  ;;  %1597 = vmatpush.msra.mxu1 %v3604_v35 }
 0x3ec   :  { %1617 = vmatpush.msra.mxu2 %v3605_v36  ;;  %1637 = vmatpush.msra.mxu3 %v3606_v37 }
 0x3ed   :  { %1578 = vmatpush.msra.mxu0 %v3607_v38  ;;  %1598 = vmatpush.msra.mxu1 %v3608_v40 }
 0x3ee   :  { %1618 = vmatpush.msra.mxu2 %v3609_v41  ;;  %1638 = vmatpush.msra.mxu3 %v3610_v42 }
 0x3ef   :  { %1579 = vmatpush.msra.mxu0 %v3611_v43  ;;  %1599 = vmatpush.msra.mxu1 %v3612_v63 }
 0x3f0   :  { %1619 = vmatpush.msra.mxu2 %v3613_v53  ;;  %1639 = vmatpush.msra.mxu3 %v3614_v57 }
 0x3f1   :  { %1580 = vmatpush.msra.mxu0 %v3615_v45  ;;  %1600 = vmatpush.msra.mxu1 %v3616_v62 }
 0x3f2   :  { %1620 = vmatpush.msra.mxu2 %v3617_v52  ;;  %1640 = vmatpush.msra.mxu3 %v3618_v48  ;;  %v3627_v48 = vld [vmem:[#allocation71_spill] sm:$0xff] }
 0x3f3   :  { %1581 = vmatpush.msra.mxu0 %v3619_v55  ;;  %1601 = vmatpush.msra.mxu1 %v3620_v50  ;;  %v3628_v50 = vld [vmem:[#allocation72_spill] sm:$0xff] }
 0x3f4   :  { %1621 = vmatpush.msra.mxu2 %v3621_v44  ;;  %1641 = vmatpush.msra.mxu3 %v3622_v39 }
 0x450   :  { %v1275_v51 = vpop.f32.mrf.mxu0  ;;  %v1295_v58 = vpop.f32.mrf.mxu1 }
 0x451   :  { %v1338_v59 = vadd.f32 %v1275_v51, %v3623_v0  ;;  %v1339_v46 = vadd.f32 %v1295_v58, %v3624_v47  ;;  %v3629_v0 = vld [vmem:[#allocation73_spill] sm:$0xff] }
 0x453   :  { %v1848_v56 = vmul.f32 -1.442695, %v1338_v59  ;;  %v1849_v54 = vmul.f32 -1.442695, %v1339_v46 }
 0x455   :  { %1953 = vpow2.f32 %v1848_v56 }
 0x456   :  { %1955 = vpow2.f32 %v1849_v54 }
 0x457   :  { %v1315_v60 = vpop.f32.mrf.mxu2  ;;  %v1335_v27 = vpop.f32.mrf.mxu3 }
 0x458   :  { %v1340_v61 = vadd.f32 %v1315_v60, %v3625_v13  ;;  %v1341_v5 = vadd.f32 %v1335_v27, %v3626_v3 }
 0x45a   :  { %v1850_v49 = vmul.f32 -1.442695, %v1340_v61 }
 0x45b   :  { %v1954_v28 = vpop.eup %1953 }
 0x45c   :  { %v1956_v9 = vpop.eup %1955  ;;  %v1351_v12 = vadd.f32 1.0, %v1954_v28  ;;  %1957 = vpow2.f32 %v1850_v49 }
 0x45d   :  { %v1352_v4 = vadd.f32 1.0, %v1956_v9  ;;  %v3630_v9 = vld [vmem:[#allocation74_spill] sm:$0xff] }
 0x45e   :  { %1959 = vrcp.f32 %v1351_v12  ;;  %v1365_v7 = vand.u32 2147483648, %v1351_v12  ;;  %v1363_v10 = vand.u32 2147483647, %v1351_v12  ;;  %vm1359_vm14 = vweird.f32 %v1351_v12 }
 0x45f   :  { %1961 = vrcp.f32 %v1352_v4  ;;  %v1380_v20 = vand.u32 2147483648, %v1352_v4  ;;  %v1378_v14 = vand.u32 2147483647, %v1352_v4  ;;  %vm1374_vm15 = vweird.f32 %v1352_v4 }
 0x460   :  { %v1366_v1 = vor.u32 1.1754944e-38, %v1365_v7  ;;  %vm1364_vm2 = vcmp.eq.f32.partialorder %v1363_v10, 8.507059e+37 }
 0x461   :  { %v1381_v29 = vor.u32 1.1754944e-38, %v1380_v20  ;;  %vm1379_vm3 = vcmp.eq.f32.partialorder %v1378_v14, 8.507059e+37 }
 0x462   :  { %v1958_v11 = vpop.eup %1957 }
 0x463   :  { %v1353_v8 = vadd.f32 1.0, %v1958_v11 }
 0x464   :  { %v1960_v15 = vpop.eup %1959 }
 0x465   :  { %v1962_v24 = vpop.eup %1961  ;;  %v1355_v21 = vmul.f32 %v1960_v15, %v1351_v12  ;;  %1963 = vrcp.f32 %v1353_v8  ;;  %vm1360_vm12 = vweird.f32 %v1960_v15  ;;  %v1395_v42 = vand.u32 2147483648, %v1353_v8 }
 0x466   :  { %v1370_v16 = vmul.f32 %v1962_v24, %v1352_v4  ;;  %1965 = vtanh.f32 %v1341_v5  ;;  %vm1375_vm13 = vweird.f32 %v1962_v24  ;;  %vm1361_vm0 = vmor %vm1359_vm14, %vm1360_vm12  ;;  %vm1389_vm5 = vweird.f32 %v1353_v8 }
 0x467   :  { %v1356_v17 = vsub.f32 1.0, %v1355_v21  ;;  %vm1376_vm1 = vmor %vm1374_vm15, %vm1375_vm13  ;;  %v1393_v43 = vand.u32 2147483647, %v1353_v8  ;;  %v1396_v53 = vor.u32 1.1754944e-38, %v1395_v42 }
 0x468   :  { %v1371_v23 = vsub.f32 1.0, %v1370_v16 }
 0x469   :  { %v1357_v2 = vmul.f32 %v1960_v15, %v1356_v17  ;;  %vm1394_vm7 = vcmp.eq.f32.partialorder %v1393_v43, 8.507059e+37  ;;  %v1729_v43 = vld [vmem:[#allocation14 + $0x70] sm:$0xff] }
 0x46a   :  { %v1372_v19 = vmul.f32 %v1962_v24, %v1371_v23 }
 0x46b   :  { %v1964_v6 = vpop.eup %1963  ;;  %v1358_v18 = vadd.f32 %v1960_v15, %v1357_v2 }
 0x46c   :  { %v1385_v22 = vmul.f32 %v1964_v6, %v1353_v8  ;;  %v1373_v26 = vadd.f32 %v1962_v24, %v1372_v19  ;;  %v1966_v31 = vpop.eup %1965  ;;  %vm1390_vm4 = vweird.f32 %v1964_v6 }
 0x46d   :  { %v1362_v30 = vsel %vm1361_vm0, %v1960_v15, %v1358_v18  ;;  %vm1391_vm6 = vmor %vm1389_vm5, %vm1390_vm4 }
 0x46e   :  { %v1386_v32 = vsub.f32 1.0, %v1385_v22  ;;  %v1367_v33 = vsel %vm1364_vm2, %v1366_v1, %v1362_v30  ;;  %v1377_v34 = vsel %vm1376_vm1, %v1962_v24, %v1373_v26 }
 0x46f   :  { %v1382_v35 = vsel %vm1379_vm3, %v1381_v29, %v1377_v34  ;;  %v1401_v36 = vmul.f32 %v1966_v31, %v1367_v33 }
 0x470   :  { %v1400_v37 = vmul.f32 %v1382_v35, %v3229_v25  ;;  %v1387_v38 = vmul.f32 %v1964_v6, %v1386_v32 }
 0x472   :  { %v3301_v40 = vadd.f32 %v1401_v36, %v1400_v37  ;;  %v1388_v41 = vadd.f32 %v1964_v6, %v1387_v38 }
 0x474   :  { %1967 = vtanh.f32 %v3301_v40  ;;  %v1392_v63 = vsel %vm1391_vm6, %v1964_v6, %v1388_v41 }
 0x475   :  { %v1397_v45 = vsel %vm1394_vm7, %v1396_v53, %v1392_v63  ;;  %v1728_v63 = vld [vmem:[#allocation14 + $0x68] sm:$0xff]  ;;  %v1727_v53 = vld [vmem:[#allocation14 + $0x60] sm:$0xff] }
 0x47a   :  { %v1968_v57 = vpop.eup %1967 }
 0x47b   :  { %v1404_v62 = vmul.f32 %v1968_v57, %v1397_v45  ;;  %v1726_v57 = vld [vmem:[#allocation14 + $0x58] sm:$0xff]  ;;  %v1725_v45 = vld [vmem:[#allocation14 + $0x50] sm:$0xff] }
 0x47d   :  { %1428 = vmatmul.f32.vlgmr.msrb.gmra.mxu0 %v1404_v62  ;;  %1448 = vmatmul.f32.vlgmr.msrb.gmra.mxu1 %v1404_v62 }
 0x47e   :  { %1468 = vmatmul.f32.vlgmr.msrb.gmra.mxu2 %v1404_v62  ;;  %1488 = vmatmul.f32.vlgmr.msrb.gmra.mxu3 %v1404_v62  ;;  %v1724_v62 = vld [vmem:[#allocation14 + $0x48] sm:$0xff] }
 0x4fa   :  { %v1429_v25 = vpop.f32.mrf.mxu0  ;;  %v1449_v52 = vpop.f32.mrf.mxu1 }
 0x4fb   :  { %v1492_v55 = vadd.f32 %v1429_v25, %v3627_v48  ;;  %v1493_v44 = vadd.f32 %v1449_v52, %v3628_v50  ;;  %v1723_v25 = vld [vmem:[#allocation14 + $0x40] sm:$0xff]  ;;  %v1722_v52 = vld [vmem:[#allocation14 + $0x38] sm:$0xff]  ;;  %v1721_v48 = vld [vmem:[#allocation14 + $0x30] sm:$0xff] }
 0x4fd   :  { %v1851_v39 = vmul.f32 -1.442695, %v1492_v55  ;;  %v1852_v51 = vmul.f32 -1.442695, %v1493_v44  ;;  %v3631_v44 = vld [vmem:[#allocation75_spill] sm:$0xff] }
 0x4ff   :  { %1969 = vpow2.f32 %v1851_v39 }
 0x500   :  { %1971 = vpow2.f32 %v1852_v51  ;;  %v3632_v51 = vld [vmem:[#allocation76_spill] sm:$0xff] }
 0x501   :  { %v1469_v58 = vpop.f32.mrf.mxu2  ;;  %v1489_v13 = vpop.f32.mrf.mxu3 }
 0x502   :  { %v1494_v59 = vadd.f32 %v1469_v58, %v3629_v0  ;;  %v1495_v12 = vadd.f32 %v1489_v13, %v3630_v9  ;;  %v1720_v0 = vld [vmem:[#allocation14 + $0x28] sm:$0xff] }
 0x503   :  { %v1716_v13 = vld [vmem:[#allocation14 + $0x8] sm:$0xff] }
 0x504   :  { %v1853_v47 = vmul.f32 -1.442695, %v1494_v59 }
 0x505   :  { %v1970_v46 = vpop.eup %1969 }
 0x506   :  { %v1972_v56 = vpop.eup %1971  ;;  %v1505_v54 = vadd.f32 1.0, %v1970_v46  ;;  %1973 = vpow2.f32 %v1853_v47  ;;  %v1719_v46 = vld [vmem:[#allocation14 + $0x20] sm:$0xff] }
 0x507   :  { %v1506_v60 = vadd.f32 1.0, %v1972_v56  ;;  %v1718_v56 = vld [vmem:[#allocation14 + $0x18] sm:$0xff] }
 0x508   :  { %1975 = vrcp.f32 %v1505_v54  ;;  %v1519_v3 = vand.u32 2147483648, %v1505_v54  ;;  %v1517_v21 = vand.u32 2147483647, %v1505_v54  ;;  %vm1513_vm10 = vweird.f32 %v1505_v54 }
 0x509   :  { %1977 = vrcp.f32 %v1506_v60  ;;  %v1534_v5 = vand.u32 2147483648, %v1506_v60  ;;  %v1532_v17 = vand.u32 2147483647, %v1506_v60  ;;  %vm1528_vm11 = vweird.f32 %v1506_v60 }
 0x50a   :  { %v1520_v2 = vor.u32 1.1754944e-38, %v1519_v3  ;;  %vm1518_vm14 = vcmp.eq.f32.partialorder %v1517_v21, 8.507059e+37 }
 0x50b   :  { %v1535_v19 = vor.u32 1.1754944e-38, %v1534_v5  ;;  %vm1533_vm15 = vcmp.eq.f32.partialorder %v1532_v17, 8.507059e+37 }
 0x50c   :  { %v1974_v61 = vpop.eup %1973 }
 0x50d   :  { %v1507_v49 = vadd.f32 1.0, %v1974_v61  ;;  %v3633_v61 = vld [vmem:[#allocation77_spill] sm:$0xff] }
 0x50e   :  { %v1976_v28 = vpop.eup %1975 }
 0x50f   :  { %v1978_v4 = vpop.eup %1977  ;;  %v1509_v27 = vmul.f32 %v1976_v28, %v1505_v54  ;;  %1979 = vrcp.f32 %v1507_v49  ;;  %vm1514_vm8 = vweird.f32 %v1976_v28  ;;  %v1549_v34 = vand.u32 2147483648, %v1507_v49  ;;  %v1717_v54 = vld [vmem:[#allocation14 + $0x10] sm:$0xff] }
 0x510   :  { %v1524_v11 = vmul.f32 %v1978_v4, %v1506_v60  ;;  %1981 = vtanh.f32 %v1495_v12  ;;  %vm1529_vm9 = vweird.f32 %v1978_v4  ;;  %vm1515_vm12 = vmor %vm1513_vm10, %vm1514_vm8  ;;  %vm1543_vm1 = vweird.f32 %v1507_v49 }
 0x511   :  { %v1510_v8 = vsub.f32 1.0, %v1509_v27  ;;  %vm1530_vm13 = vmor %vm1528_vm11, %vm1529_vm9  ;;  %v1547_v35 = vand.u32 2147483647, %v1507_v49  ;;  %v1550_v37 = vor.u32 1.1754944e-38, %v1549_v34 }
 0x512   :  { %v1525_v15 = vsub.f32 1.0, %v1524_v11 }
 0x513   :  { %v1511_v24 = vmul.f32 %v1976_v28, %v1510_v8  ;;  %vm1548_vm3 = vcmp.eq.f32.partialorder %v1547_v35, 8.507059e+37 }
 0x514   :  { %v1526_v16 = vmul.f32 %v1978_v4, %v1525_v15 }
 0x515   :  { %v1980_v23 = vpop.eup %1979  ;;  %v1512_v7 = vadd.f32 %v1976_v28, %v1511_v24  ;;  %v3634_v24 = vld [vmem:[#allocation78_spill] sm:$0xff] }
 0x516   :  { %v1539_v20 = vmul.f32 %v1980_v23, %v1507_v49  ;;  %v1527_v10 = vadd.f32 %v1978_v4, %v1526_v16  ;;  %v1982_v6 = vpop.eup %1981  ;;  %vm1544_vm0 = vweird.f32 %v1980_v23 }
 0x517   :  { %v1516_v14 = vsel %vm1515_vm12, %v1976_v28, %v1512_v7  ;;  %vm1545_vm2 = vmor %vm1543_vm1, %vm1544_vm0  ;;  %v1715_v28 = vld [vmem:[#allocation14] sm:$0xff] }
 0x518   :  { %v1540_v18 = vsub.f32 1.0, %v1539_v20  ;;  %v1521_v22 = vsel %vm1518_vm14, %v1520_v2, %v1516_v14  ;;  %v1531_v1 = vsel %vm1530_vm13, %v1978_v4, %v1527_v10 }
 0x519   :  { %v1536_v26 = vsel %vm1533_vm15, %v1535_v19, %v1531_v1  ;;  %v1555_v29 = vmul.f32 %v1982_v6, %v1521_v22 }
 0x51a   :  { %v1554_v30 = vmul.f32 %v1536_v26, %v3301_v40  ;;  %v1541_v31 = vmul.f32 %v1980_v23, %v1540_v18  ;;  %v1730_v40 = vld [vmem:[#allocation14 + $0x78] sm:$0xff] }
 0x51b   :  { %1735 = vmatpush.msrb.mxu0 %v1730_v40 }
 0x51c   :  { %v3309_v32 = vadd.f32 %v1555_v29, %v1554_v30  ;;  %v1542_v33 = vadd.f32 %v1980_v23, %v1541_v31 }
 0x51d   :  { %1736 = vmatpush.msrb.mxu0 %v1729_v43 }
 0x51e   :  { %1983 = vtanh.f32 %v3309_v32  ;;  %v1546_v36 = vsel %vm1545_vm2, %v1980_v23, %v1542_v33 }
 0x51f   :  { %v1551_v41 = vsel %vm1548_vm3, %v1550_v37, %v1546_v36  ;;  %1737 = vmatpush.msrb.mxu0 %v1728_v63 }
 0x521   :  { %1738 = vmatpush.msrb.mxu0 %v1727_v53 }
 0x523   :  { %1739 = vmatpush.msrb.mxu0 %v1726_v57 }
 0x524   :  { %v1984_v38 = vpop.eup %1983 }
 0x525   :  { %v1558_v42 = vmul.f32 %v1984_v38, %v1551_v41  ;;  %1740 = vmatpush.msrb.mxu0 %v1725_v45 }
 0x527   :  { %1582 = vmatmul.f32.vlgmr.msra.gmra.mxu0 %v1558_v42  ;;  %1602 = vmatmul.f32.vlgmr.msra.gmra.mxu1 %v1558_v42 }
 0x528   :  { %1622 = vmatmul.f32.vlgmr.msra.gmra.mxu2 %v1558_v42  ;;  %1642 = vmatmul.f32.vlgmr.msra.gmra.mxu3 %v1558_v42 }
 0x529   :  { %1741 = vmatpush.msrb.mxu0 %v1724_v62 }
 0x52b   :  { %1742 = vmatpush.msrb.mxu0 %v1723_v25 }
 0x52d   :  { %1743 = vmatpush.msrb.mxu0 %v1722_v52 }
 0x52f   :  { %1744 = vmatpush.msrb.mxu0 %v1721_v48 }
 0x531   :  { %1745 = vmatpush.msrb.mxu0 %v1720_v0 }
 0x533   :  { %1746 = vmatpush.msrb.mxu0 %v1719_v46 }
 0x535   :  { %1747 = vmatpush.msrb.mxu0 %v1718_v56 }
 0x537   :  { %1748 = vmatpush.msrb.mxu0 %v1717_v54 }
 0x539   :  { %1749 = vmatpush.msrb.mxu0 %v1716_v13 }
 0x53b   :  { %1750 = vmatpush.msrb.mxu0 %v1715_v28 }
 0x5a4   :  { %v1583_v55 = vpop.f32.mrf.mxu0  ;;  %v1603_v50 = vpop.f32.mrf.mxu1 }
 0x5a5   :  { %v1646_v39 = vadd.f32 %v1583_v55, %v3631_v44  ;;  %v1647_v58 = vadd.f32 %v1603_v50, %v3632_v51 }
 0x5a7   :  { %v1854_v59 = vmul.f32 -1.442695, %v1646_v39  ;;  %v1855_v47 = vmul.f32 -1.442695, %v1647_v58 }
 0x5a9   :  { %1985 = vpow2.f32 %v1854_v59 }
 0x5aa   :  { %1987 = vpow2.f32 %v1855_v47 }
 0x5ab   :  { %v1623_v60 = vpop.f32.mrf.mxu2  ;;  %v1643_v8 = vpop.f32.mrf.mxu3 }
 0x5ac   :  { %v1648_v49 = vadd.f32 %v1623_v60, %v3633_v61  ;;  %v1649_v21 = vadd.f32 %v1643_v8, %v3634_v24 }
 0x5ae   :  { %v1856_v9 = vmul.f32 -1.442695, %v1648_v49 }
 0x5af   :  { %v1986_v12 = vpop.eup %1985 }
 0x5b0   :  { %v1988_v4 = vpop.eup %1987  ;;  %v1659_v27 = vadd.f32 1.0, %v1986_v12  ;;  %1989 = vpow2.f32 %v1856_v9 }
 0x5b1   :  { %v1660_v11 = vadd.f32 1.0, %v1988_v4 }
 0x5b2   :  { %1991 = vrcp.f32 %v1659_v27  ;;  %v1673_v2 = vand.u32 2147483648, %v1659_v27  ;;  %v1671_v14 = vand.u32 2147483647, %v1659_v27  ;;  %vm1667_vm6 = vweird.f32 %v1659_v27 }
 0x5b3   :  { %1993 = vrcp.f32 %v1660_v11  ;;  %v1688_v10 = vand.u32 2147483648, %v1660_v11  ;;  %v1686_v18 = vand.u32 2147483647, %v1660_v11  ;;  %vm1682_vm7 = vweird.f32 %v1660_v11 }
 0x5b4   :  { %v1674_v29 = vor.u32 1.1754944e-38, %v1673_v2  ;;  %vm1672_vm10 = vcmp.eq.f32.partialorder %v1671_v14, 8.507059e+37 }
 0x5b5   :  { %v1689_v31 = vor.u32 1.1754944e-38, %v1688_v10  ;;  %vm1687_vm11 = vcmp.eq.f32.partialorder %v1686_v18, 8.507059e+37 }
 0x5b6   :  { %v1990_v15 = vpop.eup %1989 }
 0x5b7   :  { %v1661_v3 = vadd.f32 1.0, %v1990_v15 }
 0x5b8   :  { %v1992_v5 = vpop.eup %1991 }
 0x5b9   :  { %v1994_v16 = vpop.eup %1993  ;;  %v1663_v17 = vmul.f32 %v1992_v5, %v1659_v27  ;;  %1995 = vrcp.f32 %v1661_v3  ;;  %vm1668_vm4 = vweird.f32 %v1992_v5  ;;  %v1703_v53 = vand.u32 2147483648, %v1661_v3 }
 0x5ba   :  { %v1678_v23 = vmul.f32 %v1994_v16, %v1660_v11  ;;  %1997 = vtanh.f32 %v1649_v21  ;;  %vm1683_vm5 = vweird.f32 %v1994_v16  ;;  %vm1669_vm8 = vmor %vm1667_vm6, %vm1668_vm4  ;;  %vm1697_vm13 = vweird.f32 %v1661_v3 }
 0x5bb   :  { %v1664_v7 = vsub.f32 1.0, %v1663_v17  ;;  %vm1684_vm9 = vmor %vm1682_vm7, %vm1683_vm5  ;;  %v1701_v57 = vand.u32 2147483647, %v1661_v3  ;;  %v1704_v62 = vor.u32 1.1754944e-38, %v1703_v53 }
 0x5bc   :  { %v1679_v20 = vsub.f32 1.0, %v1678_v23 }
 0x5bd   :  { %v1665_v19 = vmul.f32 %v1992_v5, %v1664_v7  ;;  %vm1702_vm15 = vcmp.eq.f32.partialorder %v1701_v57, 8.507059e+37 }
 0x5be   :  { %v1680_v6 = vmul.f32 %v1994_v16, %v1679_v20 }
 0x5bf   :  { %v1996_v22 = vpop.eup %1995  ;;  %v1666_v1 = vadd.f32 %v1992_v5, %v1665_v19 }
 0x5c0   :  { %v1693_v26 = vmul.f32 %v1996_v22, %v1661_v3  ;;  %v1681_v30 = vadd.f32 %v1994_v16, %v1680_v6  ;;  %v1998_v34 = vpop.eup %1997  ;;  %vm1698_vm12 = vweird.f32 %v1996_v22 }
 0x5c1   :  { %v1670_v33 = vsel %vm1669_vm8, %v1992_v5, %v1666_v1  ;;  %vm1699_vm14 = vmor %vm1697_vm13, %vm1698_vm12 }
 0x5c2   :  { %v1694_v35 = vsub.f32 1.0, %v1693_v26  ;;  %v1675_v36 = vsel %vm1672_vm10, %v1674_v29, %v1670_v33  ;;  %v1685_v37 = vsel %vm1684_vm9, %v1994_v16, %v1681_v30 }
 0x5c3   :  { %v1690_v38 = vsel %vm1687_vm11, %v1689_v31, %v1685_v37  ;;  %v1709_v41 = vmul.f32 %v1998_v34, %v1675_v36 }
 0x5c4   :  { %v1708_v42 = vmul.f32 %v1690_v38, %v3309_v32  ;;  %v1695_v40 = vmul.f32 %v1996_v22, %v1694_v35  ;;  %v1872_v32 = vld [vmem:[%s3336_s7] ss:$0 sm:$0xff]  ;;  %s1782_s7 = sshll.u32 %s3337_s8, 4  ;;  %s1783_s7 = int_to_ptr.hbm [resolvable:$true] %s1782_s7 }
 0x5c6   :  { %v1710_v43 = vadd.f32 %v1709_v41, %v1708_v42  ;;  %v1696_v63 = vadd.f32 %v1996_v22, %v1695_v40 }
 0x5c8   :  { %1999 = vtanh.f32 %v1710_v43  ;;  %1714 = vst [vmem:[#allocation18] sm:$0xff] %v1710_v43  ;;  %v1700_v45 = vsel %vm1699_vm14, %v1996_v22, %v1696_v63 }
 0x5c9   :  { %v1705_v52 = vsel %vm1702_vm15, %v1704_v62, %v1700_v45 }
 0x5ce   :  { %v2000_v25 = vpop.eup %1999 }
 0x5cf   :  { %v1712_v48 = vmul.f32 %v2000_v25, %v1705_v52 }
 0x5d1   :  { %1751 = vmatmul.f32.vlgmr.msrb.gmra.mxu0 %v1712_v48  ;;  %1713 = vst [vmem:[#allocation16] sm:$0xff] %v1712_v48 }
 0x5d2   :  { %1796 = dma.vmem_to_hbm [thread:$0]  %s1792_s28, 128, %s1794_s27, [#allocation17]  }
 0x5d3   :  { %1807 = dma.vmem_to_hbm [thread:$0]  %s1803_s30, 128, %s1805_s12, [#allocation17]  }
 0x64e   :  { %v1752_v55 = vpop.f32.mrf.mxu0 }
 0x64f   :  { %v1753_v50 = vadd.f32 %v1872_v32, %v1752_v55 }
 0x651   :  { %v1857_v44 = vmul.f32 -1.442695, %v1753_v50 }
 0x653   :  { %2001 = vpow2.f32 %v1857_v44 }
 0x659   :  { %v2002_v39 = vpop.eup %2001 }
 0x65a   :  { %v1758_v51 = vadd.f32 1.0, %v2002_v39 }
 0x65c   :  { %2003 = vrcp.f32 %v1758_v51  ;;  %v1770_v47 = vand.u32 2147483648, %v1758_v51  ;;  %v1768_v56 = vand.u32 2147483647, %v1758_v51  ;;  %vm1764_vm1 = vweird.f32 %v1758_v51 }
 0x65e   :  { %v1771_v60 = vor.u32 1.1754944e-38, %v1770_v47  ;;  %vm1769_vm3 = vcmp.eq.f32.partialorder %v1768_v56, 8.507059e+37 }
 0x662   :  { %v2004_v58 = vpop.eup %2003 }
 0x663   :  { %v1760_v0 = vmul.f32 %v2004_v58, %v1758_v51  ;;  %vm1765_vm0 = vweird.f32 %v2004_v58 }
 0x664   :  { %vm1766_vm2 = vmor %vm1764_vm1, %vm1765_vm0 }
 0x665   :  { %v1761_v59 = vsub.f32 1.0, %v1760_v0 }
 0x667   :  { %v1762_v46 = vmul.f32 %v2004_v58, %v1761_v59 }
 0x669   :  { %v1763_v54 = vadd.f32 %v2004_v58, %v1762_v46 }
 0x66b   :  { %v1767_v13 = vsel %vm1766_vm2, %v2004_v58, %v1763_v54 }
 0x66c   :  { %v1772_v61 = vsel %vm1769_vm3, %v1771_v60, %v1767_v13 }
 0x66d   :  { %1774 = vst [vmem:[#allocation15] sm:$0xff] %v1772_v61 }
 0x66e   :  { %1785 = dma.vmem_to_hbm [thread:$0]  %s1781_s10, 128, %s1783_s7, [#allocation5]  }
 0x66f   :  { %2317 = dma.done.wait [#allocation5], 128  }
 0x670   :  { %2318 = vsyncadd [#allocation5], 4294967168 }
 0x671   :  { %2319 = dma.done.wait [#allocation17], 256  }
 0x672   :  { %2320 = vsyncadd [#allocation17], 4294967040 }
 0x673   :  { %1820 = vsyncpa [#allocation4], 1 }
 0x674   :  { %1821 = vsyncpa [#allocation7], 1 }
 0x675   :  { %1822 = vsyncpa [#allocation10], 1 }
 0x676   :  { %1823 = vsyncpa [#allocation13], 1 }
 0x677   :  { %1824 = vsyncpa [#allocation5], 1 }
 0x678   :  { %1825 = vsyncpa [#allocation17], 1 }

</bundles_post_ra>
